<compile_context>
chip_gen: v5e
topology: v5e:2x2
jax: 0.10.0
libtpu: 0.0.40
codegen_flags: <defaults>
</compile_context>

<pallas_src>
import functools

import jax
import jax.numpy as jnp
from jax import lax
from jax.experimental import pallas as pl
from jax.experimental.pallas import tpu as pltpu

HIDDEN = 256
HEAD_HIDDEN = 128
_LANE = 128


def _round_up(n, m):
    return ((n + m - 1) // m) * m


def _pick_chunk(T, max_tt=8):
    """Timesteps per grid step (must divide T)."""
    for tt in range(min(T, max_tt), 0, -1):
        if T % tt == 0:
            return tt
    return 1


# ---------------------------------------------------------------------------
# Fused Pallas kernel: recurrence + actor/critic heads
# ---------------------------------------------------------------------------
def lstm_fused_kernel(gx_ref, whh_ref, h0_ref, c0_ref,
                      aw1_ref, ab1_ref, aw2_ref, ab2_ref,
                      cw1_ref, cb1_ref, cw2_ref, cb2_ref,
                      h_out_ref, c_out_ref, probs_ref, vals_ref,
                      h_scr, c_scr):
    step = pl.program_id(0)

    @pl.when(step == 0)
    def _():
        h_scr[...] = h0_ref[...]
        c_scr[...] = c0_ref[...]

    H = h_scr.shape[-1]
    TT = gx_ref.shape[0]
    whh = whh_ref[...]                                   # (H, 4H) bf16, VMEM-resident

    def body(t, carry):
        h, c = carry
        # Only the recurrent matmul is on the serial path; x @ W_ih + b was hoisted.
        gates = gx_ref[t] + jnp.dot(h.astype(jnp.bfloat16), whh,
                                    preferred_element_type=jnp.float32)  # (B, 4H) f32
        sig = jax.nn.sigmoid(gates)                      # one large EUP push
        i = sig[:, 0 * H:1 * H]
        f = sig[:, 1 * H:2 * H]
        o = sig[:, 3 * H:4 * H]
        g = jnp.tanh(gates[:, 2 * H:3 * H])
        c = f * c + i * g                                # f32 elementwise (v5e-safe)
        h = o * jnp.tanh(c)
        return h, c

    h, c = lax.fori_loop(0, TT, body, (h_scr[...], c_scr[...]), unroll=True)
    h_scr[...] = h
    c_scr[...] = c

    @pl.when(step == pl.num_programs(0) - 1)
    def _():
        h_out_ref[...] = h
        c_out_ref[...] = c

        hb = h.astype(jnp.bfloat16)
        # Actor head: Linear(256,128) -> ReLU -> Linear(128, P_a) -> Softmax.
        ah = jnp.maximum(
            jnp.dot(hb, aw1_ref[...], preferred_element_type=jnp.float32) + ab1_ref[...],
            0.0)
        logits = (jnp.dot(ah.astype(jnp.bfloat16), aw2_ref[...],
                          preferred_element_type=jnp.float32) + ab2_ref[...])
        m = jnp.max(logits, axis=-1, keepdims=True)
        e = jnp.exp(logits - m)                          # padded lanes -> exp(-1e30) = 0
        denom = jnp.sum(e, axis=-1, keepdims=True)
        probs_ref[...] = e * pl.reciprocal(denom, approx=False)

        # Critic head: Linear(256,128) -> ReLU -> Linear(128, P_c).
        ch = jnp.maximum(
            jnp.dot(hb, cw1_ref[...], preferred_element_type=jnp.float32) + cb1_ref[...],
            0.0)
        vals_ref[...] = (jnp.dot(ch.astype(jnp.bfloat16), cw2_ref[...],
                                 preferred_element_type=jnp.float32) + cb2_ref[...])


# ---------------------------------------------------------------------------
# Wrapper
# ---------------------------------------------------------------------------
def run_lstm_fused(gates_x, w_hh, h0, c0, aw1, ab1, aw2p, ab2p, cw1, cb1, cw2p, cb2p):
    """gates_x: (T, B, 4H) f32; returns (h_T, c_T, probs_padded, values_padded)."""
    T, B, G = gates_x.shape
    H = w_hh.shape[0]
    P_a = aw2p.shape[1]
    P_c = cw2p.shape[1]
    TT = _pick_chunk(T)
    n_chunks = T // TT

    const = lambda s: (0, 0)
    return pl.pallas_call(
        lstm_fused_kernel,
        out_shape=(jax.ShapeDtypeStruct((B, H), jnp.float32),
                   jax.ShapeDtypeStruct((B, H), jnp.float32),
                   jax.ShapeDtypeStruct((B, P_a), jnp.float32),
                   jax.ShapeDtypeStruct((B, P_c), jnp.float32)),
        grid=(n_chunks,),
        in_specs=[
            pl.BlockSpec((TT, B, G), lambda s: (s, 0, 0)),   # gates_x chunk
            pl.BlockSpec((H, G), const),                     # W_hh (bf16)
            pl.BlockSpec((B, H), const),                     # h0
            pl.BlockSpec((B, H), const),                     # c0
            pl.BlockSpec((H, HEAD_HIDDEN), const),           # actor W1 (bf16)
            pl.BlockSpec((1, HEAD_HIDDEN), const),           # actor b1
            pl.BlockSpec((HEAD_HIDDEN, P_a), const),         # actor W2 (bf16, lane-padded)
            pl.BlockSpec((1, P_a), const),                   # actor b2 (lane-padded)
            pl.BlockSpec((H, HEAD_HIDDEN), const),           # critic W1 (bf16)
            pl.BlockSpec((1, HEAD_HIDDEN), const),           # critic b1
            pl.BlockSpec((HEAD_HIDDEN, P_c), const),         # critic W2 (bf16, lane-padded)
            pl.BlockSpec((1, P_c), const),                   # critic b2 (lane-padded)
        ],
        out_specs=[pl.BlockSpec((B, H), const),
                   pl.BlockSpec((B, H), const),
                   pl.BlockSpec((B, P_a), const),
                   pl.BlockSpec((B, P_c), const)],
        scratch_shapes=[pltpu.VMEM((B, H), jnp.float32),
                        pltpu.VMEM((B, H), jnp.float32)],
        compiler_params=pltpu.CompilerParams(
            dimension_semantics=("arbitrary",)),             # time axis is sequential
    )(gates_x, w_hh, h0, c0, aw1, ab1, aw2p, ab2p, cw1, cb1, cw2p, cb2p)


def init_params(key, input_dim, output_dim, hidden=HIDDEN, head_hidden=HEAD_HIDDEN):
    ks = jax.random.split(key, 12)

    def u(k, shape, fan_in):
        s = 1.0 / jnp.sqrt(fan_in)
        return jax.random.uniform(k, shape, jnp.float32, minval=-s, maxval=s)

    return {
        # LSTM (transposed vs PyTorch: (in, 4H)); separate b_ih / b_hh like PyTorch.
        "w_ih": u(ks[0], (input_dim, 4 * hidden), hidden),
        "w_hh": u(ks[1], (hidden, 4 * hidden), hidden).astype(jnp.bfloat16),
        "b_ih": u(ks[2], (1, 4 * hidden), hidden),
        "b_hh": u(ks[3], (1, 4 * hidden), hidden),
        # actor head
        "aw1": u(ks[4], (hidden, head_hidden), hidden).astype(jnp.bfloat16),
        "ab1": u(ks[5], (1, head_hidden), hidden),
        "aw2": u(ks[6], (head_hidden, output_dim), head_hidden).astype(jnp.bfloat16),
        "ab2": u(ks[7], (1, output_dim), head_hidden),
        # critic head
        "cw1": u(ks[8], (hidden, head_hidden), hidden).astype(jnp.bfloat16),
        "cb1": u(ks[9], (1, head_hidden), hidden),
        "cw2": u(ks[10], (head_hidden, 1), head_hidden).astype(jnp.bfloat16),
        "cb2": u(ks[11], (1, 1), head_hidden),
    }


@functools.partial(jax.jit, static_argnames=("output_dim",))
def lstm_forward(params, x, output_dim, hidden_state=None):
    """Mirrors LSTM.forward: x is (B, T, D) or (T, D); shared_network=None."""
    # TODO(synk): shared_network branch of the PyTorch module is not implemented
    # (constructor default is None).
    if x.ndim == 2:                                   # x.unsqueeze(0)
        x = x[None, :, :]
    B, T, D = x.shape
    H = params["w_hh"].shape[0]
    if hidden_state is None:
        h0 = jnp.zeros((B, H), jnp.float32)
        c0 = jnp.zeros((B, H), jnp.float32)
    else:
        h0 = hidden_state[0][0].astype(jnp.float32)
        c0 = hidden_state[1][0].astype(jnp.float32)

    x_tbd = jnp.transpose(x, (1, 0, 2)).astype(jnp.float32)       # (T, B, D)

    # Hoisted input projection: single batched matmul over all T*B rows (XLA),
    # so the recurrent kernel only does h @ W_hh per timestep.
    bias = params["b_ih"] + params["b_hh"]                        # (1, 4H)
    gates_x = jnp.einsum("tbd,dg->tbg", x_tbd, params["w_ih"]) + bias[None]

    # Lane-dense (128-padded) head output weights; padded actor logits get a very
    # negative bias so their softmax probability is exactly zero.
    P_a = _round_up(max(output_dim, 1), _LANE)
    P_c = _LANE
    aw2p = jnp.zeros((HEAD_HIDDEN, P_a), jnp.bfloat16).at[:, :output_dim].set(params["aw2"])
    ab2p = jnp.full((1, P_a), -1e30, jnp.float32).at[:, :output_dim].set(params["ab2"])
    cw2p = jnp.zeros((HEAD_HIDDEN, P_c), jnp.bfloat16).at[:, :1].set(params["cw2"])
    cb2p = jnp.zeros((1, P_c), jnp.float32).at[:, :1].set(params["cb2"])

    h_last, c_last, probs_pad, vals_pad = run_lstm_fused(
        gates_x, params["w_hh"], h0, c0,
        params["aw1"], params["ab1"], aw2p, ab2p,
        params["cw1"], params["cb1"], cw2p, cb2p)

    probs = probs_pad[:, :output_dim]
    values = vals_pad[:, :1]
    # lstm_out[:, -1, :] == h_n for a single-layer unidirectional LSTM.
    hidden_out = (h_last[None, :, :], c_last[None, :, :])          # (1, B, H) each
    return probs, values, hidden_out


if __name__ == "__main__":
    B, T, D = 2, 8, 16
    OUTPUT_DIM = 4

    key = jax.random.PRNGKey(0)
    pkey, xkey = jax.random.split(key)
    params = init_params(pkey, input_dim=D, output_dim=OUTPUT_DIM)
    x = jax.random.normal(xkey, (B, T, D), jnp.float32)

    probs, values, hidden_state = lstm_forward(params, x, OUTPUT_DIM)
    jax.block_until_ready((probs, values, hidden_state))

    assert probs.shape == (B, OUTPUT_DIM)
    assert values.shape == (B, 1)
    assert hidden_state[0].shape == (1, B, HIDDEN)
    assert hidden_state[1].shape == (1, B, HIDDEN)
    assert bool(jnp.all(probs >= 0.0))
    assert jnp.allclose(jnp.sum(probs, axis=-1), 1.0, atol=1e-5)
    print("KERNEL_OK")
</pallas_src>

<mosaic_0001>
module attributes {stable_mosaic.version = 11 : i64} {
  func.func @lstm_fused_kernel(%arg0: i32, %arg1: memref<8x2x1024xf32, #tpu.memory_space<vmem>>, %arg2: memref<256x1024xbf16, #tpu.memory_space<vmem>>, %arg3: memref<2x256xf32, #tpu.memory_space<vmem>>, %arg4: memref<2x256xf32, #tpu.memory_space<vmem>>, %arg5: memref<256x128xbf16, #tpu.memory_space<vmem>>, %arg6: memref<1x128xf32, #tpu.memory_space<vmem>>, %arg7: memref<128x128xbf16, #tpu.memory_space<vmem>>, %arg8: memref<1x128xf32, #tpu.memory_space<vmem>>, %arg9: memref<256x128xbf16, #tpu.memory_space<vmem>>, %arg10: memref<1x128xf32, #tpu.memory_space<vmem>>, %arg11: memref<128x128xbf16, #tpu.memory_space<vmem>>, %arg12: memref<1x128xf32, #tpu.memory_space<vmem>>, %arg13: memref<2x256xf32, #tpu.memory_space<vmem>>, %arg14: memref<2x256xf32, #tpu.memory_space<vmem>>, %arg15: memref<2x128xf32, #tpu.memory_space<vmem>>, %arg16: memref<2x128xf32, #tpu.memory_space<vmem>>, %arg17: memref<2x256xf32, #tpu.memory_space<vmem>>, %arg18: memref<2x256xf32, #tpu.memory_space<vmem>>) attributes {dimension_semantics = [#tpu.dimension_semantics<arbitrary>], iteration_bounds = array<i64: 1>, scalar_prefetch = 0 : i64, scratch_operands = 2 : i64, tpu.core_type = #tpu.core_type<tc>, window_params = [{transform_indices = @transform_0, window_bounds = array<i64: 8, 2, 1024>}, {pipeline_mode = #tpu.pipeline_mode<synchronous>, transform_indices = @transform_1, window_bounds = array<i64: 256, 1024>}, {pipeline_mode = #tpu.pipeline_mode<synchronous>, transform_indices = @transform_2, window_bounds = array<i64: 2, 256>}, {pipeline_mode = #tpu.pipeline_mode<synchronous>, transform_indices = @transform_3, window_bounds = array<i64: 2, 256>}, {pipeline_mode = #tpu.pipeline_mode<synchronous>, transform_indices = @transform_4, window_bounds = array<i64: 256, 128>}, {pipeline_mode = #tpu.pipeline_mode<synchronous>, transform_indices = @transform_5, window_bounds = array<i64: 1, 128>}, {pipeline_mode = #tpu.pipeline_mode<synchronous>, transform_indices = @transform_6, window_bounds = array<i64: 128, 128>}, {pipeline_mode = #tpu.pipeline_mode<synchronous>, transform_indices = @transform_7, window_bounds = array<i64: 1, 128>}, {pipeline_mode = #tpu.pipeline_mode<synchronous>, transform_indices = @transform_8, window_bounds = array<i64: 256, 128>}, {pipeline_mode = #tpu.pipeline_mode<synchronous>, transform_indices = @transform_9, window_bounds = array<i64: 1, 128>}, {pipeline_mode = #tpu.pipeline_mode<synchronous>, transform_indices = @transform_10, window_bounds = array<i64: 128, 128>}, {pipeline_mode = #tpu.pipeline_mode<synchronous>, transform_indices = @transform_11, window_bounds = array<i64: 1, 128>}, {pipeline_mode = #tpu.pipeline_mode<synchronous>, transform_indices = @transform_12, window_bounds = array<i64: 2, 256>}, {pipeline_mode = #tpu.pipeline_mode<synchronous>, transform_indices = @transform_13, window_bounds = array<i64: 2, 256>}, {pipeline_mode = #tpu.pipeline_mode<synchronous>, transform_indices = @transform_14, window_bounds = array<i64: 2, 128>}, {pipeline_mode = #tpu.pipeline_mode<synchronous>, transform_indices = @transform_15, window_bounds = array<i64: 2, 128>}]} {
    %c0_i32 = arith.constant 0 : i32
    %0 = arith.cmpi eq, %arg0, %c0_i32 : i32
    %1 = arith.extui %0 : i1 to i32
    %c0_i32_0 = arith.constant 0 : i32
    %2 = arith.cmpi ne, %1, %c0_i32_0 : i32
    scf.if %2 {
      %c0_44 = arith.constant 0 : index
      %c0_45 = arith.constant 0 : index
      %179 = vector.load %arg3[%c0_44, %c0_45] : memref<2x256xf32, #tpu.memory_space<vmem>>, vector<2x256xf32>
      %c0_46 = arith.constant 0 : index
      %c0_47 = arith.constant 0 : index
      %180 = vector.load %arg17[%c0_46, %c0_47] : memref<2x256xf32, #tpu.memory_space<vmem>>, vector<2x256xf32>
      tpu.vector_store %arg17[%c0_46, %c0_47], %179 {strides = array<i32>} : memref<2x256xf32, #tpu.memory_space<vmem>>, vector<2x256xf32>,
      %c0_48 = arith.constant 0 : index
      %c0_49 = arith.constant 0 : index
      %181 = vector.load %arg4[%c0_48, %c0_49] : memref<2x256xf32, #tpu.memory_space<vmem>>, vector<2x256xf32>
      %c0_50 = arith.constant 0 : index
      %c0_51 = arith.constant 0 : index
      %182 = vector.load %arg18[%c0_50, %c0_51] : memref<2x256xf32, #tpu.memory_space<vmem>>, vector<2x256xf32>
      tpu.vector_store %arg18[%c0_50, %c0_51], %181 {strides = array<i32>} : memref<2x256xf32, #tpu.memory_space<vmem>>, vector<2x256xf32>,
    } else {
    }
    %c0 = arith.constant 0 : index
    %c0_1 = arith.constant 0 : index
    %3 = vector.load %arg2[%c0, %c0_1] : memref<256x1024xbf16, #tpu.memory_space<vmem>>, vector<256x1024xbf16>
    %c0_2 = arith.constant 0 : index
    %c0_3 = arith.constant 0 : index
    %4 = vector.load %arg17[%c0_2, %c0_3] : memref<2x256xf32, #tpu.memory_space<vmem>>, vector<2x256xf32>
    %c0_4 = arith.constant 0 : index
    %c0_5 = arith.constant 0 : index
    %5 = vector.load %arg18[%c0_4, %c0_5] : memref<2x256xf32, #tpu.memory_space<vmem>>, vector<2x256xf32>
    %c0_i32_6 = arith.constant 0 : i32
    %6 = arith.index_cast %c0_i32_6 : i32 to index
    %c0_7 = arith.constant 0 : index
    %c0_8 = arith.constant 0 : index
    %7 = vector.load %arg1[%6, %c0_7, %c0_8] : memref<8x2x1024xf32, #tpu.memory_space<vmem>>, vector<1x2x1024xf32>
    %8 = vector.shape_cast %7 : vector<1x2x1024xf32> to vector<2x1024xf32>
    %9 = arith.truncf %4 : vector<2x256xf32> to vector<2x256xbf16>
    %cst = arith.constant dense<0.000000e+00> : vector<2x1024xf32>
    %10 = tpu.matmul %9, %3, %cst {dimension_numbers = #tpu.dot_dimension_numbers<[1], [0], [0], [1], [0, 0, 1, 1], [], []>} : vector<2x256xbf16>, vector<256x1024xbf16>, vector<2x1024xf32> -> vector<2x1024xf32>
    %11 = arith.addf %8, %10 : vector<2x1024xf32>
    %12 = arith.negf %11 : vector<2x1024xf32>
    %13 = math.exp %12 : vector<2x1024xf32>
    %cst_9 = arith.constant 1.000000e+00 : f32
    %14 = vector.broadcast %cst_9 : f32 to vector<2x1024xf32>
    %15 = arith.addf %14, %13 : vector<2x1024xf32>
    %16 = arith.divf %14, %15 : vector<2x1024xf32>
    %17 = vector.extract_strided_slice %16 {offsets = [0, 0], sizes = [2, 256], strides = [1, 1]} : vector<2x1024xf32> to vector<2x256xf32>
    %18 = vector.extract_strided_slice %16 {offsets = [0, 256], sizes = [2, 256], strides = [1, 1]} : vector<2x1024xf32> to vector<2x256xf32>
    %19 = vector.extract_strided_slice %16 {offsets = [0, 768], sizes = [2, 256], strides = [1, 1]} : vector<2x1024xf32> to vector<2x256xf32>
    %20 = vector.extract_strided_slice %11 {offsets = [0, 512], sizes = [2, 256], strides = [1, 1]} : vector<2x1024xf32> to vector<2x256xf32>
    %21 = math.tanh %20 : vector<2x256xf32>
    %22 = arith.mulf %18, %5 : vector<2x256xf32>
    %23 = arith.mulf %17, %21 : vector<2x256xf32>
    %24 = arith.addf %22, %23 : vector<2x256xf32>
    %25 = math.tanh %24 : vector<2x256xf32>
    %26 = arith.mulf %19, %25 : vector<2x256xf32>
    %c1_i32 = arith.constant 1 : i32
    %27 = arith.index_cast %c1_i32 : i32 to index
    %c0_10 = arith.constant 0 : index
    %c0_11 = arith.constant 0 : index
    %28 = vector.load %arg1[%27, %c0_10, %c0_11] : memref<8x2x1024xf32, #tpu.memory_space<vmem>>, vector<1x2x1024xf32>
    %29 = vector.shape_cast %28 : vector<1x2x1024xf32> to vector<2x1024xf32>
    %30 = arith.truncf %26 : vector<2x256xf32> to vector<2x256xbf16>
    %cst_12 = arith.constant dense<0.000000e+00> : vector<2x1024xf32>
    %31 = tpu.matmul %30, %3, %cst_12 {dimension_numbers = #tpu.dot_dimension_numbers<[1], [0], [0], [1], [0, 0, 1, 1], [], []>} : vector<2x256xbf16>, vector<256x1024xbf16>, vector<2x1024xf32> -> vector<2x1024xf32>
    %32 = arith.addf %29, %31 : vector<2x1024xf32>
    %33 = arith.negf %32 : vector<2x1024xf32>
    %34 = math.exp %33 : vector<2x1024xf32>
    %cst_13 = arith.constant 1.000000e+00 : f32
    %35 = vector.broadcast %cst_13 : f32 to vector<2x1024xf32>
    %36 = arith.addf %35, %34 : vector<2x1024xf32>
    %37 = arith.divf %35, %36 : vector<2x1024xf32>
    %38 = vector.extract_strided_slice %37 {offsets = [0, 0], sizes = [2, 256], strides = [1, 1]} : vector<2x1024xf32> to vector<2x256xf32>
    %39 = vector.extract_strided_slice %37 {offsets = [0, 256], sizes = [2, 256], strides = [1, 1]} : vector<2x1024xf32> to vector<2x256xf32>
    %40 = vector.extract_strided_slice %37 {offsets = [0, 768], sizes = [2, 256], strides = [1, 1]} : vector<2x1024xf32> to vector<2x256xf32>
    %41 = vector.extract_strided_slice %32 {offsets = [0, 512], sizes = [2, 256], strides = [1, 1]} : vector<2x1024xf32> to vector<2x256xf32>
    %42 = math.tanh %41 : vector<2x256xf32>
    %43 = arith.mulf %39, %24 : vector<2x256xf32>
    %44 = arith.mulf %38, %42 : vector<2x256xf32>
    %45 = arith.addf %43, %44 : vector<2x256xf32>
    %46 = math.tanh %45 : vector<2x256xf32>
    %47 = arith.mulf %40, %46 : vector<2x256xf32>
    %c2_i32 = arith.constant 2 : i32
    %48 = arith.index_cast %c2_i32 : i32 to index
    %c0_14 = arith.constant 0 : index
    %c0_15 = arith.constant 0 : index
    %49 = vector.load %arg1[%48, %c0_14, %c0_15] : memref<8x2x1024xf32, #tpu.memory_space<vmem>>, vector<1x2x1024xf32>
    %50 = vector.shape_cast %49 : vector<1x2x1024xf32> to vector<2x1024xf32>
    %51 = arith.truncf %47 : vector<2x256xf32> to vector<2x256xbf16>
    %cst_16 = arith.constant dense<0.000000e+00> : vector<2x1024xf32>
    %52 = tpu.matmul %51, %3, %cst_16 {dimension_numbers = #tpu.dot_dimension_numbers<[1], [0], [0], [1], [0, 0, 1, 1], [], []>} : vector<2x256xbf16>, vector<256x1024xbf16>, vector<2x1024xf32> -> vector<2x1024xf32>
    %53 = arith.addf %50, %52 : vector<2x1024xf32>
    %54 = arith.negf %53 : vector<2x1024xf32>
    %55 = math.exp %54 : vector<2x1024xf32>
    %cst_17 = arith.constant 1.000000e+00 : f32
    %56 = vector.broadcast %cst_17 : f32 to vector<2x1024xf32>
    %57 = arith.addf %56, %55 : vector<2x1024xf32>
    %58 = arith.divf %56, %57 : vector<2x1024xf32>
    %59 = vector.extract_strided_slice %58 {offsets = [0, 0], sizes = [2, 256], strides = [1, 1]} : vector<2x1024xf32> to vector<2x256xf32>
    %60 = vector.extract_strided_slice %58 {offsets = [0, 256], sizes = [2, 256], strides = [1, 1]} : vector<2x1024xf32> to vector<2x256xf32>
    %61 = vector.extract_strided_slice %58 {offsets = [0, 768], sizes = [2, 256], strides = [1, 1]} : vector<2x1024xf32> to vector<2x256xf32>
    %62 = vector.extract_strided_slice %53 {offsets = [0, 512], sizes = [2, 256], strides = [1, 1]} : vector<2x1024xf32> to vector<2x256xf32>
    %63 = math.tanh %62 : vector<2x256xf32>
    %64 = arith.mulf %60, %45 : vector<2x256xf32>
    %65 = arith.mulf %59, %63 : vector<2x256xf32>
    %66 = arith.addf %64, %65 : vector<2x256xf32>
    %67 = math.tanh %66 : vector<2x256xf32>
    %68 = arith.mulf %61, %67 : vector<2x256xf32>
    %c3_i32 = arith.constant 3 : i32
    %69 = arith.index_cast %c3_i32 : i32 to index
    %c0_18 = arith.constant 0 : index
    %c0_19 = arith.constant 0 : index
    %70 = vector.load %arg1[%69, %c0_18, %c0_19] : memref<8x2x1024xf32, #tpu.memory_space<vmem>>, vector<1x2x1024xf32>
    %71 = vector.shape_cast %70 : vector<1x2x1024xf32> to vector<2x1024xf32>
    %72 = arith.truncf %68 : vector<2x256xf32> to vector<2x256xbf16>
    %cst_20 = arith.constant dense<0.000000e+00> : vector<2x1024xf32>
    %73 = tpu.matmul %72, %3, %cst_20 {dimension_numbers = #tpu.dot_dimension_numbers<[1], [0], [0], [1], [0, 0, 1, 1], [], []>} : vector<2x256xbf16>, vector<256x1024xbf16>, vector<2x1024xf32> -> vector<2x1024xf32>
    %74 = arith.addf %71, %73 : vector<2x1024xf32>
    %75 = arith.negf %74 : vector<2x1024xf32>
    %76 = math.exp %75 : vector<2x1024xf32>
    %cst_21 = arith.constant 1.000000e+00 : f32
    %77 = vector.broadcast %cst_21 : f32 to vector<2x1024xf32>
    %78 = arith.addf %77, %76 : vector<2x1024xf32>
    %79 = arith.divf %77, %78 : vector<2x1024xf32>
    %80 = vector.extract_strided_slice %79 {offsets = [0, 0], sizes = [2, 256], strides = [1, 1]} : vector<2x1024xf32> to vector<2x256xf32>
    %81 = vector.extract_strided_slice %79 {offsets = [0, 256], sizes = [2, 256], strides = [1, 1]} : vector<2x1024xf32> to vector<2x256xf32>
    %82 = vector.extract_strided_slice %79 {offsets = [0, 768], sizes = [2, 256], strides = [1, 1]} : vector<2x1024xf32> to vector<2x256xf32>
    %83 = vector.extract_strided_slice %74 {offsets = [0, 512], sizes = [2, 256], strides = [1, 1]} : vector<2x1024xf32> to vector<2x256xf32>
    %84 = math.tanh %83 : vector<2x256xf32>
    %85 = arith.mulf %81, %66 : vector<2x256xf32>
    %86 = arith.mulf %80, %84 : vector<2x256xf32>
    %87 = arith.addf %85, %86 : vector<2x256xf32>
    %88 = math.tanh %87 : vector<2x256xf32>
    %89 = arith.mulf %82, %88 : vector<2x256xf32>
    %c4_i32 = arith.constant 4 : i32
    %90 = arith.index_cast %c4_i32 : i32 to index
    %c0_22 = arith.constant 0 : index
    %c0_23 = arith.constant 0 : index
    %91 = vector.load %arg1[%90, %c0_22, %c0_23] : memref<8x2x1024xf32, #tpu.memory_space<vmem>>, vector<1x2x1024xf32>
    %92 = vector.shape_cast %91 : vector<1x2x1024xf32> to vector<2x1024xf32>
    %93 = arith.truncf %89 : vector<2x256xf32> to vector<2x256xbf16>
    %cst_24 = arith.constant dense<0.000000e+00> : vector<2x1024xf32>
    %94 = tpu.matmul %93, %3, %cst_24 {dimension_numbers = #tpu.dot_dimension_numbers<[1], [0], [0], [1], [0, 0, 1, 1], [], []>} : vector<2x256xbf16>, vector<256x1024xbf16>, vector<2x1024xf32> -> vector<2x1024xf32>
    %95 = arith.addf %92, %94 : vector<2x1024xf32>
    %96 = arith.negf %95 : vector<2x1024xf32>
    %97 = math.exp %96 : vector<2x1024xf32>
    %cst_25 = arith.constant 1.000000e+00 : f32
    %98 = vector.broadcast %cst_25 : f32 to vector<2x1024xf32>
    %99 = arith.addf %98, %97 : vector<2x1024xf32>
    %100 = arith.divf %98, %99 : vector<2x1024xf32>
    %101 = vector.extract_strided_slice %100 {offsets = [0, 0], sizes = [2, 256], strides = [1, 1]} : vector<2x1024xf32> to vector<2x256xf32>
    %102 = vector.extract_strided_slice %100 {offsets = [0, 256], sizes = [2, 256], strides = [1, 1]} : vector<2x1024xf32> to vector<2x256xf32>
    %103 = vector.extract_strided_slice %100 {offsets = [0, 768], sizes = [2, 256], strides = [1, 1]} : vector<2x1024xf32> to vector<2x256xf32>
    %104 = vector.extract_strided_slice %95 {offsets = [0, 512], sizes = [2, 256], strides = [1, 1]} : vector<2x1024xf32> to vector<2x256xf32>
    %105 = math.tanh %104 : vector<2x256xf32>
    %106 = arith.mulf %102, %87 : vector<2x256xf32>
    %107 = arith.mulf %101, %105 : vector<2x256xf32>
    %108 = arith.addf %106, %107 : vector<2x256xf32>
    %109 = math.tanh %108 : vector<2x256xf32>
    %110 = arith.mulf %103, %109 : vector<2x256xf32>
    %c5_i32 = arith.constant 5 : i32
    %111 = arith.index_cast %c5_i32 : i32 to index
    %c0_26 = arith.constant 0 : index
    %c0_27 = arith.constant 0 : index
    %112 = vector.load %arg1[%111, %c0_26, %c0_27] : memref<8x2x1024xf32, #tpu.memory_space<vmem>>, vector<1x2x1024xf32>
    %113 = vector.shape_cast %112 : vector<1x2x1024xf32> to vector<2x1024xf32>
    %114 = arith.truncf %110 : vector<2x256xf32> to vector<2x256xbf16>
    %cst_28 = arith.constant dense<0.000000e+00> : vector<2x1024xf32>
    %115 = tpu.matmul %114, %3, %cst_28 {dimension_numbers = #tpu.dot_dimension_numbers<[1], [0], [0], [1], [0, 0, 1, 1], [], []>} : vector<2x256xbf16>, vector<256x1024xbf16>, vector<2x1024xf32> -> vector<2x1024xf32>
    %116 = arith.addf %113, %115 : vector<2x1024xf32>
    %117 = arith.negf %116 : vector<2x1024xf32>
    %118 = math.exp %117 : vector<2x1024xf32>
    %cst_29 = arith.constant 1.000000e+00 : f32
    %119 = vector.broadcast %cst_29 : f32 to vector<2x1024xf32>
    %120 = arith.addf %119, %118 : vector<2x1024xf32>
    %121 = arith.divf %119, %120 : vector<2x1024xf32>
    %122 = vector.extract_strided_slice %121 {offsets = [0, 0], sizes = [2, 256], strides = [1, 1]} : vector<2x1024xf32> to vector<2x256xf32>
    %123 = vector.extract_strided_slice %121 {offsets = [0, 256], sizes = [2, 256], strides = [1, 1]} : vector<2x1024xf32> to vector<2x256xf32>
    %124 = vector.extract_strided_slice %121 {offsets = [0, 768], sizes = [2, 256], strides = [1, 1]} : vector<2x1024xf32> to vector<2x256xf32>
    %125 = vector.extract_strided_slice %116 {offsets = [0, 512], sizes = [2, 256], strides = [1, 1]} : vector<2x1024xf32> to vector<2x256xf32>
    %126 = math.tanh %125 : vector<2x256xf32>
    %127 = arith.mulf %123, %108 : vector<2x256xf32>
    %128 = arith.mulf %122, %126 : vector<2x256xf32>
    %129 = arith.addf %127, %128 : vector<2x256xf32>
    %130 = math.tanh %129 : vector<2x256xf32>
    %131 = arith.mulf %124, %130 : vector<2x256xf32>
    %c6_i32 = arith.constant 6 : i32
    %132 = arith.index_cast %c6_i32 : i32 to index
    %c0_30 = arith.constant 0 : index
    %c0_31 = arith.constant 0 : index
    %133 = vector.load %arg1[%132, %c0_30, %c0_31] : memref<8x2x1024xf32, #tpu.memory_space<vmem>>, vector<1x2x1024xf32>
    %134 = vector.shape_cast %133 : vector<1x2x1024xf32> to vector<2x1024xf32>
    %135 = arith.truncf %131 : vector<2x256xf32> to vector<2x256xbf16>
    %cst_32 = arith.constant dense<0.000000e+00> : vector<2x1024xf32>
    %136 = tpu.matmul %135, %3, %cst_32 {dimension_numbers = #tpu.dot_dimension_numbers<[1], [0], [0], [1], [0, 0, 1, 1], [], []>} : vector<2x256xbf16>, vector<256x1024xbf16>, vector<2x1024xf32> -> vector<2x1024xf32>
    %137 = arith.addf %134, %136 : vector<2x1024xf32>
    %138 = arith.negf %137 : vector<2x1024xf32>
    %139 = math.exp %138 : vector<2x1024xf32>
    %cst_33 = arith.constant 1.000000e+00 : f32
    %140 = vector.broadcast %cst_33 : f32 to vector<2x1024xf32>
    %141 = arith.addf %140, %139 : vector<2x1024xf32>
    %142 = arith.divf %140, %141 : vector<2x1024xf32>
    %143 = vector.extract_strided_slice %142 {offsets = [0, 0], sizes = [2, 256], strides = [1, 1]} : vector<2x1024xf32> to vector<2x256xf32>
    %144 = vector.extract_strided_slice %142 {offsets = [0, 256], sizes = [2, 256], strides = [1, 1]} : vector<2x1024xf32> to vector<2x256xf32>
    %145 = vector.extract_strided_slice %142 {offsets = [0, 768], sizes = [2, 256], strides = [1, 1]} : vector<2x1024xf32> to vector<2x256xf32>
    %146 = vector.extract_strided_slice %137 {offsets = [0, 512], sizes = [2, 256], strides = [1, 1]} : vector<2x1024xf32> to vector<2x256xf32>
    %147 = math.tanh %146 : vector<2x256xf32>
    %148 = arith.mulf %144, %129 : vector<2x256xf32>
    %149 = arith.mulf %143, %147 : vector<2x256xf32>
    %150 = arith.addf %148, %149 : vector<2x256xf32>
    %151 = math.tanh %150 : vector<2x256xf32>
    %152 = arith.mulf %145, %151 : vector<2x256xf32>
    %c7_i32 = arith.constant 7 : i32
    %153 = arith.index_cast %c7_i32 : i32 to index
    %c0_34 = arith.constant 0 : index
    %c0_35 = arith.constant 0 : index
    %154 = vector.load %arg1[%153, %c0_34, %c0_35] : memref<8x2x1024xf32, #tpu.memory_space<vmem>>, vector<1x2x1024xf32>
    %155 = vector.shape_cast %154 : vector<1x2x1024xf32> to vector<2x1024xf32>
    %156 = arith.truncf %152 : vector<2x256xf32> to vector<2x256xbf16>
    %cst_36 = arith.constant dense<0.000000e+00> : vector<2x1024xf32>
    %157 = tpu.matmul %156, %3, %cst_36 {dimension_numbers = #tpu.dot_dimension_numbers<[1], [0], [0], [1], [0, 0, 1, 1], [], []>} : vector<2x256xbf16>, vector<256x1024xbf16>, vector<2x1024xf32> -> vector<2x1024xf32>
    %158 = arith.addf %155, %157 : vector<2x1024xf32>
    %159 = arith.negf %158 : vector<2x1024xf32>
    %160 = math.exp %159 : vector<2x1024xf32>
    %cst_37 = arith.constant 1.000000e+00 : f32
    %161 = vector.broadcast %cst_37 : f32 to vector<2x1024xf32>
    %162 = arith.addf %161, %160 : vector<2x1024xf32>
    %163 = arith.divf %161, %162 : vector<2x1024xf32>
    %164 = vector.extract_strided_slice %163 {offsets = [0, 0], sizes = [2, 256], strides = [1, 1]} : vector<2x1024xf32> to vector<2x256xf32>
    %165 = vector.extract_strided_slice %163 {offsets = [0, 256], sizes = [2, 256], strides = [1, 1]} : vector<2x1024xf32> to vector<2x256xf32>
    %166 = vector.extract_strided_slice %163 {offsets = [0, 768], sizes = [2, 256], strides = [1, 1]} : vector<2x1024xf32> to vector<2x256xf32>
    %167 = vector.extract_strided_slice %158 {offsets = [0, 512], sizes = [2, 256], strides = [1, 1]} : vector<2x1024xf32> to vector<2x256xf32>
    %168 = math.tanh %167 : vector<2x256xf32>
    %169 = arith.mulf %165, %150 : vector<2x256xf32>
    %170 = arith.mulf %164, %168 : vector<2x256xf32>
    %171 = arith.addf %169, %170 : vector<2x256xf32>
    %172 = math.tanh %171 : vector<2x256xf32>
    %173 = arith.mulf %166, %172 : vector<2x256xf32>
    %c8_i32 = arith.constant 8 : i32
    %c0_38 = arith.constant 0 : index
    %c0_39 = arith.constant 0 : index
    %174 = vector.load %arg17[%c0_38, %c0_39] : memref<2x256xf32, #tpu.memory_space<vmem>>, vector<2x256xf32>
    tpu.vector_store %arg17[%c0_38, %c0_39], %173 {strides = array<i32>} : memref<2x256xf32, #tpu.memory_space<vmem>>, vector<2x256xf32>,
    %c0_40 = arith.constant 0 : index
    %c0_41 = arith.constant 0 : index
    %175 = vector.load %arg18[%c0_40, %c0_41] : memref<2x256xf32, #tpu.memory_space<vmem>>, vector<2x256xf32>
    tpu.vector_store %arg18[%c0_40, %c0_41], %171 {strides = array<i32>} : memref<2x256xf32, #tpu.memory_space<vmem>>, vector<2x256xf32>,
    %c0_i32_42 = arith.constant 0 : i32
    %176 = arith.cmpi eq, %arg0, %c0_i32_42 : i32
    %177 = arith.extui %176 : i1 to i32
    %c0_i32_43 = arith.constant 0 : i32
    %178 = arith.cmpi ne, %177, %c0_i32_43 : i32
    scf.if %178 {
      %c0_44 = arith.constant 0 : index
      %c0_45 = arith.constant 0 : index
      %179 = vector.load %arg13[%c0_44, %c0_45] : memref<2x256xf32, #tpu.memory_space<vmem>>, vector<2x256xf32>
      tpu.vector_store %arg13[%c0_44, %c0_45], %173 {strides = array<i32>} : memref<2x256xf32, #tpu.memory_space<vmem>>, vector<2x256xf32>,
      %c0_46 = arith.constant 0 : index
      %c0_47 = arith.constant 0 : index
      %180 = vector.load %arg14[%c0_46, %c0_47] : memref<2x256xf32, #tpu.memory_space<vmem>>, vector<2x256xf32>
      tpu.vector_store %arg14[%c0_46, %c0_47], %171 {strides = array<i32>} : memref<2x256xf32, #tpu.memory_space<vmem>>, vector<2x256xf32>,
      %181 = arith.truncf %173 : vector<2x256xf32> to vector<2x256xbf16>
      %c0_48 = arith.constant 0 : index
      %c0_49 = arith.constant 0 : index
      %182 = vector.load %arg5[%c0_48, %c0_49] : memref<256x128xbf16, #tpu.memory_space<vmem>>, vector<256x128xbf16>
      %cst_50 = arith.constant dense<0.000000e+00> : vector<2x128xf32>
      %183 = tpu.matmul %181, %182, %cst_50 {dimension_numbers = #tpu.dot_dimension_numbers<[1], [0], [0], [1], [0, 0, 1, 1], [], []>} : vector<2x256xbf16>, vector<256x128xbf16>, vector<2x128xf32> -> vector<2x128xf32>
      %c0_51 = arith.constant 0 : index
      %c0_52 = arith.constant 0 : index
      %184 = vector.load %arg6[%c0_51, %c0_52] : memref<1x128xf32, #tpu.memory_space<vmem>>, vector<1x128xf32>
      %185 = vector.broadcast %184 : vector<1x128xf32> to vector<2x128xf32>
      %186 = arith.addf %183, %185 : vector<2x128xf32>
      %cst_53 = arith.constant 0.000000e+00 : f32
      %187 = vector.broadcast %cst_53 : f32 to vector<2x128xf32>
      %188 = arith.maximumf %186, %187 : vector<2x128xf32>
      %189 = arith.truncf %188 : vector<2x128xf32> to vector<2x128xbf16>
      %c0_54 = arith.constant 0 : index
      %c0_55 = arith.constant 0 : index
      %190 = vector.load %arg7[%c0_54, %c0_55] : memref<128x128xbf16, #tpu.memory_space<vmem>>, vector<128x128xbf16>
      %cst_56 = arith.constant dense<0.000000e+00> : vector<2x128xf32>
      %191 = tpu.matmul %189, %190, %cst_56 {dimension_numbers = #tpu.dot_dimension_numbers<[1], [0], [0], [1], [0, 0, 1, 1], [], []>} : vector<2x128xbf16>, vector<128x128xbf16>, vector<2x128xf32> -> vector<2x128xf32>
      %c0_57 = arith.constant 0 : index
      %c0_58 = arith.constant 0 : index
      %192 = vector.load %arg8[%c0_57, %c0_58] : memref<1x128xf32, #tpu.memory_space<vmem>>, vector<1x128xf32>
      %193 = vector.broadcast %192 : vector<1x128xf32> to vector<2x128xf32>
      %194 = arith.addf %191, %193 : vector<2x128xf32>
      %cst_59 = arith.constant dense<0xFF800000> : vector<2xf32>
      %195 = vector.multi_reduction <maximumf>, %194, %cst_59 [1] : vector<2x128xf32> to vector<2xf32>
      %196 = vector.shape_cast %195 : vector<2xf32> to vector<2x1xf32>
      %197 = vector.broadcast %196 : vector<2x1xf32> to vector<2x128xf32>
      %198 = arith.subf %194, %197 : vector<2x128xf32>
      %199 = math.exp %198 : vector<2x128xf32>
      %cst_60 = arith.constant dense<0.000000e+00> : vector<2xf32>
      %200 = vector.multi_reduction <add>, %199, %cst_60 [1] : vector<2x128xf32> to vector<2xf32>
      %201 = vector.shape_cast %200 : vector<2xf32> to vector<2x1xf32>
      %202 = tpu.reciprocal %201 : vector<2x1xf32> -> vector<2x1xf32>
      %203 = vector.broadcast %202 : vector<2x1xf32> to vector<2x128xf32>
      %204 = arith.mulf %199, %203 : vector<2x128xf32>
      %c0_61 = arith.constant 0 : index
      %c0_62 = arith.constant 0 : index
      %205 = vector.load %arg15[%c0_61, %c0_62] : memref<2x128xf32, #tpu.memory_space<vmem>>, vector<2x128xf32>
      tpu.vector_store %arg15[%c0_61, %c0_62], %204 {strides = array<i32>} : memref<2x128xf32, #tpu.memory_space<vmem>>, vector<2x128xf32>,
      %c0_63 = arith.constant 0 : index
      %c0_64 = arith.constant 0 : index
      %206 = vector.load %arg9[%c0_63, %c0_64] : memref<256x128xbf16, #tpu.memory_space<vmem>>, vector<256x128xbf16>
      %cst_65 = arith.constant dense<0.000000e+00> : vector<2x128xf32>
      %207 = tpu.matmul %181, %206, %cst_65 {dimension_numbers = #tpu.dot_dimension_numbers<[1], [0], [0], [1], [0, 0, 1, 1], [], []>} : vector<2x256xbf16>, vector<256x128xbf16>, vector<2x128xf32> -> vector<2x128xf32>
      %c0_66 = arith.constant 0 : index
      %c0_67 = arith.constant 0 : index
      %208 = vector.load %arg10[%c0_66, %c0_67] : memref<1x128xf32, #tpu.memory_space<vmem>>, vector<1x128xf32>
      %209 = vector.broadcast %208 : vector<1x128xf32> to vector<2x128xf32>
      %210 = arith.addf %207, %209 : vector<2x128xf32>
      %cst_68 = arith.constant 0.000000e+00 : f32
      %211 = vector.broadcast %cst_68 : f32 to vector<2x128xf32>
      %212 = arith.maximumf %210, %211 : vector<2x128xf32>
      %213 = arith.truncf %212 : vector<2x128xf32> to vector<2x128xbf16>
      %c0_69 = arith.constant 0 : index
      %c0_70 = arith.constant 0 : index
      %214 = vector.load %arg11[%c0_69, %c0_70] : memref<128x128xbf16, #tpu.memory_space<vmem>>, vector<128x128xbf16>
      %cst_71 = arith.constant dense<0.000000e+00> : vector<2x128xf32>
      %215 = tpu.matmul %213, %214, %cst_71 {dimension_numbers = #tpu.dot_dimension_numbers<[1], [0], [0], [1], [0, 0, 1, 1], [], []>} : vector<2x128xbf16>, vector<128x128xbf16>, vector<2x128xf32> -> vector<2x128xf32>
      %c0_72 = arith.constant 0 : index
      %c0_73 = arith.constant 0 : index
      %216 = vector.load %arg12[%c0_72, %c0_73] : memref<1x128xf32, #tpu.memory_space<vmem>>, vector<1x128xf32>
      %217 = vector.broadcast %216 : vector<1x128xf32> to vector<2x128xf32>
      %218 = arith.addf %215, %217 : vector<2x128xf32>
      %c0_74 = arith.constant 0 : index
      %c0_75 = arith.constant 0 : index
      %219 = vector.load %arg16[%c0_74, %c0_75] : memref<2x128xf32, #tpu.memory_space<vmem>>, vector<2x128xf32>
      tpu.vector_store %arg16[%c0_74, %c0_75], %218 {strides = array<i32>} : memref<2x128xf32, #tpu.memory_space<vmem>>, vector<2x128xf32>,
    } else {
    }
    return
  }
  func.func @transform_0(%arg0: i32) -> (i32, i32, i32) {
    %c0_i32 = arith.constant 0 : i32
    %c0_i32_0 = arith.constant 0 : i32
    %c0_i32_1 = arith.constant 0 : i32
    return %arg0, %c0_i32, %c0_i32_0 : i32, i32, i32
  }
  func.func @transform_1(%arg0: i32) -> (i32, i32) {
    %c0_i32 = arith.constant 0 : i32
    %c0_i32_0 = arith.constant 0 : i32
    %c0_i32_1 = arith.constant 0 : i32
    return %c0_i32, %c0_i32_0 : i32, i32
  }
  func.func @transform_2(%arg0: i32) -> (i32, i32) {
    %c0_i32 = arith.constant 0 : i32
    %c0_i32_0 = arith.constant 0 : i32
    %c0_i32_1 = arith.constant 0 : i32
    return %c0_i32, %c0_i32_0 : i32, i32
  }
  func.func @transform_3(%arg0: i32) -> (i32, i32) {
    %c0_i32 = arith.constant 0 : i32
    %c0_i32_0 = arith.constant 0 : i32
    %c0_i32_1 = arith.constant 0 : i32
    return %c0_i32, %c0_i32_0 : i32, i32
  }
  func.func @transform_4(%arg0: i32) -> (i32, i32) {
    %c0_i32 = arith.constant 0 : i32
    %c0_i32_0 = arith.constant 0 : i32
    %c0_i32_1 = arith.constant 0 : i32
    return %c0_i32, %c0_i32_0 : i32, i32
  }
  func.func @transform_5(%arg0: i32) -> (i32, i32) {
    %c0_i32 = arith.constant 0 : i32
    %c0_i32_0 = arith.constant 0 : i32
    %c0_i32_1 = arith.constant 0 : i32
    return %c0_i32, %c0_i32_0 : i32, i32
  }
  func.func @transform_6(%arg0: i32) -> (i32, i32) {
    %c0_i32 = arith.constant 0 : i32
    %c0_i32_0 = arith.constant 0 : i32
    %c0_i32_1 = arith.constant 0 : i32
    return %c0_i32, %c0_i32_0 : i32, i32
  }
  func.func @transform_7(%arg0: i32) -> (i32, i32) {
    %c0_i32 = arith.constant 0 : i32
    %c0_i32_0 = arith.constant 0 : i32
    %c0_i32_1 = arith.constant 0 : i32
    return %c0_i32, %c0_i32_0 : i32, i32
  }
  func.func @transform_8(%arg0: i32) -> (i32, i32) {
    %c0_i32 = arith.constant 0 : i32
    %c0_i32_0 = arith.constant 0 : i32
    %c0_i32_1 = arith.constant 0 : i32
    return %c0_i32, %c0_i32_0 : i32, i32
  }
  func.func @transform_9(%arg0: i32) -> (i32, i32) {
    %c0_i32 = arith.constant 0 : i32
    %c0_i32_0 = arith.constant 0 : i32
    %c0_i32_1 = arith.constant 0 : i32
    return %c0_i32, %c0_i32_0 : i32, i32
  }
  func.func @transform_10(%arg0: i32) -> (i32, i32) {
    %c0_i32 = arith.constant 0 : i32
    %c0_i32_0 = arith.constant 0 : i32
    %c0_i32_1 = arith.constant 0 : i32
    return %c0_i32, %c0_i32_0 : i32, i32
  }
  func.func @transform_11(%arg0: i32) -> (i32, i32) {
    %c0_i32 = arith.constant 0 : i32
    %c0_i32_0 = arith.constant 0 : i32
    %c0_i32_1 = arith.constant 0 : i32
    return %c0_i32, %c0_i32_0 : i32, i32
  }
  func.func @transform_12(%arg0: i32) -> (i32, i32) {
    %c0_i32 = arith.constant 0 : i32
    %c0_i32_0 = arith.constant 0 : i32
    %c0_i32_1 = arith.constant 0 : i32
    return %c0_i32, %c0_i32_0 : i32, i32
  }
  func.func @transform_13(%arg0: i32) -> (i32, i32) {
    %c0_i32 = arith.constant 0 : i32
    %c0_i32_0 = arith.constant 0 : i32
    %c0_i32_1 = arith.constant 0 : i32
    return %c0_i32, %c0_i32_0 : i32, i32
  }
  func.func @transform_14(%arg0: i32) -> (i32, i32) {
    %c0_i32 = arith.constant 0 : i32
    %c0_i32_0 = arith.constant 0 : i32
    %c0_i32_1 = arith.constant 0 : i32
    return %c0_i32, %c0_i32_0 : i32, i32
  }
  func.func @transform_15(%arg0: i32) -> (i32, i32) {
    %c0_i32 = arith.constant 0 : i32
    %c0_i32_0 = arith.constant 0 : i32
    %c0_i32_1 = arith.constant 0 : i32
    return %c0_i32, %c0_i32_0 : i32, i32
  }
}

</mosaic_0001>

<bundles_post_ra>
// kernel: lstm_forward.1
= control target key start
LH: loop header
LB: loop body
LE: loop exit
PB: predicated region body
PF: predicated region fallthrough
CT: control target
= control target key end

     0   :  { %21 = vsyncpa [#allocation5], 0  ;;  %s6735_s0 = inlined_call_operand.vmem [shape: f32[8,2,1024], index: 0, kind: input, shape index: {}]   ;;  %s6736_s1 = inlined_call_operand.hbm [shape: bf16[256,1024], index: 1, kind: input, shape index: {}]   ;;  %s6737_s2 = inlined_call_operand.vmem [shape: f32[2,256], index: 2, kind: input, shape index: {}, may-alias: {2,3}]   ;;  %s6738_s3 = inlined_call_operand.vmem [shape: f32[2,256], index: 3, kind: input, shape index: {}, may-alias: {2,3}]   ;;  %s6739_s4 = inlined_call_operand.vmem [shape: bf16[256,128], index: 4, kind: input, shape index: {}]   ;;  %s6740_s5 = inlined_call_operand.vmem [shape: f32[1,128], index: 5, kind: input, shape index: {}]   ;;  %s6741_s6 = inlined_call_operand.vmem [shape: bf16[128,128], index: 6, kind: input, shape index: {}]   ;;  %s6742_s7 = inlined_call_operand.vmem [shape: f32[1,128], index: 7, kind: input, shape index: {}]   ;;  %s6743_s8 = inlined_call_operand.vmem [shape: bf16[256,128], index: 8, kind: input, shape index: {}]   ;;  %s6744_s9 = inlined_call_operand.vmem [shape: f32[1,128], index: 9, kind: input, shape index: {}]   ;;  %s6745_s10 = inlined_call_operand.vmem [shape: bf16[128,128], index: 10, kind: input, shape index: {}]   ;;  %s6746_s11 = inlined_call_operand.vmem [shape: f32[1,128], index: 11, kind: input, shape index: {}]   ;;  %s6747_s12 = inlined_call_operand.hbm [shape: f32[2,256], index: 12, kind: output, shape index: {0}]   ;;  %s6748_s13 = inlined_call_operand.hbm [shape: f32[2,256], index: 13, kind: output, shape index: {1}]   ;;  %s6749_s14 = inlined_call_operand.hbm [shape: f32[2,128], index: 14, kind: output, shape index: {2}]   ;;  %s6750_s15 = inlined_call_operand.vmem [shape: f32[2,128], index: 15, kind: output, shape index: {3}]  }
   0x1   :  { %22 = vsyncpa [#allocation6], 0 }
   0x2   :  { %23 = vsyncpa [#allocation9], 0  ;;  %s30_s20 = sshll.u32 %s6736_s1, 4  ;;  %s4884_s21 = smov [#allocation4]   ;;  %s31_s20 = int_to_ptr.hbm [resolvable:$true] %s30_s20 }
   0x3   :  { %s32_s22 = sshll.u32 %s4884_s21, 4  ;;  %s4885_s23 = smov 512   ;;  %s33_s22 = int_to_ptr.vmem [resolvable:$true] %s32_s22 }
   0x4   :  { %s4886_s24 = smov 32  }
   0x5   :  { %38 = dma.hbm_to_vmem [thread:$0]  %s31_s20, 16384, %s33_s22, [#allocation5], %s4885_s23, %s4885_s23, %s4886_s24  }
   0x6   :  { %4878 = dma.done.wait [#allocation5], 16384  }
   0x7   :  { %4879 = vsyncadd [#allocation5], 4294950912  ;;  %v3988_v0 = vld [vmem:[#allocation4 + $0x1c0] sm:$0xf]  ;;  %v4552_v5 = vld [vmem:[#allocation4 + $0x1c4] sm:$0xf] }
   0x8   :  { %v4556_v1 = vld [vmem:[#allocation4 + $0x1dc] sm:$0xf0]  ;;  %v3990_v6 = vld [vmem:[#allocation4 + $0x1e0] sm:$0xf0]  ;;  %vm1073_vm0 = vcmask 1041408   ;;  %vm1075_vm1 = vcmask 1045508  }
   0x9   :  { %v4244_v2 = vld [vmem:[#allocation4 + $0x3c0] sm:$0xf]  ;;  %v4973_v3 = vor.u32 %v4556_v1, %v3988_v0  ;;  %v4977_v8 = vor.u32 %v4552_v5, %v3990_v6  ;;  %v4616_v9 = vld [vmem:[#allocation4 + $0x3c4] sm:$0xf]  ;;  %vm1077_vm2 = vcmask 1043456   ;;  %s4887_s27 = smov [#allocation8]  }
   0xa   :  { %v4620_v4 = vld [vmem:[#allocation4 + $0x3dc] sm:$0xf0]  ;;  %v4246_v10 = vld [vmem:[#allocation4 + $0x3e0] sm:$0xf0]  ;;  %s3726_s28 = sshll.u32 %s4887_s27, 4  ;;  %s3717_s16 = sshll.u32 %s6747_s12, 4  ;;  %s3727_s28 = int_to_ptr.vmem [resolvable:$true] %s3726_s28  ;;  %s3718_s16 = int_to_ptr.hbm [resolvable:$true] %s3717_s16 }
   0xb   :  { %7021 = vst [vmem:[#allocation14_spill] sm:$0xff] %v4973_v3  ;;  %v4975_v7 = vor.u32 %v4620_v4, %v4244_v2  ;;  %v3956_v11 = vld [vmem:[#allocation4 + $0x180] sm:$0xf]  ;;  %851 = vmatpush.bf16.msra.mxu0 %v4973_v3  ;;  %v4980_v12 = vor.u32 %v4616_v9, %v4246_v10  ;;  %877 = vmatpush.bf16.msra.mxu2 %v4977_v8  ;;  %v4544_v18 = vld [vmem:[#allocation4 + $0x184] sm:$0xf]  ;;  %s3739_s18 = sshll.u32 %s6749_s14, 4  ;;  %s3740_s18 = int_to_ptr.hbm [resolvable:$true] %s3739_s18 }
   0xc   :  { %7023 = vst [vmem:[#allocation16_spill] sm:$0xff] %v4977_v8  ;;  %v4548_v13 = vld [vmem:[#allocation4 + $0x19c] sm:$0xf0]  ;;  %v3958_v19 = vld [vmem:[#allocation4 + $0x1a0] sm:$0xf0] }
   0xd   :  { %7022 = vst [vmem:[#allocation15_spill] sm:$0xff] %v4975_v7  ;;  %v4212_v14 = vld [vmem:[#allocation4 + $0x380] sm:$0xf]  ;;  %864 = vmatpush.bf16.msra.mxu1 %v4975_v7  ;;  %v4984_v16 = vor.u32 %v4548_v13, %v3956_v11  ;;  %v4608_v20 = vld [vmem:[#allocation4 + $0x384] sm:$0xf]  ;;  %890 = vmatpush.bf16.msra.mxu3 %v4980_v12  ;;  %v4989_v21 = vor.u32 %v4544_v18, %v3958_v19 }
   0xe   :  { %7024 = vst [vmem:[#allocation17_spill] sm:$0xff] %v4980_v12  ;;  %v4612_v15 = vld [vmem:[#allocation4 + $0x39c] sm:$0xf0]  ;;  %v4214_v22 = vld [vmem:[#allocation4 + $0x3a0] sm:$0xf0] }
   0xf   :  { %7025 = vst [vmem:[#allocation18_spill] sm:$0xff] %v4984_v16  ;;  %v4986_v17 = vor.u32 %v4612_v15, %v4212_v14  ;;  %v3924_v23 = vld [vmem:[#allocation4 + $0x140] sm:$0xf]  ;;  %v4991_v25 = vor.u32 %v4608_v20, %v4214_v22  ;;  %v4536_v28 = vld [vmem:[#allocation4 + $0x144] sm:$0xf]  ;;  %852 = vmatpush.bf16.msra.mxu0 %v4984_v16  ;;  %878 = vmatpush.bf16.msra.mxu2 %v4989_v21 }
  0x10   :  { %7027 = vst [vmem:[#allocation20_spill] sm:$0xff] %v4989_v21  ;;  %v4540_v24 = vld [vmem:[#allocation4 + $0x15c] sm:$0xf0]  ;;  %v3926_v30 = vld [vmem:[#allocation4 + $0x160] sm:$0xf0] }
  0x11   :  { %7026 = vst [vmem:[#allocation19_spill] sm:$0xff] %v4986_v17  ;;  %v4180_v26 = vld [vmem:[#allocation4 + $0x340] sm:$0xf]  ;;  %v4994_v29 = vor.u32 %v4540_v24, %v3924_v23  ;;  %v4600_v31 = vld [vmem:[#allocation4 + $0x344] sm:$0xf]  ;;  %865 = vmatpush.bf16.msra.mxu1 %v4986_v17  ;;  %v5000_v34 = vor.u32 %v4536_v28, %v3926_v30  ;;  %891 = vmatpush.bf16.msra.mxu3 %v4991_v25 }
  0x12   :  { %7028 = vst [vmem:[#allocation21_spill] sm:$0xff] %v4991_v25  ;;  %v4604_v27 = vld [vmem:[#allocation4 + $0x35c] sm:$0xf0]  ;;  %v4182_v32 = vld [vmem:[#allocation4 + $0x360] sm:$0xf0] }
  0x13   :  { %7029 = vst [vmem:[#allocation22_spill] sm:$0xff] %v4994_v29  ;;  %v4998_v33 = vor.u32 %v4604_v27, %v4180_v26  ;;  %v3892_v35 = vld [vmem:[#allocation4 + $0x100] sm:$0xf]  ;;  %v5003_v38 = vor.u32 %v4600_v31, %v4182_v32  ;;  %v4528_v40 = vld [vmem:[#allocation4 + $0x104] sm:$0xf]  ;;  %853 = vmatpush.bf16.msra.mxu0 %v4994_v29  ;;  %879 = vmatpush.bf16.msra.mxu2 %v5000_v34 }
  0x14   :  { %7031 = vst [vmem:[#allocation24_spill] sm:$0xff] %v5000_v34  ;;  %v4532_v36 = vld [vmem:[#allocation4 + $0x11c] sm:$0xf0]  ;;  %v3894_v41 = vld [vmem:[#allocation4 + $0x120] sm:$0xf0] }
  0x15   :  { %7030 = vst [vmem:[#allocation23_spill] sm:$0xff] %v4998_v33  ;;  %v4148_v37 = vld [vmem:[#allocation4 + $0x300] sm:$0xf]  ;;  %v4592_v42 = vld [vmem:[#allocation4 + $0x304] sm:$0xf]  ;;  %v5006_v44 = vor.u32 %v4532_v36, %v3892_v35  ;;  %866 = vmatpush.bf16.msra.mxu1 %v4998_v33  ;;  %v5012_v46 = vor.u32 %v4528_v40, %v3894_v41  ;;  %892 = vmatpush.bf16.msra.mxu3 %v5003_v38 }
  0x16   :  { %7032 = vst [vmem:[#allocation25_spill] sm:$0xff] %v5003_v38  ;;  %v4596_v39 = vld [vmem:[#allocation4 + $0x31c] sm:$0xf0]  ;;  %v4150_v43 = vld [vmem:[#allocation4 + $0x320] sm:$0xf0] }
  0x17   :  { %7033 = vst [vmem:[#allocation26_spill] sm:$0xff] %v5006_v44  ;;  %v5010_v45 = vor.u32 %v4596_v39, %v4148_v37  ;;  %v3860_v47 = vld [vmem:[#allocation4 + $0xc0] sm:$0xf]  ;;  %v5015_v50 = vor.u32 %v4592_v42, %v4150_v43  ;;  %v4520_v52 = vld [vmem:[#allocation4 + $0xc4] sm:$0xf]  ;;  %854 = vmatpush.bf16.msra.mxu0 %v5006_v44  ;;  %880 = vmatpush.bf16.msra.mxu2 %v5012_v46 }
  0x18   :  { %7035 = vst [vmem:[#allocation28_spill] sm:$0xff] %v5012_v46  ;;  %v4524_v48 = vld [vmem:[#allocation4 + $0xdc] sm:$0xf0]  ;;  %v3862_v53 = vld [vmem:[#allocation4 + $0xe0] sm:$0xf0] }
  0x19   :  { %7034 = vst [vmem:[#allocation27_spill] sm:$0xff] %v5010_v45  ;;  %v4116_v49 = vld [vmem:[#allocation4 + $0x2c0] sm:$0xf]  ;;  %v4584_v54 = vld [vmem:[#allocation4 + $0x2c4] sm:$0xf]  ;;  %v5018_v56 = vor.u32 %v4524_v48, %v3860_v47  ;;  %867 = vmatpush.bf16.msra.mxu1 %v5010_v45  ;;  %v5024_v58 = vor.u32 %v4520_v52, %v3862_v53  ;;  %893 = vmatpush.bf16.msra.mxu3 %v5015_v50 }
  0x1a   :  { %7036 = vst [vmem:[#allocation29_spill] sm:$0xff] %v5015_v50  ;;  %v4588_v51 = vld [vmem:[#allocation4 + $0x2dc] sm:$0xf0]  ;;  %v4118_v55 = vld [vmem:[#allocation4 + $0x2e0] sm:$0xf0] }
  0x1b   :  { %7037 = vst [vmem:[#allocation30_spill] sm:$0xff] %v5018_v56  ;;  %v5022_v57 = vor.u32 %v4588_v51, %v4116_v49  ;;  %v3828_v59 = vld [vmem:[#allocation4 + $0x80] sm:$0xf]  ;;  %v5027_v62 = vor.u32 %v4584_v54, %v4118_v55  ;;  %v4512_v0 = vld [vmem:[#allocation4 + $0x84] sm:$0xf]  ;;  %855 = vmatpush.bf16.msra.mxu0 %v5018_v56  ;;  %881 = vmatpush.bf16.msra.mxu2 %v5024_v58 }
  0x1c   :  { %7039 = vst [vmem:[#allocation32_spill] sm:$0xff] %v5024_v58  ;;  %v4516_v60 = vld [vmem:[#allocation4 + $0x9c] sm:$0xf0]  ;;  %v3830_v1 = vld [vmem:[#allocation4 + $0xa0] sm:$0xf0] }
  0x1d   :  { %7038 = vst [vmem:[#allocation31_spill] sm:$0xff] %v5022_v57  ;;  %v4084_v61 = vld [vmem:[#allocation4 + $0x280] sm:$0xf]  ;;  %v4576_v2 = vld [vmem:[#allocation4 + $0x284] sm:$0xf]  ;;  %v5030_v5 = vor.u32 %v4516_v60, %v3828_v59  ;;  %868 = vmatpush.bf16.msra.mxu1 %v5022_v57  ;;  %v5036_v9 = vor.u32 %v4512_v0, %v3830_v1  ;;  %894 = vmatpush.bf16.msra.mxu3 %v5027_v62 }
  0x1e   :  { %7040 = vst [vmem:[#allocation33_spill] sm:$0xff] %v5027_v62  ;;  %v4580_v63 = vld [vmem:[#allocation4 + $0x29c] sm:$0xf0]  ;;  %v4086_v4 = vld [vmem:[#allocation4 + $0x2a0] sm:$0xf0] }
  0x1f   :  { %7041 = vst [vmem:[#allocation34_spill] sm:$0xff] %v5030_v5  ;;  %v5034_v6 = vor.u32 %v4580_v63, %v4084_v61  ;;  %v3796_v10 = vld [vmem:[#allocation4 + $0x40] sm:$0xf]  ;;  %v5039_v14 = vor.u32 %v4576_v2, %v4086_v4  ;;  %v4504_v18 = vld [vmem:[#allocation4 + $0x44] sm:$0xf]  ;;  %856 = vmatpush.bf16.msra.mxu0 %v5030_v5  ;;  %882 = vmatpush.bf16.msra.mxu2 %v5036_v9 }
  0x20   :  { %7043 = vst [vmem:[#allocation36_spill] sm:$0xff] %v5036_v9  ;;  %v4508_v11 = vld [vmem:[#allocation4 + $0x5c] sm:$0xf0]  ;;  %v3798_v19 = vld [vmem:[#allocation4 + $0x60] sm:$0xf0] }
  0x21   :  { %7042 = vst [vmem:[#allocation35_spill] sm:$0xff] %v5034_v6  ;;  %v4052_v13 = vld [vmem:[#allocation4 + $0x240] sm:$0xf]  ;;  %v4568_v20 = vld [vmem:[#allocation4 + $0x244] sm:$0xf]  ;;  %v5042_v23 = vor.u32 %v4508_v11, %v3796_v10  ;;  %869 = vmatpush.bf16.msra.mxu1 %v5034_v6  ;;  %v5048_v28 = vor.u32 %v4504_v18, %v3798_v19  ;;  %895 = vmatpush.bf16.msra.mxu3 %v5039_v14 }
  0x22   :  { %7044 = vst [vmem:[#allocation37_spill] sm:$0xff] %v5039_v14  ;;  %v4572_v15 = vld [vmem:[#allocation4 + $0x25c] sm:$0xf0]  ;;  %v4054_v22 = vld [vmem:[#allocation4 + $0x260] sm:$0xf0] }
  0x23   :  { %7045 = vst [vmem:[#allocation38_spill] sm:$0xff] %v5042_v23  ;;  %v3764_v24 = vld [vmem:[#allocation4] sm:$0xf]  ;;  %v5046_v27 = vor.u32 %v4572_v15, %v4052_v13  ;;  %v4496_v32 = vld [vmem:[#allocation4 + $0x4] sm:$0xf]  ;;  %v5051_v35 = vor.u32 %v4568_v20, %v4054_v22  ;;  %857 = vmatpush.bf16.msra.mxu0 %v5042_v23  ;;  %883 = vmatpush.bf16.msra.mxu2 %v5048_v28 }
  0x24   :  { %v4500_v26 = vld [vmem:[#allocation4 + $0x1c] sm:$0xf0]  ;;  %7047 = vst [vmem:[#allocation40_spill] sm:$0xff] %v5048_v28  ;;  %v3766_v36 = vld [vmem:[#allocation4 + $0x20] sm:$0xf0] }
  0x25   :  { %7046 = vst [vmem:[#allocation39_spill] sm:$0xff] %v5046_v27  ;;  %v4020_v30 = vld [vmem:[#allocation4 + $0x200] sm:$0xf]  ;;  %v4560_v37 = vld [vmem:[#allocation4 + $0x204] sm:$0xf]  ;;  %v5054_v43 = vor.u32 %v4500_v26, %v3764_v24  ;;  %870 = vmatpush.bf16.msra.mxu1 %v5046_v27  ;;  %v5060_v52 = vor.u32 %v4496_v32, %v3766_v36  ;;  %896 = vmatpush.bf16.msra.mxu3 %v5051_v35 }
  0x26   :  { %v4564_v31 = vld [vmem:[#allocation4 + $0x21c] sm:$0xf0]  ;;  %7048 = vst [vmem:[#allocation41_spill] sm:$0xff] %v5051_v35  ;;  %v4022_v39 = vld [vmem:[#allocation4 + $0x220] sm:$0xf0] }
  0x27   :  { %v3996_v40 = vld [vmem:[#allocation4 + $0x1c8] sm:$0xf]  ;;  %7049 = vst [vmem:[#allocation42_spill] sm:$0xff] %v5054_v43  ;;  %v4553_v48 = vld [vmem:[#allocation4 + $0x1cc] sm:$0xf]  ;;  %v5058_v51 = vor.u32 %v4564_v31, %v4020_v30  ;;  %v5063_v55 = vor.u32 %v4560_v37, %v4022_v39  ;;  %858 = vmatpush.bf16.msra.mxu0 %v5054_v43  ;;  %884 = vmatpush.bf16.msra.mxu2 %v5060_v52 }
  0x28   :  { %v4557_v41 = vld [vmem:[#allocation4 + $0x1e4] sm:$0xf0]  ;;  %v3998_v49 = vld [vmem:[#allocation4 + $0x1e8] sm:$0xf0]  ;;  %7051 = vst [vmem:[#allocation44_spill] sm:$0xff] %v5060_v52 }
  0x29   :  { %v4252_v42 = vld [vmem:[#allocation4 + $0x3c8] sm:$0xf]  ;;  %7050 = vst [vmem:[#allocation43_spill] sm:$0xff] %v5058_v51  ;;  %v4617_v53 = vld [vmem:[#allocation4 + $0x3cc] sm:$0xf]  ;;  %v5065_v59 = vor.u32 %v4557_v41, %v3996_v40  ;;  %v5069_v61 = vor.u32 %v4553_v48, %v3998_v49  ;;  %871 = vmatpush.bf16.msra.mxu1 %v5058_v51  ;;  %897 = vmatpush.bf16.msra.mxu3 %v5063_v55 }
  0x2a   :  { %v4621_v47 = vld [vmem:[#allocation4 + $0x3e4] sm:$0xf0]  ;;  %v4254_v54 = vld [vmem:[#allocation4 + $0x3e8] sm:$0xf0]  ;;  %7052 = vst [vmem:[#allocation45_spill] sm:$0xff] %v5063_v55 }
  0x2b   :  { %7053 = vst [vmem:[#allocation46_spill] sm:$0xff] %v5065_v59  ;;  %v5067_v60 = vor.u32 %v4621_v47, %v4252_v42  ;;  %v3964_v63 = vld [vmem:[#allocation4 + $0x188] sm:$0xf]  ;;  %v5072_v2 = vor.u32 %v4617_v53, %v4254_v54  ;;  %v4545_v10 = vld [vmem:[#allocation4 + $0x18c] sm:$0xf]  ;;  %903 = vmatpush.bf16.msrb.mxu0 %v5065_v59  ;;  %929 = vmatpush.bf16.msrb.mxu2 %v5069_v61 }
  0x2c   :  { %7055 = vst [vmem:[#allocation48_spill] sm:$0xff] %v5069_v61  ;;  %v4549_v0 = vld [vmem:[#allocation4 + $0x1a4] sm:$0xf0]  ;;  %v3966_v11 = vld [vmem:[#allocation4 + $0x1a8] sm:$0xf0] }
  0x2d   :  { %7054 = vst [vmem:[#allocation47_spill] sm:$0xff] %v5067_v60  ;;  %v4220_v1 = vld [vmem:[#allocation4 + $0x388] sm:$0xf]  ;;  %v4609_v13 = vld [vmem:[#allocation4 + $0x38c] sm:$0xf]  ;;  %v5081_v19 = vor.u32 %v4549_v0, %v3964_v63  ;;  %916 = vmatpush.bf16.msrb.mxu1 %v5067_v60  ;;  %v5087_v22 = vor.u32 %v4545_v10, %v3966_v11  ;;  %942 = vmatpush.bf16.msrb.mxu3 %v5072_v2 }
  0x2e   :  { %7056 = vst [vmem:[#allocation49_spill] sm:$0xff] %v5072_v2  ;;  %v4613_v4 = vld [vmem:[#allocation4 + $0x3a4] sm:$0xf0]  ;;  %v4222_v15 = vld [vmem:[#allocation4 + $0x3a8] sm:$0xf0] }
  0x2f   :  { %v67_v18 = vld [vmem:[%s6737_s2] sm:$0xf]  ;;  %7057 = vst [vmem:[#allocation50_spill] sm:$0xff] %v5081_v19  ;;  %v5085_v20 = vor.u32 %v4613_v4, %v4220_v1  ;;  %v3932_v24 = vld [vmem:[#allocation4 + $0x148] sm:$0xf]  ;;  %v5090_v31 = vor.u32 %v4609_v13, %v4222_v15  ;;  %904 = vmatpush.bf16.msrb.mxu0 %v5081_v19  ;;  %930 = vmatpush.bf16.msrb.mxu2 %v5087_v22 }
  0x30   :  { %68 = vst [vmem:[#allocation2] sm:$0xf] %v67_v18  ;;  %v4541_v26 = vld [vmem:[#allocation4 + $0x164] sm:$0xf0]  ;;  %v4537_v36 = vld [vmem:[#allocation4 + $0x14c] sm:$0xf] }
  0x31   :  { %7058 = vst [vmem:[#allocation51_spill] sm:$0xff] %v5085_v20  ;;  %v4188_v30 = vld [vmem:[#allocation4 + $0x348] sm:$0xf]  ;;  %v3934_v37 = vld [vmem:[#allocation4 + $0x168] sm:$0xf0]  ;;  %v5093_v41 = vor.u32 %v4541_v26, %v3932_v24  ;;  %917 = vmatpush.bf16.msrb.mxu1 %v5085_v20  ;;  %943 = vmatpush.bf16.msrb.mxu3 %v5090_v31 }
  0x32   :  { %7059 = vst [vmem:[#allocation52_spill] sm:$0xff] %v5087_v22  ;;  %v4605_v32 = vld [vmem:[#allocation4 + $0x364] sm:$0xf0]  ;;  %v4601_v39 = vld [vmem:[#allocation4 + $0x34c] sm:$0xf]  ;;  %v5099_v47 = vor.u32 %v4537_v36, %v3934_v37 }
  0x33   :  { %7060 = vst [vmem:[#allocation53_spill] sm:$0xff] %v5090_v31  ;;  %v4190_v40 = vld [vmem:[#allocation4 + $0x368] sm:$0xf0]  ;;  %v5097_v42 = vor.u32 %v4605_v32, %v4188_v30  ;;  %v3900_v48 = vld [vmem:[#allocation4 + $0x108] sm:$0xf]  ;;  %905 = vmatpush.bf16.msrb.mxu0 %v5093_v41 }
  0x34   :  { %7061 = vst [vmem:[#allocation54_spill] sm:$0xff] %v5093_v41  ;;  %v4533_v49 = vld [vmem:[#allocation4 + $0x124] sm:$0xf0]  ;;  %v5102_v54 = vor.u32 %v4601_v39, %v4190_v40  ;;  %v4529_v0 = vld [vmem:[#allocation4 + $0x10c] sm:$0xf]  ;;  %931 = vmatpush.bf16.msrb.mxu2 %v5099_v47 }
  0x35   :  { %7062 = vst [vmem:[#allocation55_spill] sm:$0xff] %v5097_v42  ;;  %v4156_v53 = vld [vmem:[#allocation4 + $0x308] sm:$0xf]  ;;  %v3902_v1 = vld [vmem:[#allocation4 + $0x128] sm:$0xf0]  ;;  %v5105_v13 = vor.u32 %v4533_v49, %v3900_v48  ;;  %918 = vmatpush.bf16.msrb.mxu1 %v5097_v42 }
  0x36   :  { %7063 = vst [vmem:[#allocation56_spill] sm:$0xff] %v5099_v47  ;;  %v4597_v63 = vld [vmem:[#allocation4 + $0x324] sm:$0xf0]  ;;  %v4593_v4 = vld [vmem:[#allocation4 + $0x30c] sm:$0xf]  ;;  %v5111_v18 = vor.u32 %v4529_v0, %v3902_v1  ;;  %944 = vmatpush.bf16.msrb.mxu3 %v5102_v54 }
  0x37   :  { %7064 = vst [vmem:[#allocation57_spill] sm:$0xff] %v5102_v54  ;;  %v4158_v10 = vld [vmem:[#allocation4 + $0x328] sm:$0xf0]  ;;  %v199_v11 = vld [vmem:[#allocation2] sm:$0xf]  ;;  %v5109_v15 = vor.u32 %v4597_v63, %v4156_v53  ;;  %906 = vmatpush.bf16.msrb.mxu0 %v5105_v13 }
  0x38   :  { %7065 = vst [vmem:[#allocation58_spill] sm:$0xff] %v5105_v13  ;;  %v3868_v24 = vld [vmem:[#allocation4 + $0xc8] sm:$0xf]  ;;  %v5114_v32 = vor.u32 %v4593_v4, %v4158_v10  ;;  %v4521_v37 = vld [vmem:[#allocation4 + $0xcc] sm:$0xf]  ;;  %932 = vmatpush.bf16.msrb.mxu2 %v5111_v18 }
  0x39   :  { %204 = vst [vmem:[#allocation1] ss:$4 sm:$0xff] %v199_v11  ;;  %v4525_v26 = vld [vmem:[#allocation4 + $0xe4] sm:$0xf0]  ;;  %v3870_v39 = vld [vmem:[#allocation4 + $0xe8] sm:$0xf0]  ;;  %919 = vmatpush.bf16.msrb.mxu1 %v5109_v15 }
  0x3a   :  { %7066 = vst [vmem:[#allocation59_spill] sm:$0xff] %v5109_v15  ;;  %v4124_v30 = vld [vmem:[#allocation4 + $0x2c8] sm:$0xf]  ;;  %v5117_v40 = vor.u32 %v4525_v26, %v3868_v24  ;;  %v4585_v48 = vld [vmem:[#allocation4 + $0x2cc] sm:$0xf]  ;;  %v5123_v63 = vor.u32 %v4521_v37, %v3870_v39  ;;  %945 = vmatpush.bf16.msrb.mxu3 %v5114_v32 }
  0x3b   :  { %7067 = vst [vmem:[#allocation60_spill] sm:$0xff] %v5111_v18  ;;  %v4589_v36 = vld [vmem:[#allocation4 + $0x2e4] sm:$0xf0]  ;;  %v4126_v49 = vld [vmem:[#allocation4 + $0x2e8] sm:$0xf0] }
  0x3c   :  { %7068 = vst [vmem:[#allocation61_spill] sm:$0xff] %v5114_v32  ;;  %v5121_v53 = vor.u32 %v4589_v36, %v4124_v30  ;;  %v3836_v0 = vld [vmem:[#allocation4 + $0x88] sm:$0xf]  ;;  %v4513_v11 = vld [vmem:[#allocation4 + $0x8c] sm:$0xf]  ;;  %v5126_v54 = vor.u32 %v4585_v48, %v4126_v49  ;;  %907 = vmatpush.bf16.msrb.mxu0 %v5117_v40  ;;  %933 = vmatpush.bf16.msrb.mxu2 %v5123_v63 }
  0x3d   :  { %7069 = vst [vmem:[#allocation62_spill] sm:$0xff] %v5117_v40  ;;  %v4517_v1 = vld [vmem:[#allocation4 + $0xa4] sm:$0xf0]  ;;  %v3838_v13 = vld [vmem:[#allocation4 + $0xa8] sm:$0xf0] }
  0x3e   :  { %7070 = vst [vmem:[#allocation63_spill] sm:$0xff] %v5121_v53  ;;  %v4092_v4 = vld [vmem:[#allocation4 + $0x288] sm:$0xf]  ;;  %v5133_v30 = vor.u32 %v4517_v1, %v3836_v0  ;;  %v4577_v36 = vld [vmem:[#allocation4 + $0x28c] sm:$0xf]  ;;  %920 = vmatpush.bf16.msrb.mxu1 %v5121_v53  ;;  %v5139_v32 = vor.u32 %v4513_v11, %v3838_v13  ;;  %946 = vmatpush.bf16.msrb.mxu3 %v5126_v54 }
  0x3f   :  { %7071 = vst [vmem:[#allocation64_spill] sm:$0xff] %v5123_v63  ;;  %v4581_v10 = vld [vmem:[#allocation4 + $0x2a4] sm:$0xf0]  ;;  %v4094_v37 = vld [vmem:[#allocation4 + $0x2a8] sm:$0xf0] }
  0x40   :  { %v205_v24 = vld.sshfl [vmem:[#allocation1] sm:$0xff pattern:$0x73625140]  ;;  %v206_v26 = vld.sshfl [vmem:[#allocation1 + $0x8] sm:$0xff pattern:$0x73625140]  ;;  %v5137_v39 = vor.u32 %v4581_v10, %v4092_v4  ;;  %v5144_v40 = vor.u32 %v4577_v36, %v4094_v37  ;;  %908 = vmatpush.bf16.msrb.mxu0 %v5133_v30  ;;  %934 = vmatpush.bf16.msrb.mxu2 %v5139_v32 }
  0x41   :  { %7072 = vst [vmem:[#allocation65_spill] sm:$0xff] %v5126_v54  ;;  %v5128_v47 = vpack.c.bf16 %v205_v24, %v205_v24  ;;  %v5130_v15 = vpack.c.bf16 %v206_v26, %v206_v26  ;;  %v3804_v48 = vld [vmem:[#allocation4 + $0x48] sm:$0xf]  ;;  %v4505_v0 = vld [vmem:[#allocation4 + $0x4c] sm:$0xf] }
  0x42   :  { %7073 = vst [vmem:[#allocation66_spill] sm:$0xff] %v5133_v30  ;;  %v4509_v49 = vld [vmem:[#allocation4 + $0x64] sm:$0xf0]  ;;  %v3806_v1 = vld [vmem:[#allocation4 + $0x68] sm:$0xf0]  ;;  %921 = vmatpush.bf16.msrb.mxu1 %v5137_v39  ;;  %947 = vmatpush.bf16.msrb.mxu3 %v5144_v40 }
  0x43   :  { %7074 = vst [vmem:[#allocation67_spill] sm:$0xff] %v5137_v39  ;;  %v4060_v24 = vld [vmem:[#allocation4 + $0x248] sm:$0xf]  ;;  %885 = vmatmul.bf16.vlgmr.msra.gmra.mxu2 %v5128_v47  ;;  %898 = vmatmul.bf16.vlgmr.msra.gmra.mxu3 %v5130_v15  ;;  %v4569_v4 = vld [vmem:[#allocation4 + $0x24c] sm:$0xf]  ;;  %v5149_v13 = vor.u32 %v4509_v49, %v3804_v48  ;;  %v5155_v36 = vor.u32 %v4505_v0, %v3806_v1 }
  0x44   :  { %7075 = vst [vmem:[#allocation68_spill] sm:$0xff] %v5139_v32  ;;  %v4573_v26 = vld [vmem:[#allocation4 + $0x264] sm:$0xf0]  ;;  %859 = vmatmul.bf16.vlgmr.msra.gmra.mxu0 %v5128_v47  ;;  %872 = vmatmul.bf16.vlgmr.msra.gmra.mxu1 %v5130_v15  ;;  %v4062_v10 = vld [vmem:[#allocation4 + $0x268] sm:$0xf0] }
  0x45   :  { %7076 = vst [vmem:[#allocation69_spill] sm:$0xff] %v5144_v40  ;;  %v3772_v11 = vld [vmem:[#allocation4 + $0x8] sm:$0xf]  ;;  %v5153_v53 = vor.u32 %v4573_v26, %v4060_v24  ;;  %v4497_v18 = vld [vmem:[#allocation4 + $0xc] sm:$0xf]  ;;  %v5158_v48 = vor.u32 %v4569_v4, %v4062_v10  ;;  %909 = vmatpush.bf16.msrb.mxu0 %v5149_v13  ;;  %935 = vmatpush.bf16.msrb.mxu2 %v5155_v36 }
  0x46   :  { %7077 = vst [vmem:[#allocation70_spill] sm:$0xff] %v5149_v13  ;;  %v4501_v63 = vld [vmem:[#allocation4 + $0x24] sm:$0xf0]  ;;  %v3774_v42 = vld [vmem:[#allocation4 + $0x28] sm:$0xf0] }
  0x47   :  { %7078 = vst [vmem:[#allocation71_spill] sm:$0xff] %v5153_v53  ;;  %v4028_v37 = vld [vmem:[#allocation4 + $0x208] sm:$0xf]  ;;  %v4561_v30 = vld [vmem:[#allocation4 + $0x20c] sm:$0xf]  ;;  %v5161_v32 = vor.u32 %v4501_v63, %v3772_v11  ;;  %922 = vmatpush.bf16.msrb.mxu1 %v5153_v53  ;;  %v5167_v39 = vor.u32 %v4497_v18, %v3774_v42  ;;  %948 = vmatpush.bf16.msrb.mxu3 %v5158_v48 }
  0x48   :  { %7079 = vst [vmem:[#allocation72_spill] sm:$0xff] %v5155_v36  ;;  %v4565_v54 = vld [vmem:[#allocation4 + $0x224] sm:$0xf0]  ;;  %v4004_v41 = vld [vmem:[#allocation4 + $0x1d0] sm:$0xf] }
  0x49   :  { %7080 = vst [vmem:[#allocation73_spill] sm:$0xff] %v5158_v48  ;;  %v4558_v49 = vld [vmem:[#allocation4 + $0x1ec] sm:$0xf0]  ;;  %v4030_v24 = vld [vmem:[#allocation4 + $0x228] sm:$0xf0]  ;;  %v5165_v1 = vor.u32 %v4565_v54, %v4028_v37  ;;  %910 = vmatpush.bf16.msrb.mxu0 %v5161_v32  ;;  %936 = vmatpush.bf16.msrb.mxu2 %v5167_v39 }
  0x4a   :  { %v4260_v31 = vld [vmem:[#allocation4 + $0x3d0] sm:$0xf]  ;;  %7081 = vst [vmem:[#allocation74_spill] sm:$0xff] %v5161_v32  ;;  %v4554_v26 = vld [vmem:[#allocation4 + $0x1d4] sm:$0xf]  ;;  %v5169_v40 = vor.u32 %v4558_v49, %v4004_v41  ;;  %v5174_v63 = vor.u32 %v4561_v30, %v4030_v24 }
  0x4b   :  { %v4622_v22 = vld [vmem:[#allocation4 + $0x3ec] sm:$0xf0]  ;;  %v4006_v0 = vld [vmem:[#allocation4 + $0x1f0] sm:$0xf0]  ;;  %7082 = vst [vmem:[#allocation75_spill] sm:$0xff] %v5165_v1  ;;  %923 = vmatpush.bf16.msrb.mxu1 %v5165_v1 }
  0x4c   :  { %7083 = vst [vmem:[#allocation76_spill] sm:$0xff] %v5167_v39  ;;  %v4618_v4 = vld [vmem:[#allocation4 + $0x3d4] sm:$0xf]  ;;  %v5171_v20 = vor.u32 %v4622_v22, %v4260_v31  ;;  %v5176_v11 = vor.u32 %v4554_v26, %v4006_v0  ;;  %v3972_v13 = vld [vmem:[#allocation4 + $0x190] sm:$0xf]  ;;  %949 = vmatpush.bf16.msrb.mxu3 %v5174_v63 }
  0x4d   :  { %v4262_v10 = vld [vmem:[#allocation4 + $0x3f0] sm:$0xf0]  ;;  %7084 = vst [vmem:[#allocation77_spill] sm:$0xff] %v5169_v40  ;;  %v4550_v53 = vld [vmem:[#allocation4 + $0x1ac] sm:$0xf0]  ;;  %955 = vmatpush.bf16.msra.mxu0 %v5169_v40 }
  0x4e   :  { %7085 = vst [vmem:[#allocation78_spill] sm:$0xff] %v5171_v20  ;;  %v5179_v54 = vor.u32 %v4618_v4, %v4262_v10  ;;  %v4228_v42 = vld [vmem:[#allocation4 + $0x390] sm:$0xf]  ;;  %v4546_v37 = vld [vmem:[#allocation4 + $0x194] sm:$0xf]  ;;  %981 = vmatpush.bf16.msra.mxu2 %v5176_v11  ;;  %v5187_v30 = vor.u32 %v4550_v53, %v3972_v13 }
  0x4f   :  { %7086 = vst [vmem:[#allocation79_spill] sm:$0xff] %v5174_v63  ;;  %v4614_v18 = vld [vmem:[#allocation4 + $0x3ac] sm:$0xf0]  ;;  %v3974_v22 = vld [vmem:[#allocation4 + $0x1b0] sm:$0xf0]  ;;  %968 = vmatpush.bf16.msra.mxu1 %v5171_v20 }
  0x50   :  { %7087 = vst [vmem:[#allocation80_spill] sm:$0xff] %v5176_v11  ;;  %v4610_v31 = vld [vmem:[#allocation4 + $0x394] sm:$0xf]  ;;  %v5189_v49 = vor.u32 %v4614_v18, %v4228_v42  ;;  %v3940_v24 = vld [vmem:[#allocation4 + $0x150] sm:$0xf]  ;;  %994 = vmatpush.bf16.msra.mxu3 %v5179_v54  ;;  %v5192_v0 = vor.u32 %v4546_v37, %v3974_v22 }
  0x51   :  { %7088 = vst [vmem:[#allocation81_spill] sm:$0xff] %v5179_v54  ;;  %v4230_v41 = vld [vmem:[#allocation4 + $0x3b0] sm:$0xf0]  ;;  %v4542_v26 = vld [vmem:[#allocation4 + $0x16c] sm:$0xf0]  ;;  %956 = vmatpush.bf16.msra.mxu0 %v5187_v30 }
  0x52   :  { %7089 = vst [vmem:[#allocation82_spill] sm:$0xff] %v5187_v30  ;;  %v5194_v4 = vor.u32 %v4610_v31, %v4230_v41  ;;  %v4196_v10 = vld [vmem:[#allocation4 + $0x350] sm:$0xf]  ;;  %v4538_v39 = vld [vmem:[#allocation4 + $0x154] sm:$0xf]  ;;  %v5200_v53 = vor.u32 %v4542_v26, %v3940_v24  ;;  %982 = vmatpush.bf16.msra.mxu2 %v5192_v0 }
  0x53   :  { %7090 = vst [vmem:[#allocation83_spill] sm:$0xff] %v5189_v49  ;;  %v4606_v40 = vld [vmem:[#allocation4 + $0x36c] sm:$0xf0]  ;;  %v3942_v20 = vld [vmem:[#allocation4 + $0x170] sm:$0xf0]  ;;  %937 = vmatmul.bf16.vlgmr.msrb.gmra.mxu2 %v5128_v47  ;;  %950 = vmatmul.bf16.vlgmr.msrb.gmra.mxu3 %v5130_v15 }
  0x54   :  { %7091 = vst [vmem:[#allocation84_spill] sm:$0xff] %v5192_v0  ;;  %v4602_v1 = vld [vmem:[#allocation4 + $0x354] sm:$0xf]  ;;  %969 = vmatpush.bf16.msra.mxu1 %v5189_v49  ;;  %v5202_v13 = vor.u32 %v4606_v40, %v4196_v10  ;;  %v3908_v42 = vld [vmem:[#allocation4 + $0x110] sm:$0xf]  ;;  %995 = vmatpush.bf16.msra.mxu3 %v5194_v4  ;;  %v5206_v37 = vor.u32 %v4538_v39, %v3942_v20 }
  0x55   :  { %7092 = vst [vmem:[#allocation85_spill] sm:$0xff] %v5194_v4  ;;  %v4198_v63 = vld [vmem:[#allocation4 + $0x370] sm:$0xf0]  ;;  %v4534_v18 = vld [vmem:[#allocation4 + $0x12c] sm:$0xf0]  ;;  %911 = vmatmul.bf16.vlgmr.msrb.gmra.mxu0 %v5128_v47  ;;  %924 = vmatmul.bf16.vlgmr.msrb.gmra.mxu1 %v5130_v15 }
  0x56   :  { %7093 = vst [vmem:[#allocation86_spill] sm:$0xff] %v5200_v53  ;;  %v5208_v22 = vor.u32 %v4602_v1, %v4198_v63  ;;  %v4164_v31 = vld [vmem:[#allocation4 + $0x310] sm:$0xf]  ;;  %v4530_v54 = vld [vmem:[#allocation4 + $0x114] sm:$0xf]  ;;  %957 = vmatpush.bf16.msra.mxu0 %v5200_v53  ;;  %v5214_v10 = vor.u32 %v4534_v18, %v3908_v42  ;;  %983 = vmatpush.bf16.msra.mxu2 %v5206_v37 }
  0x57   :  { %7094 = vst [vmem:[#allocation87_spill] sm:$0xff] %v5202_v13  ;;  %v4598_v41 = vld [vmem:[#allocation4 + $0x32c] sm:$0xf0]  ;;  %v3910_v24 = vld [vmem:[#allocation4 + $0x130] sm:$0xf0] }
  0x58   :  { %7095 = vst [vmem:[#allocation88_spill] sm:$0xff] %v5206_v37  ;;  %v4594_v40 = vld [vmem:[#allocation4 + $0x314] sm:$0xf]  ;;  %970 = vmatpush.bf16.msra.mxu1 %v5202_v13  ;;  %v5216_v20 = vor.u32 %v4598_v41, %v4164_v31  ;;  %v3876_v39 = vld [vmem:[#allocation4 + $0xd0] sm:$0xf]  ;;  %996 = vmatpush.bf16.msra.mxu3 %v5208_v22  ;;  %v5220_v63 = vor.u32 %v4530_v54, %v3910_v24 }
  0x59   :  { %7096 = vst [vmem:[#allocation89_spill] sm:$0xff] %v5208_v22  ;;  %v4166_v26 = vld [vmem:[#allocation4 + $0x330] sm:$0xf0]  ;;  %v4526_v1 = vld [vmem:[#allocation4 + $0xec] sm:$0xf0] }
  0x5a   :  { %7097 = vst [vmem:[#allocation90_spill] sm:$0xff] %v5214_v10  ;;  %v5222_v4 = vor.u32 %v4594_v40, %v4166_v26  ;;  %v4132_v0 = vld [vmem:[#allocation4 + $0x2d0] sm:$0xf]  ;;  %v4522_v30 = vld [vmem:[#allocation4 + $0xd4] sm:$0xf]  ;;  %958 = vmatpush.bf16.msra.mxu0 %v5214_v10  ;;  %v5226_v42 = vor.u32 %v4526_v1, %v3876_v39  ;;  %984 = vmatpush.bf16.msra.mxu2 %v5220_v63 }
  0x5b   :  { %7098 = vst [vmem:[#allocation91_spill] sm:$0xff] %v5216_v20  ;;  %v4590_v49 = vld [vmem:[#allocation4 + $0x2ec] sm:$0xf0]  ;;  %v3878_v53 = vld [vmem:[#allocation4 + $0xf0] sm:$0xf0] }
  0x5c   :  { %7099 = vst [vmem:[#allocation92_spill] sm:$0xff] %v5220_v63  ;;  %v4586_v11 = vld [vmem:[#allocation4 + $0x2d4] sm:$0xf]  ;;  %971 = vmatpush.bf16.msra.mxu1 %v5216_v20  ;;  %v5228_v18 = vor.u32 %v4590_v49, %v4132_v0  ;;  %v3844_v31 = vld [vmem:[#allocation4 + $0x90] sm:$0xf]  ;;  %997 = vmatpush.bf16.msra.mxu3 %v5222_v4  ;;  %v5232_v54 = vor.u32 %v4522_v30, %v3878_v53 }
  0x5d   :  { %7100 = vst [vmem:[#allocation93_spill] sm:$0xff] %v5222_v4  ;;  %v4134_v13 = vld [vmem:[#allocation4 + $0x2f0] sm:$0xf0]  ;;  %v4518_v41 = vld [vmem:[#allocation4 + $0xac] sm:$0xf0] }
  0x5e   :  { %7101 = vst [vmem:[#allocation94_spill] sm:$0xff] %v5226_v42  ;;  %v5234_v24 = vor.u32 %v4586_v11, %v4134_v13  ;;  %v4100_v40 = vld [vmem:[#allocation4 + $0x290] sm:$0xf]  ;;  %v4514_v22 = vld [vmem:[#allocation4 + $0x94] sm:$0xf]  ;;  %959 = vmatpush.bf16.msra.mxu0 %v5226_v42  ;;  %v5238_v49 = vor.u32 %v4518_v41, %v3844_v31  ;;  %985 = vmatpush.bf16.msra.mxu2 %v5232_v54 }
  0x5f   :  { %7102 = vst [vmem:[#allocation95_spill] sm:$0xff] %v5228_v18  ;;  %v4582_v26 = vld [vmem:[#allocation4 + $0x2ac] sm:$0xf0]  ;;  %v3846_v10 = vld [vmem:[#allocation4 + $0xb0] sm:$0xf0] }
  0x60   :  { %7103 = vst [vmem:[#allocation96_spill] sm:$0xff] %v5232_v54  ;;  %v4578_v37 = vld [vmem:[#allocation4 + $0x294] sm:$0xf]  ;;  %v3812_v39 = vld [vmem:[#allocation4 + $0x50] sm:$0xf]  ;;  %972 = vmatpush.bf16.msra.mxu1 %v5228_v18  ;;  %v5240_v0 = vor.u32 %v4582_v26, %v4100_v40  ;;  %998 = vmatpush.bf16.msra.mxu3 %v5234_v24  ;;  %v5244_v11 = vor.u32 %v4514_v22, %v3846_v10 }
  0x61   :  { %7104 = vst [vmem:[#allocation97_spill] sm:$0xff] %v5234_v24  ;;  %v4102_v20 = vld [vmem:[#allocation4 + $0x2b0] sm:$0xf0]  ;;  %v4510_v1 = vld [vmem:[#allocation4 + $0x6c] sm:$0xf0] }
  0x62   :  { %7105 = vst [vmem:[#allocation98_spill] sm:$0xff] %v5238_v49  ;;  %v4068_v30 = vld [vmem:[#allocation4 + $0x250] sm:$0xf]  ;;  %v5246_v13 = vor.u32 %v4578_v37, %v4102_v20  ;;  %v4506_v4 = vld [vmem:[#allocation4 + $0x54] sm:$0xf]  ;;  %960 = vmatpush.bf16.msra.mxu0 %v5238_v49  ;;  %v5250_v41 = vor.u32 %v4510_v1, %v3812_v39  ;;  %986 = vmatpush.bf16.msra.mxu2 %v5244_v11 }
  0x63   :  { %7106 = vst [vmem:[#allocation99_spill] sm:$0xff] %v5240_v0  ;;  %v4574_v53 = vld [vmem:[#allocation4 + $0x26c] sm:$0xf0]  ;;  %v3814_v63 = vld [vmem:[#allocation4 + $0x70] sm:$0xf0] }
  0x64   :  { %7107 = vst [vmem:[#allocation100_spill] sm:$0xff] %v5244_v11  ;;  %v4570_v42 = vld [vmem:[#allocation4 + $0x254] sm:$0xf]  ;;  %v3780_v18 = vld [vmem:[#allocation4 + $0x10] sm:$0xf]  ;;  %973 = vmatpush.bf16.msra.mxu1 %v5240_v0  ;;  %v5252_v40 = vor.u32 %v4574_v53, %v4068_v30  ;;  %999 = vmatpush.bf16.msra.mxu3 %v5246_v13  ;;  %v5256_v37 = vor.u32 %v4506_v4, %v3814_v63 }
  0x65   :  { %7108 = vst [vmem:[#allocation101_spill] sm:$0xff] %v5246_v13  ;;  %v4070_v32 = vld [vmem:[#allocation4 + $0x270] sm:$0xf0]  ;;  %v4502_v31 = vld [vmem:[#allocation4 + $0x2c] sm:$0xf0] }
  0x66   :  { %7109 = vst [vmem:[#allocation102_spill] sm:$0xff] %v5250_v41  ;;  %v4036_v26 = vld [vmem:[#allocation4 + $0x210] sm:$0xf]  ;;  %v4498_v22 = vld [vmem:[#allocation4 + $0x14] sm:$0xf]  ;;  %v5258_v10 = vor.u32 %v4570_v42, %v4070_v32  ;;  %961 = vmatpush.bf16.msra.mxu0 %v5250_v41  ;;  %v5262_v53 = vor.u32 %v4502_v31, %v3780_v18  ;;  %987 = vmatpush.bf16.msra.mxu2 %v5256_v37 }
  0x67   :  { %7110 = vst [vmem:[#allocation103_spill] sm:$0xff] %v5252_v40  ;;  %v4566_v24 = vld [vmem:[#allocation4 + $0x22c] sm:$0xf0]  ;;  %v3782_v20 = vld [vmem:[#allocation4 + $0x30] sm:$0xf0] }
  0x68   :  { %7111 = vst [vmem:[#allocation104_spill] sm:$0xff] %v5256_v37  ;;  %v4562_v54 = vld [vmem:[#allocation4 + $0x214] sm:$0xf]  ;;  %v4012_v48 = vld [vmem:[#allocation4 + $0x1d8] sm:$0xf]  ;;  %974 = vmatpush.bf16.msra.mxu1 %v5252_v40  ;;  %v5264_v11 = vor.u32 %v4566_v24, %v4036_v26  ;;  %1000 = vmatpush.bf16.msra.mxu3 %v5258_v10  ;;  %v5268_v42 = vor.u32 %v4498_v22, %v3782_v20 }
  0x69   :  { %7112 = vst [vmem:[#allocation105_spill] sm:$0xff] %v5258_v10  ;;  %v4038_v49 = vld [vmem:[#allocation4 + $0x230] sm:$0xf0]  ;;  %v4559_v0 = vld [vmem:[#allocation4 + $0x1f4] sm:$0xf0] }
  0x6a   :  { %v4268_v39 = vld [vmem:[#allocation4 + $0x3d8] sm:$0xf]  ;;  %v4555_v30 = vld [vmem:[#allocation4 + $0x1dc] sm:$0xf]  ;;  %7113 = vst [vmem:[#allocation106_spill] sm:$0xff] %v5262_v53  ;;  %v5270_v13 = vor.u32 %v4562_v54, %v4038_v49  ;;  %v5272_v36 = vor.u32 %v4559_v0, %v4012_v48  ;;  %962 = vmatpush.bf16.msra.mxu0 %v5262_v53  ;;  %988 = vmatpush.bf16.msra.mxu2 %v5268_v42 }
  0x6b   :  { %v4623_v1 = vld [vmem:[#allocation4 + $0x3f4] sm:$0xf0]  ;;  %7114 = vst [vmem:[#allocation107_spill] sm:$0xff] %v5264_v11  ;;  %v4014_v4 = vld [vmem:[#allocation4 + $0x1f8] sm:$0xf0] }
  0x6c   :  { %v4619_v63 = vld [vmem:[#allocation4 + $0x3dc] sm:$0xf]  ;;  %7115 = vst [vmem:[#allocation108_spill] sm:$0xff] %v5268_v42  ;;  %v5274_v41 = vor.u32 %v4623_v1, %v4268_v39  ;;  %v3980_v40 = vld [vmem:[#allocation4 + $0x198] sm:$0xf]  ;;  %v5276_v31 = vor.u32 %v4555_v30, %v4014_v4  ;;  %975 = vmatpush.bf16.msra.mxu1 %v5264_v11  ;;  %1001 = vmatpush.bf16.msra.mxu3 %v5270_v13 }
  0x6d   :  { %v4270_v32 = vld [vmem:[#allocation4 + $0x3f8] sm:$0xf0]  ;;  %7116 = vst [vmem:[#allocation109_spill] sm:$0xff] %v5270_v13  ;;  %v4551_v18 = vld [vmem:[#allocation4 + $0x1b4] sm:$0xf0]  ;;  %989 = vmatmul.bf16.vlgmr.msra.gmra.mxu2 %v5128_v47  ;;  %963 = vmatmul.bf16.vlgmr.msra.gmra.mxu0 %v5128_v47 }
  0x6e   :  { %7117 = vst [vmem:[#allocation110_spill] sm:$0xff] %v5272_v36  ;;  %v5278_v24 = vor.u32 %v4619_v63, %v4270_v32  ;;  %v4236_v26 = vld [vmem:[#allocation4 + $0x398] sm:$0xf]  ;;  %v4547_v2 = vld [vmem:[#allocation4 + $0x19c] sm:$0xf]  ;;  %1007 = vmatpush.bf16.msrb.mxu0 %v5272_v36  ;;  %v5286_v48 = vor.u32 %v4551_v18, %v3980_v40  ;;  %1033 = vmatpush.bf16.msrb.mxu2 %v5276_v31 }
  0x6f   :  { %7118 = vst [vmem:[#allocation111_spill] sm:$0xff] %v5274_v41  ;;  %v4615_v19 = vld [vmem:[#allocation4 + $0x3b4] sm:$0xf0]  ;;  %v3982_v22 = vld [vmem:[#allocation4 + $0x1b8] sm:$0xf0]  ;;  %1002 = vmatmul.bf16.vlgmr.msra.gmra.mxu3 %v5130_v15  ;;  %976 = vmatmul.bf16.vlgmr.msra.gmra.mxu1 %v5130_v15 }
  0x70   :  { %7119 = vst [vmem:[#allocation112_spill] sm:$0xff] %v5276_v31  ;;  %v4611_v54 = vld [vmem:[#allocation4 + $0x39c] sm:$0xf]  ;;  %1020 = vmatpush.bf16.msrb.mxu1 %v5274_v41  ;;  %v5288_v0 = vor.u32 %v4615_v19, %v4236_v26  ;;  %v3948_v20 = vld [vmem:[#allocation4 + $0x158] sm:$0xf]  ;;  %1046 = vmatpush.bf16.msrb.mxu3 %v5278_v24  ;;  %v5292_v1 = vor.u32 %v4547_v2, %v3982_v22 }
  0x71   :  { %7120 = vst [vmem:[#allocation113_spill] sm:$0xff] %v5278_v24  ;;  %v4238_v49 = vld [vmem:[#allocation4 + $0x3b8] sm:$0xf0]  ;;  %v4543_v39 = vld [vmem:[#allocation4 + $0x174] sm:$0xf0] }
  0x72   :  { %7121 = vst [vmem:[#allocation114_spill] sm:$0xff] %v5286_v48  ;;  %v5294_v30 = vor.u32 %v4611_v54, %v4238_v49  ;;  %v4204_v4 = vld [vmem:[#allocation4 + $0x358] sm:$0xf]  ;;  %v4539_v32 = vld [vmem:[#allocation4 + $0x15c] sm:$0xf]  ;;  %1008 = vmatpush.bf16.msrb.mxu0 %v5286_v48  ;;  %v5302_v2 = vor.u32 %v4543_v39, %v3948_v20  ;;  %1034 = vmatpush.bf16.msrb.mxu2 %v5292_v1 }
  0x73   :  { %7122 = vst [vmem:[#allocation115_spill] sm:$0xff] %v5288_v0  ;;  %v4607_v63 = vld [vmem:[#allocation4 + $0x374] sm:$0xf0]  ;;  %v3950_v40 = vld [vmem:[#allocation4 + $0x178] sm:$0xf0] }
  0x74   :  { %7123 = vst [vmem:[#allocation116_spill] sm:$0xff] %v5292_v1  ;;  %v4603_v19 = vld [vmem:[#allocation4 + $0x35c] sm:$0xf]  ;;  %1021 = vmatpush.bf16.msrb.mxu1 %v5288_v0  ;;  %v5304_v26 = vor.u32 %v4607_v63, %v4204_v4  ;;  %v3916_v22 = vld [vmem:[#allocation4 + $0x118] sm:$0xf]  ;;  %1047 = vmatpush.bf16.msrb.mxu3 %v5294_v30  ;;  %v5308_v49 = vor.u32 %v4539_v32, %v3950_v40 }
  0x75   :  { %7124 = vst [vmem:[#allocation117_spill] sm:$0xff] %v5294_v30  ;;  %v4206_v18 = vld [vmem:[#allocation4 + $0x378] sm:$0xf0]  ;;  %v4535_v54 = vld [vmem:[#allocation4 + $0x134] sm:$0xf0] }
  0x76   :  { %7125 = vst [vmem:[#allocation118_spill] sm:$0xff] %v5302_v2  ;;  %v5310_v24 = vor.u32 %v4603_v19, %v4206_v18  ;;  %v4172_v31 = vld [vmem:[#allocation4 + $0x318] sm:$0xf]  ;;  %v4531_v36 = vld [vmem:[#allocation4 + $0x11c] sm:$0xf]  ;;  %1009 = vmatpush.bf16.msrb.mxu0 %v5302_v2  ;;  %v5314_v20 = vor.u32 %v4535_v54, %v3916_v22  ;;  %1035 = vmatpush.bf16.msrb.mxu2 %v5308_v49 }
  0x77   :  { %7126 = vst [vmem:[#allocation119_spill] sm:$0xff] %v5304_v26  ;;  %v4599_v41 = vld [vmem:[#allocation4 + $0x334] sm:$0xf0]  ;;  %v3918_v48 = vld [vmem:[#allocation4 + $0x138] sm:$0xf0] }
  0x78   :  { %7127 = vst [vmem:[#allocation120_spill] sm:$0xff] %v5308_v49  ;;  %v4595_v13 = vld [vmem:[#allocation4 + $0x31c] sm:$0xf]  ;;  %1022 = vmatpush.bf16.msrb.mxu1 %v5304_v26  ;;  %v5316_v39 = vor.u32 %v4599_v41, %v4172_v31  ;;  %v3884_v4 = vld [vmem:[#allocation4 + $0xd8] sm:$0xf]  ;;  %1048 = vmatpush.bf16.msrb.mxu3 %v5310_v24  ;;  %v5320_v32 = vor.u32 %v4531_v36, %v3918_v48 }
  0x79   :  { %7128 = vst [vmem:[#allocation121_spill] sm:$0xff] %v5310_v24  ;;  %v4174_v0 = vld [vmem:[#allocation4 + $0x338] sm:$0xf0]  ;;  %v4527_v63 = vld [vmem:[#allocation4 + $0xf4] sm:$0xf0] }
  0x7a   :  { %7129 = vst [vmem:[#allocation122_spill] sm:$0xff] %v5314_v20  ;;  %v5322_v40 = vor.u32 %v4595_v13, %v4174_v0  ;;  %v4140_v19 = vld [vmem:[#allocation4 + $0x2d8] sm:$0xf]  ;;  %v4523_v30 = vld [vmem:[#allocation4 + $0xdc] sm:$0xf]  ;;  %1010 = vmatpush.bf16.msrb.mxu0 %v5314_v20  ;;  %v5326_v41 = vor.u32 %v4527_v63, %v3884_v4  ;;  %1036 = vmatpush.bf16.msrb.mxu2 %v5320_v32 }
  0x7b   :  { %7130 = vst [vmem:[#allocation123_spill] sm:$0xff] %v5316_v39  ;;  %v4591_v18 = vld [vmem:[#allocation4 + $0x2f4] sm:$0xf0]  ;;  %v3886_v2 = vld [vmem:[#allocation4 + $0xf8] sm:$0xf0] }
  0x7c   :  { %7131 = vst [vmem:[#allocation124_spill] sm:$0xff] %v5320_v32  ;;  %v4587_v1 = vld [vmem:[#allocation4 + $0x2dc] sm:$0xf]  ;;  %1023 = vmatpush.bf16.msrb.mxu1 %v5316_v39  ;;  %v5328_v31 = vor.u32 %v4591_v18, %v4140_v19  ;;  %v3852_v22 = vld [vmem:[#allocation4 + $0x98] sm:$0xf]  ;;  %1049 = vmatpush.bf16.msrb.mxu3 %v5322_v40  ;;  %v5332_v36 = vor.u32 %v4523_v30, %v3886_v2 }
  0x7d   :  { %7132 = vst [vmem:[#allocation125_spill] sm:$0xff] %v5322_v40  ;;  %v4142_v26 = vld [vmem:[#allocation4 + $0x2f8] sm:$0xf0]  ;;  %v4519_v54 = vld [vmem:[#allocation4 + $0xb4] sm:$0xf0] }
  0x7e   :  { %7133 = vst [vmem:[#allocation126_spill] sm:$0xff] %v5326_v41  ;;  %v5334_v13 = vor.u32 %v4587_v1, %v4142_v26  ;;  %v4108_v48 = vld [vmem:[#allocation4 + $0x298] sm:$0xf]  ;;  %v4515_v24 = vld [vmem:[#allocation4 + $0x9c] sm:$0xf]  ;;  %1011 = vmatpush.bf16.msrb.mxu0 %v5326_v41  ;;  %v5338_v4 = vor.u32 %v4519_v54, %v3852_v22  ;;  %1037 = vmatpush.bf16.msrb.mxu2 %v5332_v36 }
  0x7f   :  { %7134 = vst [vmem:[#allocation127_spill] sm:$0xff] %v5328_v31  ;;  %v4583_v0 = vld [vmem:[#allocation4 + $0x2b4] sm:$0xf0]  ;;  %v3854_v20 = vld [vmem:[#allocation4 + $0xb8] sm:$0xf0] }
  0x80   :  { %7135 = vst [vmem:[#allocation128_spill] sm:$0xff] %v5332_v36  ;;  %v4579_v49 = vld [vmem:[#allocation4 + $0x29c] sm:$0xf]  ;;  %1024 = vmatpush.bf16.msrb.mxu1 %v5328_v31  ;;  %v5340_v63 = vor.u32 %v4583_v0, %v4108_v48  ;;  %v3820_v19 = vld [vmem:[#allocation4 + $0x58] sm:$0xf]  ;;  %1050 = vmatpush.bf16.msrb.mxu3 %v5334_v13  ;;  %v5344_v1 = vor.u32 %v4515_v24, %v3854_v20 }
  0x81   :  { %7136 = vst [vmem:[#allocation129_spill] sm:$0xff] %v5334_v13  ;;  %v4110_v39 = vld [vmem:[#allocation4 + $0x2b8] sm:$0xf0]  ;;  %v4511_v18 = vld [vmem:[#allocation4 + $0x74] sm:$0xf0] }
  0x82   :  { %7137 = vst [vmem:[#allocation130_spill] sm:$0xff] %v5338_v4  ;;  %v5346_v30 = vor.u32 %v4579_v49, %v4110_v39  ;;  %v4076_v2 = vld [vmem:[#allocation4 + $0x258] sm:$0xf]  ;;  %v4507_v40 = vld [vmem:[#allocation4 + $0x5c] sm:$0xf]  ;;  %1012 = vmatpush.bf16.msrb.mxu0 %v5338_v4  ;;  %v5350_v22 = vor.u32 %v4511_v18, %v3820_v19  ;;  %1038 = vmatpush.bf16.msrb.mxu2 %v5344_v1 }
  0x83   :  { %7138 = vst [vmem:[#allocation131_spill] sm:$0xff] %v5340_v63  ;;  %v4575_v26 = vld [vmem:[#allocation4 + $0x274] sm:$0xf0]  ;;  %v3822_v41 = vld [vmem:[#allocation4 + $0x78] sm:$0xf0] }
  0x84   :  { %7139 = vst [vmem:[#allocation132_spill] sm:$0xff] %v5344_v1  ;;  %v4571_v32 = vld [vmem:[#allocation4 + $0x25c] sm:$0xf]  ;;  %1025 = vmatpush.bf16.msrb.mxu1 %v5340_v63  ;;  %v5352_v54 = vor.u32 %v4575_v26, %v4076_v2  ;;  %v3788_v48 = vld [vmem:[#allocation4 + $0x18] sm:$0xf]  ;;  %1051 = vmatpush.bf16.msrb.mxu3 %v5346_v30  ;;  %v5356_v24 = vor.u32 %v4507_v40, %v3822_v41  ;;  %v7157_v2 = vld [vmem:[#allocation57_spill] sm:$0xff] }
  0x85   :  { %7140 = vst [vmem:[#allocation133_spill] sm:$0xff] %v5346_v30  ;;  %v4078_v31 = vld [vmem:[#allocation4 + $0x278] sm:$0xf0]  ;;  %v4503_v0 = vld [vmem:[#allocation4 + $0x34] sm:$0xf0]  ;;  %v7158_v26 = vld [vmem:[#allocation58_spill] sm:$0xff] }
  0x86   :  { %7141 = vst [vmem:[#allocation134_spill] sm:$0xff] %v5350_v22  ;;  %v5358_v49 = vor.u32 %v4571_v32, %v4078_v31  ;;  %v4044_v20 = vld [vmem:[#allocation4 + $0x218] sm:$0xf]  ;;  %v4499_v13 = vld [vmem:[#allocation4 + $0x1c] sm:$0xf]  ;;  %1013 = vmatpush.bf16.msrb.mxu0 %v5350_v22  ;;  %v5362_v19 = vor.u32 %v4503_v0, %v3788_v48  ;;  %1039 = vmatpush.bf16.msrb.mxu2 %v5356_v24 }
  0x87   :  { %7142 = vst [vmem:[#allocation135_spill] sm:$0xff] %v5352_v54  ;;  %v4567_v39 = vld [vmem:[#allocation4 + $0x234] sm:$0xf0]  ;;  %v3790_v4 = vld [vmem:[#allocation4 + $0x38] sm:$0xf0] }
  0x88   :  { %7143 = vst [vmem:[#allocation136_spill] sm:$0xff] %v5356_v24  ;;  %v4563_v36 = vld [vmem:[#allocation4 + $0x21c] sm:$0xf]  ;;  %1026 = vmatpush.bf16.msrb.mxu1 %v5352_v54  ;;  %v5364_v18 = vor.u32 %v4567_v39, %v4044_v20  ;;  %1052 = vmatpush.bf16.msrb.mxu3 %v5358_v49  ;;  %v5368_v32 = vor.u32 %v4499_v13, %v3790_v4  ;;  %v7151_v41 = vld [vmem:[#allocation51_spill] sm:$0xff]  ;;  %v7154_v13 = vld [vmem:[#allocation54_spill] sm:$0xff] }
  0x89   :  { %7144 = vst [vmem:[#allocation137_spill] sm:$0xff] %v5358_v49  ;;  %v4046_v63 = vld [vmem:[#allocation4 + $0x238] sm:$0xf0]  ;;  %v7155_v4 = vld [vmem:[#allocation55_spill] sm:$0xff]  ;;  %v7161_v20 = vld [vmem:[#allocation61_spill] sm:$0xff] }
  0x8a   :  { %7145 = vst [vmem:[#allocation138_spill] sm:$0xff] %v5362_v19  ;;  %v5370_v40 = vor.u32 %v4563_v36, %v4046_v63  ;;  %1014 = vmatpush.bf16.msrb.mxu0 %v5362_v19  ;;  %1040 = vmatpush.bf16.msrb.mxu2 %v5368_v32  ;;  %v7152_v31 = vld [vmem:[#allocation52_spill] sm:$0xff]  ;;  %v7153_v36 = vld [vmem:[#allocation53_spill] sm:$0xff]  ;;  %v7159_v48 = vld [vmem:[#allocation59_spill] sm:$0xff] }
  0x8b   :  { %7146 = vst [vmem:[#allocation139_spill] sm:$0xff] %v5364_v18  ;;  %v7156_v63 = vld [vmem:[#allocation56_spill] sm:$0xff]  ;;  %v7162_v39 = vld [vmem:[#allocation62_spill] sm:$0xff] }
  0x8c   :  { %7147 = vst [vmem:[#allocation140_spill] sm:$0xff] %v5368_v32  ;;  %1027 = vmatpush.bf16.msrb.mxu1 %v5364_v18  ;;  %1053 = vmatpush.bf16.msrb.mxu3 %v5370_v40  ;;  %v7160_v0 = vld [vmem:[#allocation60_spill] sm:$0xff] }
  0x8d   :  { %7148 = vst [vmem:[#allocation141_spill] sm:$0xff] %v5370_v40  ;;  %1015 = vmatmul.bf16.vlgmr.msrb.gmra.mxu0 %v5128_v47  ;;  %1041 = vmatmul.bf16.vlgmr.msrb.gmra.mxu2 %v5128_v47  ;;  %v7149_v47 = vld [vmem:[#allocation49_spill] sm:$0xff] }
  0x8e   :  { %1147 = vmatpush.bf16.msra.mxu0 %v4973_v3  ;;  %1173 = vmatpush.bf16.msra.mxu2 %v4977_v8 }
  0x8f   :  { %1028 = vmatmul.bf16.vlgmr.msrb.gmra.mxu1 %v5130_v15  ;;  %1054 = vmatmul.bf16.vlgmr.msrb.gmra.mxu3 %v5130_v15  ;;  %v7150_v15 = vld [vmem:[#allocation50_spill] sm:$0xff] }
  0x90   :  { %1160 = vmatpush.bf16.msra.mxu1 %v4975_v7  ;;  %1186 = vmatpush.bf16.msra.mxu3 %v4980_v12 }
  0x92   :  { %1148 = vmatpush.bf16.msra.mxu0 %v4984_v16  ;;  %1174 = vmatpush.bf16.msra.mxu2 %v4989_v21 }
  0x94   :  { %1161 = vmatpush.bf16.msra.mxu1 %v4986_v17  ;;  %1187 = vmatpush.bf16.msra.mxu3 %v4991_v25 }
  0x96   :  { %1149 = vmatpush.bf16.msra.mxu0 %v4994_v29  ;;  %1175 = vmatpush.bf16.msra.mxu2 %v5000_v34 }
  0x98   :  { %1162 = vmatpush.bf16.msra.mxu1 %v4998_v33  ;;  %1188 = vmatpush.bf16.msra.mxu3 %v5003_v38 }
  0x9a   :  { %1150 = vmatpush.bf16.msra.mxu0 %v5006_v44  ;;  %1176 = vmatpush.bf16.msra.mxu2 %v5012_v46 }
  0x9c   :  { %1163 = vmatpush.bf16.msra.mxu1 %v5010_v45  ;;  %1189 = vmatpush.bf16.msra.mxu3 %v5015_v50 }
  0x9e   :  { %1151 = vmatpush.bf16.msra.mxu0 %v5018_v56  ;;  %1177 = vmatpush.bf16.msra.mxu2 %v5024_v58 }
  0xa0   :  { %1164 = vmatpush.bf16.msra.mxu1 %v5022_v57  ;;  %1190 = vmatpush.bf16.msra.mxu3 %v5027_v62 }
  0xa2   :  { %1152 = vmatpush.bf16.msra.mxu0 %v5030_v5  ;;  %1178 = vmatpush.bf16.msra.mxu2 %v5036_v9 }
  0xa4   :  { %1165 = vmatpush.bf16.msra.mxu1 %v5034_v6  ;;  %1191 = vmatpush.bf16.msra.mxu3 %v5039_v14 }
  0xa6   :  { %1153 = vmatpush.bf16.msra.mxu0 %v5042_v23  ;;  %1179 = vmatpush.bf16.msra.mxu2 %v5048_v28 }
  0xa8   :  { %1166 = vmatpush.bf16.msra.mxu1 %v5046_v27  ;;  %1192 = vmatpush.bf16.msra.mxu3 %v5051_v35 }
  0xaa   :  { %1154 = vmatpush.bf16.msra.mxu0 %v5054_v43  ;;  %1180 = vmatpush.bf16.msra.mxu2 %v5060_v52 }
  0xac   :  { %1167 = vmatpush.bf16.msra.mxu1 %v5058_v51  ;;  %1193 = vmatpush.bf16.msra.mxu3 %v5063_v55 }
  0xae   :  { %1199 = vmatpush.bf16.msrb.mxu0 %v5065_v59  ;;  %1225 = vmatpush.bf16.msrb.mxu2 %v5069_v61 }
  0xb0   :  { %1212 = vmatpush.bf16.msrb.mxu1 %v5067_v60  ;;  %1238 = vmatpush.bf16.msrb.mxu3 %v7149_v47  ;;  %v7177_v47 = vld [vmem:[#allocation79_spill] sm:$0xff] }
  0xb2   :  { %1200 = vmatpush.bf16.msrb.mxu0 %v7150_v15  ;;  %1226 = vmatpush.bf16.msrb.mxu2 %v7152_v31  ;;  %v7163_v31 = vld [vmem:[#allocation63_spill] sm:$0xff] }
  0xb4   :  { %1213 = vmatpush.bf16.msrb.mxu1 %v7151_v41  ;;  %1239 = vmatpush.bf16.msrb.mxu3 %v7153_v36  ;;  %v7164_v36 = vld [vmem:[#allocation64_spill] sm:$0xff] }
  0xb6   :  { %1201 = vmatpush.bf16.msrb.mxu0 %v7154_v13  ;;  %1227 = vmatpush.bf16.msrb.mxu2 %v7156_v63  ;;  %v7165_v13 = vld [vmem:[#allocation65_spill] sm:$0xff]  ;;  %v7167_v63 = vld [vmem:[#allocation67_spill] sm:$0xff] }
  0xb8   :  { %1214 = vmatpush.bf16.msrb.mxu1 %v7155_v4  ;;  %1240 = vmatpush.bf16.msrb.mxu3 %v7157_v2  ;;  %v7166_v4 = vld [vmem:[#allocation66_spill] sm:$0xff]  ;;  %v7168_v2 = vld [vmem:[#allocation68_spill] sm:$0xff] }
  0xba   :  { %1202 = vmatpush.bf16.msrb.mxu0 %v7158_v26  ;;  %1228 = vmatpush.bf16.msrb.mxu2 %v7160_v0  ;;  %v7169_v26 = vld [vmem:[#allocation69_spill] sm:$0xff]  ;;  %v7170_v0 = vld [vmem:[#allocation70_spill] sm:$0xff] }
  0xbc   :  { %1215 = vmatpush.bf16.msrb.mxu1 %v7159_v48  ;;  %1241 = vmatpush.bf16.msrb.mxu3 %v7161_v20  ;;  %v7171_v20 = vld [vmem:[#allocation71_spill] sm:$0xff] }
  0xbe   :  { %1203 = vmatpush.bf16.msrb.mxu0 %v7162_v39  ;;  %1229 = vmatpush.bf16.msrb.mxu2 %v7164_v36  ;;  %v7173_v36 = vld [vmem:[#allocation73_spill] sm:$0xff] }
  0xc0   :  { %1216 = vmatpush.bf16.msrb.mxu1 %v7163_v31  ;;  %1242 = vmatpush.bf16.msrb.mxu3 %v7165_v13  ;;  %v7172_v31 = vld [vmem:[#allocation72_spill] sm:$0xff]  ;;  %v7174_v13 = vld [vmem:[#allocation74_spill] sm:$0xff] }
  0xc1   :  { %v860_v48 = vpop.f32.mrf.mxu0  ;;  %v873_v39 = vpop.f32.mrf.mxu1 }
  0xc2   :  { %1204 = vmatpush.bf16.msrb.mxu0 %v7166_v4  ;;  %1230 = vmatpush.bf16.msrb.mxu2 %v7168_v2  ;;  %v874_v41 = vadd.f32 %v873_v39, %v860_v48  ;;  %v7175_v4 = vld [vmem:[#allocation75_spill] sm:$0xff] }
  0xc4   :  { %1217 = vmatpush.bf16.msrb.mxu1 %v7167_v63  ;;  %1243 = vmatpush.bf16.msrb.mxu3 %v7169_v26  ;;  %v7176_v26 = vld [vmem:[#allocation76_spill] sm:$0xff] }
  0xc6   :  { %1205 = vmatpush.bf16.msrb.mxu0 %v7170_v0  ;;  %1231 = vmatpush.bf16.msrb.mxu2 %v7172_v31  ;;  %v886_v63 = vpop.f32.mrf.mxu2  ;;  %v899_v15 = vpop.f32.mrf.mxu3 }
  0xc7   :  { %v900_v2 = vadd.f32 %v899_v15, %v886_v63 }
  0xc8   :  { %1218 = vmatpush.bf16.msrb.mxu1 %v7171_v20  ;;  %1244 = vmatpush.bf16.msrb.mxu3 %v7173_v36 }
  0xc9   :  { %v1067_v0 = vrot.slane %v900_v2, 6  ;;  %v862_v20 = vpop.f32.mrf.mxu0  ;;  %v875_v61 = vpop.f32.mrf.mxu1 }
  0xca   :  { %1206 = vmatpush.bf16.msrb.mxu0 %v7174_v13  ;;  %1232 = vmatpush.bf16.msrb.mxu2 %v7176_v26 }
  0xcb   :  { %v1074_v48 = vsel %vm1073_vm0, %v874_v41, %v1067_v0 }
  0xcc   :  { %1219 = vmatpush.bf16.msrb.mxu1 %v7175_v4  ;;  %1245 = vmatpush.bf16.msrb.mxu3 %v7177_v47  ;;  %v69_v4 = vld [vmem:[%s6738_s3] sm:$0xf]  ;;  %s4888_s3 = smov [#allocation7]  }
  0xcd   :  { %70 = vst [vmem:[#allocation3] sm:$0xf] %v69_v4 }
  0xce   :  { %v888_v39 = vpop.f32.mrf.mxu2  ;;  %v901_v31 = vpop.f32.mrf.mxu3 }
  0xcf   :  { %v201_v39 = vld [vmem:[%s6735_s0] sm:$0xff] }
  0xd2   :  { %v912_v36 = vpop.f32.mrf.mxu0  ;;  %v925_v55 = vpop.f32.mrf.mxu1 }
  0xd3   :  { %v926_v2 = vadd.f32 %v925_v55, %v912_v36 }
  0xd5   :  { %v1068_v61 = vrot.slane %v926_v2, 4 }
  0xd6   :  { %v938_v13 = vpop.f32.mrf.mxu2  ;;  %v951_v15 = vpop.f32.mrf.mxu3 }
  0xd7   :  { %v952_v20 = vadd.f32 %v951_v15, %v938_v13 }
  0xd9   :  { %v1069_v60 = vrot.slane %v952_v20, 2 }
  0xda   :  { %v914_v63 = vpop.f32.mrf.mxu0  ;;  %v927_v26 = vpop.f32.mrf.mxu1 }
  0xdb   :  { %v1076_v41 = vsel %vm1075_vm1, %v1068_v61, %v1069_v60 }
  0xdc   :  { %v1078_v4 = vsel %vm1077_vm2, %v1074_v48, %v1076_v41 }
  0xdd   :  { %v1084_v63 = vadd.f32 %v1078_v4, %v201_v39 }
  0xde   :  { %v940_v52 = vpop.f32.mrf.mxu2  ;;  %v953_v47 = vpop.f32.mrf.mxu3 }
  0xdf   :  { %v4274_v36 = vmul.f32 -1.442695, %v1084_v63 }
  0xe1   :  { %4682 = vpow2.f32 %v4274_v36 }
  0xe7   :  { %v4683_v2 = vpop.eup %4682 }
  0xe8   :  { %v1092_v60 = vadd.f32 1.0, %v4683_v2 }
  0xea   :  { %v964_v31 = vpop.f32.mrf.mxu0  ;;  %4684 = vrcp.f32 %v1092_v60  ;;  %vm1099_vm4 = vweird.f32 %v1092_v60 }
  0xec   :  { %v977_v0 = vpop.f32.mrf.mxu1 }
  0xed   :  { %v978_v41 = vadd.f32 %v977_v0, %v964_v31  ;;  %v1105_v0 = vand.u32 2147483648, %v1092_v60 }
  0xf0   :  { %v990_v26 = vpop.f32.mrf.mxu2  ;;  %v4685_v59 = vpop.eup %4684 }
  0xf1   :  { %v1095_v35 = vmul.f32 %v4685_v59, %v1092_v60  ;;  %vm1100_vm3 = vweird.f32 %v4685_v59 }
  0xf2   :  { %v1003_v52 = vpop.f32.mrf.mxu3  ;;  %v966_v47 = vpop.f32.mrf.mxu0  ;;  %vm1101_vm5 = vmor %vm1099_vm4, %vm1100_vm3 }
  0xf3   :  { %v1004_v51 = vadd.f32 %v1003_v52, %v990_v26 }
  0xf4   :  { %v979_v55 = vpop.f32.mrf.mxu1 }
  0xf5   :  { %v1070_v39 = vrot.slane %v1004_v51, 6 }
  0xf7   :  { %v1079_v2 = vsel %vm1073_vm0, %v978_v41, %v1070_v39  ;;  %v1106_v41 = vor.u32 1.1754944e-38, %v1105_v0 }
  0xf8   :  { %v992_v13 = vpop.f32.mrf.mxu2 }
  0xf9   :  { %v1096_v13 = vsub.f32 1.0, %v1095_v35  ;;  %v1103_v35 = vand.u32 2147483647, %v1092_v60 }
  0xfa   :  { %v1005_v15 = vpop.f32.mrf.mxu3 }
  0xfb   :  { %v202_v15 = vld [vmem:[%s6735_s0 + $0x8] sm:$0xff]  ;;  %vm1104_vm6 = vcmp.eq.f32.partialorder %v1103_v35, 8.507059e+37 }
 0x10a   :  { %v1016_v20 = vpop.f32.mrf.mxu0 }
 0x10c   :  { %v1029_v61 = vpop.f32.mrf.mxu1 }
 0x10d   :  { %v1030_v43 = vadd.f32 %v1029_v61, %v1016_v20  ;;  %v1097_v61 = vmul.f32 %v4685_v59, %v1096_v13 }
 0x10f   :  { %v1071_v4 = vrot.slane %v1030_v43, 4 }
 0x110   :  { %v1042_v28 = vpop.f32.mrf.mxu2 }
 0x112   :  { %v1055_v48 = vpop.f32.mrf.mxu3  ;;  %v1018_v55 = vpop.f32.mrf.mxu0 }
 0x113   :  { %v1056_v47 = vadd.f32 %v1055_v48, %v1042_v28  ;;  %v1098_v28 = vadd.f32 %v4685_v59, %v1097_v61 }
 0x114   :  { %v1031_v63 = vpop.f32.mrf.mxu1 }
 0x115   :  { %v1072_v36 = vrot.slane %v1056_v47, 2  ;;  %v1102_v48 = vsel %vm1101_vm5, %v4685_v59, %v1098_v28 }
 0x117   :  { %v1080_v26 = vsel %vm1075_vm1, %v1071_v4, %v1072_v36  ;;  %v1107_v4 = vsel %vm1104_vm6, %v1106_v41, %v1102_v48  ;;  %v200_v36 = vld [vmem:[#allocation3] sm:$0xf] }
 0x118   :  { %v1081_v52 = vsel %vm1077_vm2, %v1079_v2, %v1080_v26  ;;  %v1044_v31 = vpop.f32.mrf.mxu2  ;;  %v1126_v63 = vrot.slane %v1107_v4, 4 }
 0x119   :  { %v1085_v20 = vadd.f32 %v1081_v52, %v202_v15 }
 0x11a   :  { %v1057_v51 = vpop.f32.mrf.mxu3  ;;  %v1128_v2 = vmul.f32 %v1126_v63, %v200_v36  ;;  %v7179_v63 = vld [vmem:[#allocation78_spill] sm:$0xff]  ;;  %v7180_v36 = vld [vmem:[#allocation80_spill] sm:$0xff] }
 0x11b   :  { %v4275_v43 = vmul.f32 -1.442695, %v1085_v20 }
 0x11d   :  { %4686 = vpow2.f32 %v4275_v43 }
 0x11e   :  { %4688 = vtanh.f32 %v1085_v20 }
 0x123   :  { %v4687_v47 = vpop.eup %4686 }
 0x124   :  { %v1093_v39 = vadd.f32 1.0, %v4687_v47  ;;  %v4689_v55 = vpop.eup %4688 }
 0x125   :  { %v1129_v13 = vmul.f32 %v4689_v55, %v1107_v4 }
 0x126   :  { %4690 = vrcp.f32 %v1093_v39  ;;  %v1120_v60 = vand.u32 2147483648, %v1093_v39  ;;  %v1118_v59 = vand.u32 2147483647, %v1093_v39  ;;  %vm1114_vm8 = vweird.f32 %v1093_v39 }
 0x127   :  { %v5459_v52 = vadd.f32 %v1129_v13, %v1128_v2  ;;  %v7181_v13 = vld [vmem:[#allocation81_spill] sm:$0xff]  ;;  %v7183_v2 = vld [vmem:[#allocation83_spill] sm:$0xff] }
 0x128   :  { %v1121_v51 = vor.u32 1.1754944e-38, %v1120_v60  ;;  %vm1119_vm10 = vcmp.eq.f32.partialorder %v1118_v59, 8.507059e+37  ;;  %v7186_v60 = vld [vmem:[#allocation86_spill] sm:$0xff]  ;;  %v7188_v59 = vld [vmem:[#allocation88_spill] sm:$0xff] }
 0x129   :  { %4692 = vtanh.f32 %v5459_v52 }
 0x12c   :  { %v4691_v15 = vpop.eup %4690 }
 0x12d   :  { %v1110_v26 = vmul.f32 %v4691_v15, %v1093_v39  ;;  %vm1115_vm7 = vweird.f32 %v4691_v15  ;;  %v7178_v39 = vld [vmem:[#allocation77_spill] sm:$0xff] }
 0x12e   :  { %vm1116_vm9 = vmor %vm1114_vm8, %vm1115_vm7 }
 0x12f   :  { %v1111_v61 = vsub.f32 1.0, %v1110_v26  ;;  %v4693_v35 = vpop.eup %4692  ;;  %v7184_v26 = vld [vmem:[#allocation84_spill] sm:$0xff] }
 0x131   :  { %v1112_v31 = vmul.f32 %v4691_v15, %v1111_v61  ;;  %v7185_v61 = vld [vmem:[#allocation85_spill] sm:$0xff] }
 0x133   :  { %v1113_v20 = vadd.f32 %v4691_v15, %v1112_v31  ;;  %v7187_v31 = vld [vmem:[#allocation87_spill] sm:$0xff] }
 0x135   :  { %v1117_v43 = vsel %vm1116_vm9, %v4691_v15, %v1113_v20  ;;  %v7182_v15 = vld [vmem:[#allocation82_spill] sm:$0xff]  ;;  %v7189_v20 = vld [vmem:[#allocation89_spill] sm:$0xff] }
 0x136   :  { %v1122_v28 = vsel %vm1119_vm10, %v1121_v51, %v1117_v43  ;;  %v7190_v51 = vld [vmem:[#allocation90_spill] sm:$0xff]  ;;  %v7191_v43 = vld [vmem:[#allocation91_spill] sm:$0xff] }
 0x137   :  { %v1133_v0 = vrot.slane %v1122_v28, 4  ;;  %v7192_v28 = vld [vmem:[#allocation92_spill] sm:$0xff] }
 0x139   :  { %v1135_v48 = vmul.f32 %v4693_v35, %v1133_v0  ;;  %v7193_v0 = vld [vmem:[#allocation93_spill] sm:$0xff]  ;;  %v7194_v35 = vld [vmem:[#allocation94_spill] sm:$0xff] }
 0x13b   :  { %1140 = vst [vmem:[#allocation1] ss:$4 sm:$0xff] %v1135_v48  ;;  %v7195_v48 = vld [vmem:[#allocation95_spill] sm:$0xff] }
 0x142   :  { %v1141_v47 = vld.sshfl [vmem:[#allocation1] sm:$0xff pattern:$0x73625140]  ;;  %v1142_v41 = vld.sshfl [vmem:[#allocation1 + $0x8] sm:$0xff pattern:$0x73625140] }
 0x143   :  { %v5462_v4 = vpack.c.bf16 %v1141_v47, %v1141_v47  ;;  %v5464_v55 = vpack.c.bf16 %v1142_v41, %v1142_v41  ;;  %v7196_v47 = vld [vmem:[#allocation96_spill] sm:$0xff]  ;;  %v7197_v41 = vld [vmem:[#allocation97_spill] sm:$0xff] }
 0x145   :  { %1155 = vmatmul.bf16.vlgmr.msra.gmra.mxu0 %v5462_v4  ;;  %1168 = vmatmul.bf16.vlgmr.msra.gmra.mxu1 %v5464_v55 }
 0x146   :  { %1181 = vmatmul.bf16.vlgmr.msra.gmra.mxu2 %v5462_v4  ;;  %1194 = vmatmul.bf16.vlgmr.msra.gmra.mxu3 %v5464_v55 }
 0x147   :  { %1251 = vmatpush.bf16.msra.mxu0 %v7178_v39  ;;  %1264 = vmatpush.bf16.msra.mxu1 %v7179_v63 }
 0x148   :  { %1277 = vmatpush.bf16.msra.mxu2 %v7180_v36  ;;  %1290 = vmatpush.bf16.msra.mxu3 %v7181_v13 }
 0x14b   :  { %1252 = vmatpush.bf16.msra.mxu0 %v7182_v15  ;;  %1265 = vmatpush.bf16.msra.mxu1 %v7183_v2 }
 0x14c   :  { %1278 = vmatpush.bf16.msra.mxu2 %v7184_v26  ;;  %1291 = vmatpush.bf16.msra.mxu3 %v7185_v61 }
 0x14f   :  { %1253 = vmatpush.bf16.msra.mxu0 %v7186_v60  ;;  %1266 = vmatpush.bf16.msra.mxu1 %v7187_v31 }
 0x150   :  { %1279 = vmatpush.bf16.msra.mxu2 %v7188_v59  ;;  %1292 = vmatpush.bf16.msra.mxu3 %v7189_v20  ;;  %v7202_v20 = vld [vmem:[#allocation102_spill] sm:$0xff]  ;;  %v7203_v59 = vld [vmem:[#allocation103_spill] sm:$0xff] }
 0x153   :  { %1254 = vmatpush.bf16.msra.mxu0 %v7190_v51  ;;  %1267 = vmatpush.bf16.msra.mxu1 %v7191_v43  ;;  %v7198_v43 = vld [vmem:[#allocation98_spill] sm:$0xff]  ;;  %v7201_v51 = vld [vmem:[#allocation101_spill] sm:$0xff] }
 0x154   :  { %1280 = vmatpush.bf16.msra.mxu2 %v7192_v28  ;;  %1293 = vmatpush.bf16.msra.mxu3 %v7193_v0  ;;  %v7199_v28 = vld [vmem:[#allocation99_spill] sm:$0xff]  ;;  %v7200_v0 = vld [vmem:[#allocation100_spill] sm:$0xff] }
 0x155   :  { %1207 = vmatmul.bf16.vlgmr.msrb.gmra.mxu0 %v5462_v4  ;;  %1220 = vmatmul.bf16.vlgmr.msrb.gmra.mxu1 %v5464_v55 }
 0x156   :  { %1233 = vmatmul.bf16.vlgmr.msrb.gmra.mxu2 %v5462_v4  ;;  %1246 = vmatmul.bf16.vlgmr.msrb.gmra.mxu3 %v5464_v55 }
 0x157   :  { %1255 = vmatpush.bf16.msra.mxu0 %v7194_v35  ;;  %1268 = vmatpush.bf16.msra.mxu1 %v7195_v48 }
 0x158   :  { %1281 = vmatpush.bf16.msra.mxu2 %v7196_v47  ;;  %1294 = vmatpush.bf16.msra.mxu3 %v7197_v41 }
 0x15b   :  { %1256 = vmatpush.bf16.msra.mxu0 %v7198_v43  ;;  %1269 = vmatpush.bf16.msra.mxu1 %v7199_v28  ;;  %v7204_v43 = vld [vmem:[#allocation109_spill] sm:$0xff]  ;;  %v7205_v28 = vld [vmem:[#allocation110_spill] sm:$0xff] }
 0x15c   :  { %1282 = vmatpush.bf16.msra.mxu2 %v7200_v0  ;;  %1295 = vmatpush.bf16.msra.mxu3 %v7201_v51  ;;  %v7206_v0 = vld [vmem:[#allocation111_spill] sm:$0xff]  ;;  %v7207_v51 = vld [vmem:[#allocation112_spill] sm:$0xff] }
 0x15f   :  { %1257 = vmatpush.bf16.msra.mxu0 %v7202_v20  ;;  %1270 = vmatpush.bf16.msra.mxu1 %v7203_v59  ;;  %v7208_v20 = vld [vmem:[#allocation113_spill] sm:$0xff]  ;;  %v7219_v59 = vld [vmem:[#allocation124_spill] sm:$0xff] }
 0x160   :  { %1283 = vmatpush.bf16.msra.mxu2 %v5256_v37  ;;  %1296 = vmatpush.bf16.msra.mxu3 %v5258_v10  ;;  %v7217_v10 = vld [vmem:[#allocation122_spill] sm:$0xff]  ;;  %v7218_v37 = vld [vmem:[#allocation123_spill] sm:$0xff] }
 0x163   :  { %1258 = vmatpush.bf16.msra.mxu0 %v5262_v53  ;;  %1271 = vmatpush.bf16.msra.mxu1 %v5264_v11  ;;  %v7209_v11 = vld [vmem:[#allocation114_spill] sm:$0xff]  ;;  %v7216_v53 = vld [vmem:[#allocation121_spill] sm:$0xff] }
 0x164   :  { %1284 = vmatpush.bf16.msra.mxu2 %v5268_v42  ;;  %1297 = vmatpush.bf16.msra.mxu3 %v7204_v43  ;;  %v7210_v42 = vld [vmem:[#allocation115_spill] sm:$0xff]  ;;  %v7211_v43 = vld [vmem:[#allocation116_spill] sm:$0xff] }
 0x166   :  { %1259 = vmatmul.bf16.vlgmr.msra.gmra.mxu0 %v5462_v4  ;;  %1272 = vmatmul.bf16.vlgmr.msra.gmra.mxu1 %v5464_v55 }
 0x167   :  { %1303 = vmatpush.bf16.msrb.mxu0 %v7205_v28  ;;  %1316 = vmatpush.bf16.msrb.mxu1 %v7206_v0  ;;  %v7212_v28 = vld [vmem:[#allocation117_spill] sm:$0xff]  ;;  %v7213_v0 = vld [vmem:[#allocation118_spill] sm:$0xff] }
 0x168   :  { %1329 = vmatpush.bf16.msrb.mxu2 %v7207_v51  ;;  %1342 = vmatpush.bf16.msrb.mxu3 %v7208_v20  ;;  %v7214_v51 = vld [vmem:[#allocation119_spill] sm:$0xff]  ;;  %v7215_v20 = vld [vmem:[#allocation120_spill] sm:$0xff] }
 0x169   :  { %1285 = vmatmul.bf16.vlgmr.msra.gmra.mxu2 %v5462_v4  ;;  %1298 = vmatmul.bf16.vlgmr.msra.gmra.mxu3 %v5464_v55 }
 0x16b   :  { %1304 = vmatpush.bf16.msrb.mxu0 %v7209_v11  ;;  %1317 = vmatpush.bf16.msrb.mxu1 %v7210_v42  ;;  %v7220_v11 = vld [vmem:[#allocation125_spill] sm:$0xff]  ;;  %v7221_v42 = vld [vmem:[#allocation126_spill] sm:$0xff] }
 0x16c   :  { %1330 = vmatpush.bf16.msrb.mxu2 %v7211_v43  ;;  %1343 = vmatpush.bf16.msrb.mxu3 %v7212_v28  ;;  %v7222_v43 = vld [vmem:[#allocation127_spill] sm:$0xff]  ;;  %v7223_v28 = vld [vmem:[#allocation128_spill] sm:$0xff] }
 0x16f   :  { %1305 = vmatpush.bf16.msrb.mxu0 %v7213_v0  ;;  %1318 = vmatpush.bf16.msrb.mxu1 %v7214_v51  ;;  %v7224_v0 = vld [vmem:[#allocation129_spill] sm:$0xff]  ;;  %v7225_v51 = vld [vmem:[#allocation130_spill] sm:$0xff] }
 0x170   :  { %1331 = vmatpush.bf16.msrb.mxu2 %v7215_v20  ;;  %1344 = vmatpush.bf16.msrb.mxu3 %v7216_v53  ;;  %v7226_v20 = vld [vmem:[#allocation131_spill] sm:$0xff] }
 0x173   :  { %1306 = vmatpush.bf16.msrb.mxu0 %v7217_v10  ;;  %1319 = vmatpush.bf16.msrb.mxu1 %v7218_v37 }
 0x174   :  { %1332 = vmatpush.bf16.msrb.mxu2 %v7219_v59  ;;  %1345 = vmatpush.bf16.msrb.mxu3 %v7220_v11 }
 0x177   :  { %1307 = vmatpush.bf16.msrb.mxu0 %v7221_v42  ;;  %1320 = vmatpush.bf16.msrb.mxu1 %v7222_v43 }
 0x178   :  { %1333 = vmatpush.bf16.msrb.mxu2 %v7223_v28  ;;  %1346 = vmatpush.bf16.msrb.mxu3 %v7224_v0 }
 0x17b   :  { %1308 = vmatpush.bf16.msrb.mxu0 %v7225_v51  ;;  %1321 = vmatpush.bf16.msrb.mxu1 %v7226_v20 }
 0x17c   :  { %1334 = vmatpush.bf16.msrb.mxu2 %v5344_v1  ;;  %1347 = vmatpush.bf16.msrb.mxu3 %v5346_v30 }
 0x17f   :  { %1309 = vmatpush.bf16.msrb.mxu0 %v5350_v22  ;;  %1322 = vmatpush.bf16.msrb.mxu1 %v5352_v54 }
 0x180   :  { %1335 = vmatpush.bf16.msrb.mxu2 %v5356_v24  ;;  %1348 = vmatpush.bf16.msrb.mxu3 %v5358_v49 }
 0x183   :  { %1310 = vmatpush.bf16.msrb.mxu0 %v5362_v19  ;;  %1323 = vmatpush.bf16.msrb.mxu1 %v5364_v18 }
 0x184   :  { %1336 = vmatpush.bf16.msrb.mxu2 %v5368_v32  ;;  %1349 = vmatpush.bf16.msrb.mxu3 %v5370_v40 }
 0x186   :  { %1311 = vmatmul.bf16.vlgmr.msrb.gmra.mxu0 %v5462_v4  ;;  %1324 = vmatmul.bf16.vlgmr.msrb.gmra.mxu1 %v5464_v55 }
 0x187   :  { %1440 = vmatpush.bf16.msra.mxu0 %v4973_v3  ;;  %1453 = vmatpush.bf16.msra.mxu1 %v4975_v7 }
 0x188   :  { %1337 = vmatmul.bf16.vlgmr.msrb.gmra.mxu2 %v5462_v4  ;;  %1350 = vmatmul.bf16.vlgmr.msrb.gmra.mxu3 %v5464_v55  ;;  %v7227_v4 = vld [vmem:[#allocation40_spill] sm:$0xff]  ;;  %v7228_v55 = vld [vmem:[#allocation41_spill] sm:$0xff] }
 0x189   :  { %1466 = vmatpush.bf16.msra.mxu2 %v4977_v8  ;;  %1479 = vmatpush.bf16.msra.mxu3 %v4980_v12 }
 0x18b   :  { %1441 = vmatpush.bf16.msra.mxu0 %v4984_v16  ;;  %1454 = vmatpush.bf16.msra.mxu1 %v4986_v17 }
 0x18d   :  { %1467 = vmatpush.bf16.msra.mxu2 %v4989_v21  ;;  %1480 = vmatpush.bf16.msra.mxu3 %v4991_v25 }
 0x18f   :  { %1442 = vmatpush.bf16.msra.mxu0 %v4994_v29  ;;  %1455 = vmatpush.bf16.msra.mxu1 %v4998_v33 }
 0x191   :  { %1468 = vmatpush.bf16.msra.mxu2 %v5000_v34  ;;  %1481 = vmatpush.bf16.msra.mxu3 %v5003_v38 }
 0x193   :  { %1443 = vmatpush.bf16.msra.mxu0 %v5006_v44  ;;  %1456 = vmatpush.bf16.msra.mxu1 %v5010_v45 }
 0x195   :  { %1469 = vmatpush.bf16.msra.mxu2 %v5012_v46  ;;  %1482 = vmatpush.bf16.msra.mxu3 %v5015_v50 }
 0x197   :  { %1444 = vmatpush.bf16.msra.mxu0 %v5018_v56  ;;  %1457 = vmatpush.bf16.msra.mxu1 %v5022_v57  ;;  %v7229_v57 = vld [vmem:[#allocation42_spill] sm:$0xff] }
 0x199   :  { %1470 = vmatpush.bf16.msra.mxu2 %v5024_v58  ;;  %1483 = vmatpush.bf16.msra.mxu3 %v5027_v62  ;;  %v7230_v58 = vld [vmem:[#allocation43_spill] sm:$0xff]  ;;  %v7231_v62 = vld [vmem:[#allocation46_spill] sm:$0xff] }
 0x19b   :  { %1445 = vmatpush.bf16.msra.mxu0 %v5030_v5  ;;  %1458 = vmatpush.bf16.msra.mxu1 %v5034_v6  ;;  %v7232_v5 = vld [vmem:[#allocation47_spill] sm:$0xff]  ;;  %v7233_v6 = vld [vmem:[#allocation44_spill] sm:$0xff] }
 0x19d   :  { %1471 = vmatpush.bf16.msra.mxu2 %v5036_v9  ;;  %1484 = vmatpush.bf16.msra.mxu3 %v5039_v14  ;;  %v7234_v9 = vld [vmem:[#allocation45_spill] sm:$0xff]  ;;  %v7235_v14 = vld [vmem:[#allocation48_spill] sm:$0xff] }
 0x19f   :  { %1446 = vmatpush.bf16.msra.mxu0 %v5042_v23  ;;  %1459 = vmatpush.bf16.msra.mxu1 %v5046_v27  ;;  %v7236_v23 = vld [vmem:[#allocation49_spill] sm:$0xff]  ;;  %v7237_v27 = vld [vmem:[#allocation50_spill] sm:$0xff] }
 0x1a1   :  { %1472 = vmatpush.bf16.msra.mxu2 %v7227_v4  ;;  %1485 = vmatpush.bf16.msra.mxu3 %v7228_v55  ;;  %v7238_v4 = vld [vmem:[#allocation51_spill] sm:$0xff]  ;;  %v7239_v55 = vld [vmem:[#allocation52_spill] sm:$0xff] }
 0x1a3   :  { %1447 = vmatpush.bf16.msra.mxu0 %v7229_v57  ;;  %1460 = vmatpush.bf16.msra.mxu1 %v7230_v58  ;;  %v7240_v57 = vld [vmem:[#allocation53_spill] sm:$0xff]  ;;  %v7241_v58 = vld [vmem:[#allocation54_spill] sm:$0xff] }
 0x1a5   :  { %1473 = vmatpush.bf16.msra.mxu2 %v7233_v6  ;;  %1486 = vmatpush.bf16.msra.mxu3 %v7234_v9  ;;  %v7244_v6 = vld [vmem:[#allocation57_spill] sm:$0xff]  ;;  %v7245_v9 = vld [vmem:[#allocation58_spill] sm:$0xff] }
 0x1a7   :  { %1492 = vmatpush.bf16.msrb.mxu0 %v7231_v62  ;;  %1505 = vmatpush.bf16.msrb.mxu1 %v7232_v5  ;;  %v7242_v62 = vld [vmem:[#allocation55_spill] sm:$0xff]  ;;  %v7243_v5 = vld [vmem:[#allocation56_spill] sm:$0xff] }
 0x1a9   :  { %1518 = vmatpush.bf16.msrb.mxu2 %v7235_v14  ;;  %1531 = vmatpush.bf16.msrb.mxu3 %v7236_v23  ;;  %v7246_v14 = vld [vmem:[#allocation59_spill] sm:$0xff]  ;;  %v7247_v23 = vld [vmem:[#allocation60_spill] sm:$0xff] }
 0x1ab   :  { %1493 = vmatpush.bf16.msrb.mxu0 %v7237_v27  ;;  %1506 = vmatpush.bf16.msrb.mxu1 %v7238_v4  ;;  %v7248_v27 = vld [vmem:[#allocation61_spill] sm:$0xff]  ;;  %v7249_v4 = vld [vmem:[#allocation62_spill] sm:$0xff] }
 0x1ad   :  { %1519 = vmatpush.bf16.msrb.mxu2 %v7239_v55  ;;  %1532 = vmatpush.bf16.msrb.mxu3 %v7240_v57  ;;  %v7250_v55 = vld [vmem:[#allocation63_spill] sm:$0xff]  ;;  %v7251_v57 = vld [vmem:[#allocation64_spill] sm:$0xff] }
 0x1af   :  { %1494 = vmatpush.bf16.msrb.mxu0 %v7241_v58  ;;  %1507 = vmatpush.bf16.msrb.mxu1 %v7242_v62  ;;  %v7252_v58 = vld [vmem:[#allocation65_spill] sm:$0xff]  ;;  %v7253_v62 = vld [vmem:[#allocation66_spill] sm:$0xff] }
 0x1b1   :  { %1520 = vmatpush.bf16.msrb.mxu2 %v7243_v5  ;;  %1533 = vmatpush.bf16.msrb.mxu3 %v7244_v6  ;;  %v7254_v5 = vld [vmem:[#allocation67_spill] sm:$0xff]  ;;  %v7255_v6 = vld [vmem:[#allocation68_spill] sm:$0xff] }
 0x1b3   :  { %1495 = vmatpush.bf16.msrb.mxu0 %v7245_v9  ;;  %1508 = vmatpush.bf16.msrb.mxu1 %v7246_v14  ;;  %v7256_v9 = vld [vmem:[#allocation69_spill] sm:$0xff]  ;;  %v7257_v14 = vld [vmem:[#allocation70_spill] sm:$0xff] }
 0x1b5   :  { %1521 = vmatpush.bf16.msrb.mxu2 %v7247_v23  ;;  %1534 = vmatpush.bf16.msrb.mxu3 %v7248_v27  ;;  %v7258_v23 = vld [vmem:[#allocation71_spill] sm:$0xff]  ;;  %v7259_v27 = vld [vmem:[#allocation72_spill] sm:$0xff] }
 0x1b7   :  { %1496 = vmatpush.bf16.msrb.mxu0 %v7249_v4  ;;  %1509 = vmatpush.bf16.msrb.mxu1 %v7250_v55  ;;  %v7260_v4 = vld [vmem:[#allocation73_spill] sm:$0xff]  ;;  %v7261_v55 = vld [vmem:[#allocation74_spill] sm:$0xff] }
 0x1b9   :  { %1522 = vmatpush.bf16.msrb.mxu2 %v7251_v57  ;;  %1535 = vmatpush.bf16.msrb.mxu3 %v7252_v58  ;;  %v7262_v57 = vld [vmem:[#allocation75_spill] sm:$0xff]  ;;  %v7263_v58 = vld [vmem:[#allocation76_spill] sm:$0xff] }
 0x1bb   :  { %1497 = vmatpush.bf16.msrb.mxu0 %v7253_v62  ;;  %1510 = vmatpush.bf16.msrb.mxu1 %v7254_v5  ;;  %v7264_v62 = vld [vmem:[#allocation79_spill] sm:$0xff] }
 0x1bd   :  { %1523 = vmatpush.bf16.msrb.mxu2 %v7255_v6  ;;  %1536 = vmatpush.bf16.msrb.mxu3 %v7256_v9 }
 0x1bf   :  { %1498 = vmatpush.bf16.msrb.mxu0 %v7257_v14  ;;  %1511 = vmatpush.bf16.msrb.mxu1 %v7258_v23 }
 0x1c1   :  { %1524 = vmatpush.bf16.msrb.mxu2 %v7259_v27  ;;  %1537 = vmatpush.bf16.msrb.mxu3 %v7260_v4 }
 0x1c2   :  { %v1156_v5 = vpop.f32.mrf.mxu0  ;;  %v1169_v6 = vpop.f32.mrf.mxu1 }
 0x1c3   :  { %1499 = vmatpush.bf16.msrb.mxu0 %v7261_v55  ;;  %1512 = vmatpush.bf16.msrb.mxu1 %v7262_v57  ;;  %v1170_v17 = vadd.f32 %v1169_v6, %v1156_v5 }
 0x1c5   :  { %1525 = vmatpush.bf16.msrb.mxu2 %v7263_v58  ;;  %1538 = vmatpush.bf16.msrb.mxu3 %v7264_v62 }
 0x1c9   :  { %v1182_v56 = vpop.f32.mrf.mxu2  ;;  %v1195_v9 = vpop.f32.mrf.mxu3 }
 0x1ca   :  { %v1158_v50 = vpop.f32.mrf.mxu0  ;;  %v1171_v14 = vpop.f32.mrf.mxu1  ;;  %v1196_v57 = vadd.f32 %v1195_v9, %v1182_v56 }
 0x1cc   :  { %v1363_v25 = vrot.slane %v1196_v57, 6 }
 0x1d1   :  { %v1184_v46 = vpop.f32.mrf.mxu2  ;;  %v1197_v23 = vpop.f32.mrf.mxu3 }
 0x1d2   :  { %v1208_v45 = vpop.f32.mrf.mxu0  ;;  %v1221_v27 = vpop.f32.mrf.mxu1  ;;  %v1369_v23 = vsel %vm1073_vm0, %v1170_v17, %v1363_v25 }
 0x1d3   :  { %v1222_v33 = vadd.f32 %v1221_v27, %v1208_v45 }
 0x1d5   :  { %v1364_v21 = vrot.slane %v1222_v33, 4 }
 0x1d9   :  { %v1234_v44 = vpop.f32.mrf.mxu2  ;;  %v1247_v4 = vpop.f32.mrf.mxu3 }
 0x1da   :  { %v1210_v38 = vpop.f32.mrf.mxu0  ;;  %v1223_v55 = vpop.f32.mrf.mxu1  ;;  %v1248_v34 = vadd.f32 %v1247_v4, %v1234_v44 }
 0x1db   :  { %v4276_v38 = vld [vmem:[%s6735_s0 + $0x10] sm:$0xff] }
 0x1dc   :  { %v1365_v58 = vrot.slane %v1248_v34, 2 }
 0x1de   :  { %v1370_v50 = vsel %vm1075_vm1, %v1364_v21, %v1365_v58 }
 0x1df   :  { %v1371_v44 = vsel %vm1077_vm2, %v1369_v23, %v1370_v50 }
 0x1e0   :  { %v1377_v56 = vadd.f32 %v4276_v38, %v1371_v44 }
 0x1e1   :  { %v1236_v29 = vpop.f32.mrf.mxu2  ;;  %v1249_v62 = vpop.f32.mrf.mxu3 }
 0x1e2   :  { %v4278_v57 = vmul.f32 -1.442695, %v1377_v56 }
 0x1e3   :  { %v1260_v14 = vpop.f32.mrf.mxu0  ;;  %v1273_v46 = vpop.f32.mrf.mxu1 }
 0x1e4   :  { %4694 = vpow2.f32 %v4278_v57 }
 0x1ea   :  { %v4695_v21 = vpop.eup %4694 }
 0x1eb   :  { %v1262_v29 = vpop.f32.mrf.mxu0  ;;  %v1275_v62 = vpop.f32.mrf.mxu1  ;;  %v1385_v58 = vadd.f32 1.0, %v4695_v21 }
 0x1ec   :  { %v1286_v45 = vpop.f32.mrf.mxu2  ;;  %v1299_v34 = vpop.f32.mrf.mxu3  ;;  %v1274_v62 = vadd.f32 %v1273_v46, %v1260_v14 }
 0x1ed   :  { %4696 = vrcp.f32 %v1385_v58  ;;  %v1300_v9 = vadd.f32 %v1299_v34, %v1286_v45  ;;  %v1398_v46 = vand.u32 2147483648, %v1385_v58  ;;  %vm1392_vm12 = vweird.f32 %v1385_v58 }
 0x1ef   :  { %v1366_v23 = vrot.slane %v1300_v9, 6 }
 0x1f1   :  { %v1372_v21 = vsel %vm1073_vm0, %v1274_v62, %v1366_v23  ;;  %v1399_v23 = vor.u32 1.1754944e-38, %v1398_v46 }
 0x1f3   :  { %v4697_v25 = vpop.eup %4696 }
 0x1f4   :  { %v1288_v33 = vpop.f32.mrf.mxu2  ;;  %v1301_v5 = vpop.f32.mrf.mxu3  ;;  %v1388_v4 = vmul.f32 %v4697_v25, %v1385_v58  ;;  %vm1393_vm11 = vweird.f32 %v4697_v25 }
 0x1f5   :  { %v4277_v5 = vld [vmem:[%s6735_s0 + $0x18] sm:$0xff]  ;;  %vm1394_vm13 = vmor %vm1392_vm12, %vm1393_vm11 }
 0x1f6   :  { %v1389_v33 = vsub.f32 1.0, %v1388_v4 }
 0x203   :  { %v1312_v6 = vpop.f32.mrf.mxu0  ;;  %v1325_v17 = vpop.f32.mrf.mxu1 }
 0x204   :  { %v1326_v27 = vadd.f32 %v1325_v17, %v1312_v6  ;;  %v1390_v17 = vmul.f32 %v4697_v25, %v1389_v33 }
 0x206   :  { %v1367_v56 = vrot.slane %v1326_v27, 4  ;;  %v1391_v14 = vadd.f32 %v4697_v25, %v1390_v17  ;;  %v1396_v27 = vand.u32 2147483647, %v1385_v58 }
 0x208   :  { %v1395_v4 = vsel %vm1394_vm13, %v4697_v25, %v1391_v14  ;;  %vm1397_vm14 = vcmp.eq.f32.partialorder %v1396_v27, 8.507059e+37 }
 0x20b   :  { %v1338_v55 = vpop.f32.mrf.mxu2  ;;  %v1351_v50 = vpop.f32.mrf.mxu3 }
 0x20c   :  { %v1352_v38 = vadd.f32 %v1351_v50, %v1338_v55  ;;  %v1314_v44 = vpop.f32.mrf.mxu0  ;;  %v1327_v29 = vpop.f32.mrf.mxu1 }
 0x20d   :  { %v1400_v29 = vsel %vm1397_vm14, %v1399_v23, %v1395_v4 }
 0x20e   :  { %v1368_v57 = vrot.slane %v1352_v38, 2 }
 0x210   :  { %v1373_v45 = vsel %vm1075_vm1, %v1367_v56, %v1368_v57  ;;  %v1419_v56 = vrot.slane %v1400_v29, 4 }
 0x211   :  { %v1374_v34 = vsel %vm1077_vm2, %v1372_v21, %v1373_v45 }
 0x212   :  { %v1378_v6 = vadd.f32 %v4277_v5, %v1374_v34  ;;  %v1421_v5 = vmul.f32 %v1419_v56, %v5459_v52  ;;  %v7268_v56 = vld [vmem:[#allocation91_spill] sm:$0xff] }
 0x213   :  { %v1340_v9 = vpop.f32.mrf.mxu2  ;;  %v1353_v55 = vpop.f32.mrf.mxu3 }
 0x214   :  { %v4279_v50 = vmul.f32 -1.442695, %v1378_v6 }
 0x216   :  { %4698 = vpow2.f32 %v4279_v50 }
 0x217   :  { %4700 = vtanh.f32 %v1378_v6 }
 0x21c   :  { %v4699_v38 = vpop.eup %4698 }
 0x21d   :  { %v1386_v44 = vadd.f32 1.0, %v4699_v38  ;;  %v4701_v62 = vpop.eup %4700 }
 0x21e   :  { %v1422_v57 = vmul.f32 %v4701_v62, %v1400_v29  ;;  %v7266_v29 = vld [vmem:[#allocation89_spill] sm:$0xff]  ;;  %v7267_v62 = vld [vmem:[#allocation90_spill] sm:$0xff] }
 0x21f   :  { %4702 = vrcp.f32 %v1386_v44  ;;  %v1413_v58 = vand.u32 2147483648, %v1386_v44  ;;  %v1411_v25 = vand.u32 2147483647, %v1386_v44  ;;  %vm1407_vm3 = vweird.f32 %v1386_v44 }
 0x220   :  { %v5623_v45 = vadd.f32 %v1422_v57, %v1421_v5  ;;  %v7269_v57 = vld [vmem:[#allocation92_spill] sm:$0xff]  ;;  %v7271_v5 = vld [vmem:[#allocation98_spill] sm:$0xff] }
 0x221   :  { %v1414_v9 = vor.u32 1.1754944e-38, %v1413_v58  ;;  %vm1412_vm5 = vcmp.eq.f32.partialorder %v1411_v25, 8.507059e+37  ;;  %v7274_v58 = vld [vmem:[#allocation101_spill] sm:$0xff]  ;;  %v7276_v25 = vld [vmem:[#allocation103_spill] sm:$0xff] }
 0x222   :  { %4704 = vtanh.f32 %v5623_v45 }
 0x225   :  { %v4703_v33 = vpop.eup %4702 }
 0x226   :  { %v1403_v21 = vmul.f32 %v4703_v33, %v1386_v44  ;;  %vm1408_vm15 = vweird.f32 %v4703_v33  ;;  %v7265_v44 = vld [vmem:[#allocation88_spill] sm:$0xff] }
 0x227   :  { %vm1409_vm4 = vmor %vm1407_vm3, %vm1408_vm15 }
 0x228   :  { %v1404_v34 = vsub.f32 1.0, %v1403_v21  ;;  %v4705_v46 = vpop.eup %4704  ;;  %v7272_v21 = vld [vmem:[#allocation99_spill] sm:$0xff] }
 0x22a   :  { %v1405_v17 = vmul.f32 %v4703_v33, %v1404_v34  ;;  %v7273_v34 = vld [vmem:[#allocation100_spill] sm:$0xff] }
 0x22c   :  { %v1406_v6 = vadd.f32 %v4703_v33, %v1405_v17  ;;  %v7275_v17 = vld [vmem:[#allocation102_spill] sm:$0xff] }
 0x22e   :  { %v1410_v55 = vsel %vm1409_vm4, %v4703_v33, %v1406_v6  ;;  %v7270_v33 = vld [vmem:[#allocation93_spill] sm:$0xff]  ;;  %v7277_v6 = vld [vmem:[#allocation104_spill] sm:$0xff] }
 0x22f   :  { %v1415_v50 = vsel %vm1412_vm5, %v1414_v9, %v1410_v55  ;;  %v7278_v9 = vld [vmem:[#allocation105_spill] sm:$0xff]  ;;  %v7279_v55 = vld [vmem:[#allocation106_spill] sm:$0xff] }
 0x230   :  { %v1426_v14 = vrot.slane %v1415_v50, 4  ;;  %v7280_v50 = vld [vmem:[#allocation107_spill] sm:$0xff] }
 0x232   :  { %v1428_v52 = vmul.f32 %v4705_v46, %v1426_v14  ;;  %v7281_v14 = vld [vmem:[#allocation108_spill] sm:$0xff]  ;;  %v7282_v46 = vld [vmem:[#allocation109_spill] sm:$0xff] }
 0x234   :  { %1433 = vst [vmem:[#allocation1] ss:$4 sm:$0xff] %v1428_v52  ;;  %v7283_v52 = vld [vmem:[#allocation110_spill] sm:$0xff] }
 0x23b   :  { %v1434_v27 = vld.sshfl [vmem:[#allocation1] sm:$0xff pattern:$0x73625140]  ;;  %v1435_v4 = vld.sshfl [vmem:[#allocation1 + $0x8] sm:$0xff pattern:$0x73625140] }
 0x23c   :  { %v5626_v38 = vpack.c.bf16 %v1434_v27, %v1434_v27  ;;  %v5628_v23 = vpack.c.bf16 %v1435_v4, %v1435_v4  ;;  %v7284_v27 = vld [vmem:[#allocation111_spill] sm:$0xff]  ;;  %v7285_v4 = vld [vmem:[#allocation112_spill] sm:$0xff] }
 0x23e   :  { %1448 = vmatmul.bf16.vlgmr.msra.gmra.mxu0 %v5626_v38  ;;  %1461 = vmatmul.bf16.vlgmr.msra.gmra.mxu1 %v5628_v23 }
 0x23f   :  { %1474 = vmatmul.bf16.vlgmr.msra.gmra.mxu2 %v5626_v38  ;;  %1487 = vmatmul.bf16.vlgmr.msra.gmra.mxu3 %v5628_v23 }
 0x240   :  { %1544 = vmatpush.bf16.msra.mxu0 %v7178_v39  ;;  %1557 = vmatpush.bf16.msra.mxu1 %v7179_v63 }
 0x241   :  { %1570 = vmatpush.bf16.msra.mxu2 %v7180_v36  ;;  %1583 = vmatpush.bf16.msra.mxu3 %v7181_v13 }
 0x244   :  { %1545 = vmatpush.bf16.msra.mxu0 %v7182_v15  ;;  %1558 = vmatpush.bf16.msra.mxu1 %v7183_v2 }
 0x245   :  { %1571 = vmatpush.bf16.msra.mxu2 %v7184_v26  ;;  %1584 = vmatpush.bf16.msra.mxu3 %v7185_v61 }
 0x248   :  { %1546 = vmatpush.bf16.msra.mxu0 %v7186_v60  ;;  %1559 = vmatpush.bf16.msra.mxu1 %v7187_v31 }
 0x249   :  { %1572 = vmatpush.bf16.msra.mxu2 %v7265_v44  ;;  %1585 = vmatpush.bf16.msra.mxu3 %v7266_v29 }
 0x24c   :  { %1547 = vmatpush.bf16.msra.mxu0 %v7267_v62  ;;  %1560 = vmatpush.bf16.msra.mxu1 %v7268_v56 }
 0x24d   :  { %1573 = vmatpush.bf16.msra.mxu2 %v7269_v57  ;;  %1586 = vmatpush.bf16.msra.mxu3 %v7270_v33 }
 0x24e   :  { %1500 = vmatmul.bf16.vlgmr.msrb.gmra.mxu0 %v5626_v38  ;;  %1513 = vmatmul.bf16.vlgmr.msrb.gmra.mxu1 %v5628_v23 }
 0x24f   :  { %1526 = vmatmul.bf16.vlgmr.msrb.gmra.mxu2 %v5626_v38  ;;  %1539 = vmatmul.bf16.vlgmr.msrb.gmra.mxu3 %v5628_v23 }
 0x250   :  { %1548 = vmatpush.bf16.msra.mxu0 %v7194_v35  ;;  %1561 = vmatpush.bf16.msra.mxu1 %v7195_v48 }
 0x251   :  { %1574 = vmatpush.bf16.msra.mxu2 %v7196_v47  ;;  %1587 = vmatpush.bf16.msra.mxu3 %v7197_v41 }
 0x254   :  { %1549 = vmatpush.bf16.msra.mxu0 %v7271_v5  ;;  %1562 = vmatpush.bf16.msra.mxu1 %v7272_v21 }
 0x255   :  { %1575 = vmatpush.bf16.msra.mxu2 %v7273_v34  ;;  %1588 = vmatpush.bf16.msra.mxu3 %v7274_v58 }
 0x258   :  { %1550 = vmatpush.bf16.msra.mxu0 %v7275_v17  ;;  %1563 = vmatpush.bf16.msra.mxu1 %v7276_v25  ;;  %v7286_v17 = vld [vmem:[#allocation113_spill] sm:$0xff] }
 0x259   :  { %1576 = vmatpush.bf16.msra.mxu2 %v7277_v6  ;;  %1589 = vmatpush.bf16.msra.mxu3 %v7278_v9 }
 0x25c   :  { %1551 = vmatpush.bf16.msra.mxu0 %v7279_v55  ;;  %1564 = vmatpush.bf16.msra.mxu1 %v7280_v50  ;;  %v7287_v50 = vld [vmem:[#allocation114_spill] sm:$0xff] }
 0x25d   :  { %1577 = vmatpush.bf16.msra.mxu2 %v7281_v14  ;;  %1590 = vmatpush.bf16.msra.mxu3 %v7282_v46  ;;  %v7288_v14 = vld [vmem:[#allocation115_spill] sm:$0xff]  ;;  %v7289_v46 = vld [vmem:[#allocation116_spill] sm:$0xff] }
 0x25f   :  { %1552 = vmatmul.bf16.vlgmr.msra.gmra.mxu0 %v5626_v38  ;;  %1565 = vmatmul.bf16.vlgmr.msra.gmra.mxu1 %v5628_v23 }
 0x260   :  { %1596 = vmatpush.bf16.msrb.mxu0 %v7283_v52  ;;  %1609 = vmatpush.bf16.msrb.mxu1 %v7284_v27  ;;  %v7290_v52 = vld [vmem:[#allocation117_spill] sm:$0xff]  ;;  %v7291_v27 = vld [vmem:[#allocation118_spill] sm:$0xff] }
 0x261   :  { %1622 = vmatpush.bf16.msrb.mxu2 %v7285_v4  ;;  %1635 = vmatpush.bf16.msrb.mxu3 %v7286_v17  ;;  %v7292_v4 = vld [vmem:[#allocation119_spill] sm:$0xff]  ;;  %v7293_v17 = vld [vmem:[#allocation120_spill] sm:$0xff] }
 0x262   :  { %1578 = vmatmul.bf16.vlgmr.msra.gmra.mxu2 %v5626_v38  ;;  %1591 = vmatmul.bf16.vlgmr.msra.gmra.mxu3 %v5628_v23 }
 0x264   :  { %1597 = vmatpush.bf16.msrb.mxu0 %v7287_v50  ;;  %1610 = vmatpush.bf16.msrb.mxu1 %v7288_v14 }
 0x265   :  { %1623 = vmatpush.bf16.msrb.mxu2 %v7289_v46  ;;  %1636 = vmatpush.bf16.msrb.mxu3 %v7290_v52 }
 0x268   :  { %1598 = vmatpush.bf16.msrb.mxu0 %v7291_v27  ;;  %1611 = vmatpush.bf16.msrb.mxu1 %v7292_v4 }
 0x269   :  { %1624 = vmatpush.bf16.msrb.mxu2 %v7293_v17  ;;  %1637 = vmatpush.bf16.msrb.mxu3 %v7216_v53 }
 0x26c   :  { %1599 = vmatpush.bf16.msrb.mxu0 %v7217_v10  ;;  %1612 = vmatpush.bf16.msrb.mxu1 %v7218_v37 }
 0x26d   :  { %1625 = vmatpush.bf16.msrb.mxu2 %v7219_v59  ;;  %1638 = vmatpush.bf16.msrb.mxu3 %v7220_v11 }
 0x270   :  { %1600 = vmatpush.bf16.msrb.mxu0 %v7221_v42  ;;  %1613 = vmatpush.bf16.msrb.mxu1 %v7222_v43 }
 0x271   :  { %1626 = vmatpush.bf16.msrb.mxu2 %v7223_v28  ;;  %1639 = vmatpush.bf16.msrb.mxu3 %v7224_v0 }
 0x274   :  { %1601 = vmatpush.bf16.msrb.mxu0 %v7225_v51  ;;  %1614 = vmatpush.bf16.msrb.mxu1 %v7226_v20 }
 0x275   :  { %1627 = vmatpush.bf16.msrb.mxu2 %v5344_v1  ;;  %1640 = vmatpush.bf16.msrb.mxu3 %v5346_v30 }
 0x278   :  { %1602 = vmatpush.bf16.msrb.mxu0 %v5350_v22  ;;  %1615 = vmatpush.bf16.msrb.mxu1 %v5352_v54 }
 0x279   :  { %1628 = vmatpush.bf16.msrb.mxu2 %v5356_v24  ;;  %1641 = vmatpush.bf16.msrb.mxu3 %v5358_v49 }
 0x27c   :  { %1603 = vmatpush.bf16.msrb.mxu0 %v5362_v19  ;;  %1616 = vmatpush.bf16.msrb.mxu1 %v5364_v18  ;;  %v7298_v18 = vld [vmem:[#allocation23_spill] sm:$0xff]  ;;  %v7299_v19 = vld [vmem:[#allocation24_spill] sm:$0xff] }
 0x27d   :  { %1629 = vmatpush.bf16.msrb.mxu2 %v5368_v32  ;;  %1642 = vmatpush.bf16.msrb.mxu3 %v5370_v40  ;;  %v7294_v32 = vld [vmem:[#allocation19_spill] sm:$0xff]  ;;  %v7295_v40 = vld [vmem:[#allocation20_spill] sm:$0xff] }
 0x27f   :  { %1604 = vmatmul.bf16.vlgmr.msrb.gmra.mxu0 %v5626_v38  ;;  %1617 = vmatmul.bf16.vlgmr.msrb.gmra.mxu1 %v5628_v23 }
 0x280   :  { %1733 = vmatpush.bf16.msra.mxu0 %v4973_v3  ;;  %1746 = vmatpush.bf16.msra.mxu1 %v4975_v7  ;;  %v7296_v3 = vld [vmem:[#allocation21_spill] sm:$0xff]  ;;  %v7297_v7 = vld [vmem:[#allocation22_spill] sm:$0xff] }
 0x281   :  { %1630 = vmatmul.bf16.vlgmr.msrb.gmra.mxu2 %v5626_v38  ;;  %1643 = vmatmul.bf16.vlgmr.msrb.gmra.mxu3 %v5628_v23  ;;  %v7300_v38 = vld [vmem:[#allocation25_spill] sm:$0xff]  ;;  %v7301_v23 = vld [vmem:[#allocation26_spill] sm:$0xff] }
 0x282   :  { %1759 = vmatpush.bf16.msra.mxu2 %v4977_v8  ;;  %1772 = vmatpush.bf16.msra.mxu3 %v4980_v12  ;;  %v7302_v8 = vld [vmem:[#allocation27_spill] sm:$0xff]  ;;  %v7303_v12 = vld [vmem:[#allocation28_spill] sm:$0xff] }
 0x284   :  { %1734 = vmatpush.bf16.msra.mxu0 %v4984_v16  ;;  %1747 = vmatpush.bf16.msra.mxu1 %v7294_v32  ;;  %v7304_v16 = vld [vmem:[#allocation29_spill] sm:$0xff]  ;;  %v7305_v32 = vld [vmem:[#allocation30_spill] sm:$0xff] }
 0x286   :  { %1760 = vmatpush.bf16.msra.mxu2 %v7295_v40  ;;  %1773 = vmatpush.bf16.msra.mxu3 %v7296_v3  ;;  %v7306_v40 = vld [vmem:[#allocation31_spill] sm:$0xff]  ;;  %v7307_v3 = vld [vmem:[#allocation32_spill] sm:$0xff] }
 0x288   :  { %1735 = vmatpush.bf16.msra.mxu0 %v7297_v7  ;;  %1748 = vmatpush.bf16.msra.mxu1 %v7298_v18  ;;  %v7308_v7 = vld [vmem:[#allocation33_spill] sm:$0xff]  ;;  %v7309_v18 = vld [vmem:[#allocation34_spill] sm:$0xff] }
 0x28a   :  { %1761 = vmatpush.bf16.msra.mxu2 %v7299_v19  ;;  %1774 = vmatpush.bf16.msra.mxu3 %v7300_v38  ;;  %v7310_v19 = vld [vmem:[#allocation35_spill] sm:$0xff]  ;;  %v7311_v38 = vld [vmem:[#allocation36_spill] sm:$0xff] }
 0x28c   :  { %1736 = vmatpush.bf16.msra.mxu0 %v7301_v23  ;;  %1749 = vmatpush.bf16.msra.mxu1 %v7302_v8  ;;  %v7312_v23 = vld [vmem:[#allocation37_spill] sm:$0xff]  ;;  %v7313_v8 = vld [vmem:[#allocation38_spill] sm:$0xff] }
 0x28e   :  { %1762 = vmatpush.bf16.msra.mxu2 %v7303_v12  ;;  %1775 = vmatpush.bf16.msra.mxu3 %v7304_v16  ;;  %v7314_v12 = vld [vmem:[#allocation39_spill] sm:$0xff]  ;;  %v7315_v16 = vld [vmem:[#allocation40_spill] sm:$0xff] }
 0x290   :  { %1737 = vmatpush.bf16.msra.mxu0 %v7305_v32  ;;  %1750 = vmatpush.bf16.msra.mxu1 %v7306_v40  ;;  %v7316_v32 = vld [vmem:[#allocation41_spill] sm:$0xff]  ;;  %v7317_v40 = vld [vmem:[#allocation42_spill] sm:$0xff] }
 0x292   :  { %1763 = vmatpush.bf16.msra.mxu2 %v7307_v3  ;;  %1776 = vmatpush.bf16.msra.mxu3 %v7308_v7  ;;  %v7318_v3 = vld [vmem:[#allocation43_spill] sm:$0xff]  ;;  %v7319_v7 = vld [vmem:[#allocation46_spill] sm:$0xff] }
 0x294   :  { %1738 = vmatpush.bf16.msra.mxu0 %v7309_v18  ;;  %1751 = vmatpush.bf16.msra.mxu1 %v7310_v19  ;;  %v7320_v18 = vld [vmem:[#allocation47_spill] sm:$0xff]  ;;  %v7321_v19 = vld [vmem:[#allocation44_spill] sm:$0xff] }
 0x296   :  { %1764 = vmatpush.bf16.msra.mxu2 %v7311_v38  ;;  %1777 = vmatpush.bf16.msra.mxu3 %v7312_v23  ;;  %v7322_v38 = vld [vmem:[#allocation45_spill] sm:$0xff]  ;;  %v7323_v23 = vld [vmem:[#allocation48_spill] sm:$0xff] }
 0x298   :  { %1739 = vmatpush.bf16.msra.mxu0 %v7313_v8  ;;  %1752 = vmatpush.bf16.msra.mxu1 %v7314_v12  ;;  %v7324_v8 = vld [vmem:[#allocation49_spill] sm:$0xff]  ;;  %v7325_v12 = vld [vmem:[#allocation50_spill] sm:$0xff] }
 0x29a   :  { %1765 = vmatpush.bf16.msra.mxu2 %v7315_v16  ;;  %1778 = vmatpush.bf16.msra.mxu3 %v7316_v32  ;;  %v7326_v16 = vld [vmem:[#allocation51_spill] sm:$0xff]  ;;  %v7327_v32 = vld [vmem:[#allocation52_spill] sm:$0xff] }
 0x29c   :  { %1740 = vmatpush.bf16.msra.mxu0 %v7317_v40  ;;  %1753 = vmatpush.bf16.msra.mxu1 %v7318_v3  ;;  %v7328_v40 = vld [vmem:[#allocation53_spill] sm:$0xff]  ;;  %v7329_v3 = vld [vmem:[#allocation54_spill] sm:$0xff] }
 0x29e   :  { %1766 = vmatpush.bf16.msra.mxu2 %v7321_v19  ;;  %1779 = vmatpush.bf16.msra.mxu3 %v7322_v38  ;;  %v7332_v19 = vld [vmem:[#allocation57_spill] sm:$0xff]  ;;  %v7333_v38 = vld [vmem:[#allocation58_spill] sm:$0xff] }
 0x2a0   :  { %1785 = vmatpush.bf16.msrb.mxu0 %v7319_v7  ;;  %1798 = vmatpush.bf16.msrb.mxu1 %v7320_v18  ;;  %v7330_v7 = vld [vmem:[#allocation55_spill] sm:$0xff]  ;;  %v7331_v18 = vld [vmem:[#allocation56_spill] sm:$0xff] }
 0x2a2   :  { %1811 = vmatpush.bf16.msrb.mxu2 %v7323_v23  ;;  %1824 = vmatpush.bf16.msrb.mxu3 %v7324_v8  ;;  %v7334_v23 = vld [vmem:[#allocation59_spill] sm:$0xff]  ;;  %v7335_v8 = vld [vmem:[#allocation60_spill] sm:$0xff] }
 0x2a4   :  { %1786 = vmatpush.bf16.msrb.mxu0 %v7325_v12  ;;  %1799 = vmatpush.bf16.msrb.mxu1 %v7326_v16  ;;  %v7336_v12 = vld [vmem:[#allocation61_spill] sm:$0xff]  ;;  %v7337_v16 = vld [vmem:[#allocation62_spill] sm:$0xff] }
 0x2a6   :  { %1812 = vmatpush.bf16.msrb.mxu2 %v7327_v32  ;;  %1825 = vmatpush.bf16.msrb.mxu3 %v7328_v40  ;;  %v7338_v32 = vld [vmem:[#allocation63_spill] sm:$0xff]  ;;  %v7339_v40 = vld [vmem:[#allocation64_spill] sm:$0xff] }
 0x2a8   :  { %1787 = vmatpush.bf16.msrb.mxu0 %v7329_v3  ;;  %1800 = vmatpush.bf16.msrb.mxu1 %v7330_v7  ;;  %v7340_v3 = vld [vmem:[#allocation65_spill] sm:$0xff]  ;;  %v7341_v7 = vld [vmem:[#allocation66_spill] sm:$0xff] }
 0x2aa   :  { %1813 = vmatpush.bf16.msrb.mxu2 %v7331_v18  ;;  %1826 = vmatpush.bf16.msrb.mxu3 %v7332_v19  ;;  %v7342_v18 = vld [vmem:[#allocation67_spill] sm:$0xff]  ;;  %v7343_v19 = vld [vmem:[#allocation68_spill] sm:$0xff] }
 0x2ac   :  { %1788 = vmatpush.bf16.msrb.mxu0 %v7333_v38  ;;  %1801 = vmatpush.bf16.msrb.mxu1 %v7334_v23  ;;  %v7344_v38 = vld [vmem:[#allocation69_spill] sm:$0xff]  ;;  %v7345_v23 = vld [vmem:[#allocation70_spill] sm:$0xff] }
 0x2ae   :  { %1814 = vmatpush.bf16.msrb.mxu2 %v7335_v8  ;;  %1827 = vmatpush.bf16.msrb.mxu3 %v7336_v12  ;;  %v7346_v8 = vld [vmem:[#allocation71_spill] sm:$0xff]  ;;  %v7347_v12 = vld [vmem:[#allocation72_spill] sm:$0xff] }
 0x2b0   :  { %1789 = vmatpush.bf16.msrb.mxu0 %v7337_v16  ;;  %1802 = vmatpush.bf16.msrb.mxu1 %v7338_v32  ;;  %v7348_v16 = vld [vmem:[#allocation73_spill] sm:$0xff]  ;;  %v7349_v32 = vld [vmem:[#allocation74_spill] sm:$0xff] }
 0x2b2   :  { %1815 = vmatpush.bf16.msrb.mxu2 %v7339_v40  ;;  %1828 = vmatpush.bf16.msrb.mxu3 %v7340_v3  ;;  %v7350_v40 = vld [vmem:[#allocation75_spill] sm:$0xff]  ;;  %v7351_v3 = vld [vmem:[#allocation76_spill] sm:$0xff] }
 0x2b4   :  { %1790 = vmatpush.bf16.msrb.mxu0 %v7341_v7  ;;  %1803 = vmatpush.bf16.msrb.mxu1 %v7342_v18  ;;  %v7352_v7 = vld [vmem:[#allocation79_spill] sm:$0xff] }
 0x2b6   :  { %1816 = vmatpush.bf16.msrb.mxu2 %v7343_v19  ;;  %1829 = vmatpush.bf16.msrb.mxu3 %v7344_v38 }
 0x2b8   :  { %1791 = vmatpush.bf16.msrb.mxu0 %v7345_v23  ;;  %1804 = vmatpush.bf16.msrb.mxu1 %v7346_v8 }
 0x2ba   :  { %1817 = vmatpush.bf16.msrb.mxu2 %v7347_v12  ;;  %1830 = vmatpush.bf16.msrb.mxu3 %v7348_v16 }
 0x2bb   :  { %v1449_v18 = vpop.f32.mrf.mxu0  ;;  %v1462_v19 = vpop.f32.mrf.mxu1 }
 0x2bc   :  { %1792 = vmatpush.bf16.msrb.mxu0 %v7349_v32  ;;  %1805 = vmatpush.bf16.msrb.mxu1 %v7350_v40  ;;  %v1463_v42 = vadd.f32 %v1462_v19, %v1449_v18 }
 0x2be   :  { %1818 = vmatpush.bf16.msrb.mxu2 %v7351_v3  ;;  %1831 = vmatpush.bf16.msrb.mxu3 %v7352_v7 }
 0x2c2   :  { %v1475_v49 = vpop.f32.mrf.mxu2  ;;  %v1488_v38 = vpop.f32.mrf.mxu3 }
 0x2c3   :  { %v1451_v24 = vpop.f32.mrf.mxu0  ;;  %v1464_v23 = vpop.f32.mrf.mxu1  ;;  %v1489_v40 = vadd.f32 %v1488_v38, %v1475_v49 }
 0x2c5   :  { %v1656_v28 = vrot.slane %v1489_v40, 6 }
 0x2ca   :  { %v1477_v54 = vpop.f32.mrf.mxu2  ;;  %v1490_v8 = vpop.f32.mrf.mxu3 }
 0x2cb   :  { %v1501_v22 = vpop.f32.mrf.mxu0  ;;  %v1514_v12 = vpop.f32.mrf.mxu1  ;;  %v1662_v8 = vsel %vm1073_vm0, %v1463_v42, %v1656_v28 }
 0x2cc   :  { %v1515_v51 = vadd.f32 %v1514_v12, %v1501_v22 }
 0x2ce   :  { %v1657_v43 = vrot.slane %v1515_v51, 4 }
 0x2d2   :  { %v1527_v30 = vpop.f32.mrf.mxu2  ;;  %v1540_v16 = vpop.f32.mrf.mxu3 }
 0x2d3   :  { %v1503_v1 = vpop.f32.mrf.mxu0  ;;  %v1516_v32 = vpop.f32.mrf.mxu1  ;;  %v1541_v20 = vadd.f32 %v1540_v16, %v1527_v30 }
 0x2d4   :  { %v4280_v1 = vld [vmem:[%s6735_s0 + $0x20] sm:$0xff] }
 0x2d5   :  { %v1658_v3 = vrot.slane %v1541_v20, 2 }
 0x2d7   :  { %v1663_v24 = vsel %vm1075_vm1, %v1657_v43, %v1658_v3 }
 0x2d8   :  { %v1664_v16 = vsel %vm1077_vm2, %v1662_v8, %v1663_v24 }
 0x2d9   :  { %v1670_v30 = vadd.f32 %v4280_v1, %v1664_v16 }
 0x2da   :  { %v1529_v0 = vpop.f32.mrf.mxu2  ;;  %v1542_v7 = vpop.f32.mrf.mxu3 }
 0x2db   :  { %v4282_v32 = vmul.f32 -1.442695, %v1670_v30 }
 0x2dc   :  { %v1553_v23 = vpop.f32.mrf.mxu0  ;;  %v1566_v54 = vpop.f32.mrf.mxu1 }
 0x2dd   :  { %4706 = vpow2.f32 %v4282_v32 }
 0x2e3   :  { %v4707_v3 = vpop.eup %4706 }
 0x2e4   :  { %v1555_v49 = vpop.f32.mrf.mxu0  ;;  %v1568_v7 = vpop.f32.mrf.mxu1  ;;  %v1678_v40 = vadd.f32 1.0, %v4707_v3 }
 0x2e5   :  { %v1579_v12 = vpop.f32.mrf.mxu2  ;;  %v1592_v22 = vpop.f32.mrf.mxu3  ;;  %v1567_v7 = vadd.f32 %v1566_v54, %v1553_v23 }
 0x2e6   :  { %4708 = vrcp.f32 %v1678_v40  ;;  %v1593_v43 = vadd.f32 %v1592_v22, %v1579_v12  ;;  %v1691_v54 = vand.u32 2147483648, %v1678_v40  ;;  %vm1685_vm7 = vweird.f32 %v1678_v40 }
 0x2e8   :  { %v1659_v8 = vrot.slane %v1593_v43, 6 }
 0x2ea   :  { %v1665_v3 = vsel %vm1073_vm0, %v1567_v7, %v1659_v8  ;;  %v1692_v8 = vor.u32 1.1754944e-38, %v1691_v54 }
 0x2ec   :  { %v4709_v51 = vpop.eup %4708 }
 0x2ed   :  { %v1581_v19 = vpop.f32.mrf.mxu2  ;;  %v1594_v18 = vpop.f32.mrf.mxu3  ;;  %v1681_v0 = vmul.f32 %v4709_v51, %v1678_v40  ;;  %vm1686_vm6 = vweird.f32 %v4709_v51 }
 0x2ee   :  { %v4281_v18 = vld [vmem:[%s6735_s0 + $0x28] sm:$0xff]  ;;  %vm1687_vm8 = vmor %vm1685_vm7, %vm1686_vm6 }
 0x2ef   :  { %v1682_v19 = vsub.f32 1.0, %v1681_v0 }
 0x2fc   :  { %v1605_v20 = vpop.f32.mrf.mxu0  ;;  %v1618_v42 = vpop.f32.mrf.mxu1 }
 0x2fd   :  { %v1619_v28 = vadd.f32 %v1618_v42, %v1605_v20  ;;  %v1683_v42 = vmul.f32 %v4709_v51, %v1682_v19 }
 0x2ff   :  { %v1660_v30 = vrot.slane %v1619_v28, 4  ;;  %v1684_v23 = vadd.f32 %v4709_v51, %v1683_v42  ;;  %v1689_v28 = vand.u32 2147483647, %v1678_v40 }
 0x301   :  { %v1688_v0 = vsel %vm1687_vm8, %v4709_v51, %v1684_v23  ;;  %vm1690_vm9 = vcmp.eq.f32.partialorder %v1689_v28, 8.507059e+37 }
 0x304   :  { %v1631_v38 = vpop.f32.mrf.mxu2  ;;  %v1644_v24 = vpop.f32.mrf.mxu3 }
 0x305   :  { %v1645_v1 = vadd.f32 %v1644_v24, %v1631_v38  ;;  %v1607_v16 = vpop.f32.mrf.mxu0  ;;  %v1620_v49 = vpop.f32.mrf.mxu1 }
 0x306   :  { %v1693_v49 = vsel %vm1690_vm9, %v1692_v8, %v1688_v0 }
 0x307   :  { %v1661_v32 = vrot.slane %v1645_v1, 2 }
 0x309   :  { %v1666_v12 = vsel %vm1075_vm1, %v1660_v30, %v1661_v32  ;;  %v1712_v30 = vrot.slane %v1693_v49, 4 }
 0x30a   :  { %v1667_v22 = vsel %vm1077_vm2, %v1665_v3, %v1666_v12 }
 0x30b   :  { %v1671_v20 = vadd.f32 %v4281_v18, %v1667_v22  ;;  %v1714_v18 = vmul.f32 %v1712_v30, %v5623_v45  ;;  %v7356_v30 = vld [vmem:[#allocation109_spill] sm:$0xff] }
 0x30c   :  { %v1633_v43 = vpop.f32.mrf.mxu2  ;;  %v1646_v38 = vpop.f32.mrf.mxu3 }
 0x30d   :  { %v4283_v24 = vmul.f32 -1.442695, %v1671_v20 }
 0x30f   :  { %4710 = vpow2.f32 %v4283_v24 }
 0x310   :  { %4712 = vtanh.f32 %v1671_v20 }
 0x315   :  { %v4711_v1 = vpop.eup %4710 }
 0x316   :  { %v1679_v16 = vadd.f32 1.0, %v4711_v1  ;;  %v4713_v7 = vpop.eup %4712 }
 0x317   :  { %v1715_v32 = vmul.f32 %v4713_v7, %v1693_v49  ;;  %v7354_v49 = vld [vmem:[#allocation107_spill] sm:$0xff]  ;;  %v7355_v7 = vld [vmem:[#allocation108_spill] sm:$0xff] }
 0x318   :  { %4714 = vrcp.f32 %v1679_v16  ;;  %v1706_v40 = vand.u32 2147483648, %v1679_v16  ;;  %v1704_v51 = vand.u32 2147483647, %v1679_v16  ;;  %vm1700_vm11 = vweird.f32 %v1679_v16 }
 0x319   :  { %v5787_v12 = vadd.f32 %v1715_v32, %v1714_v18  ;;  %v7357_v32 = vld [vmem:[#allocation110_spill] sm:$0xff]  ;;  %v7359_v18 = vld [vmem:[#allocation112_spill] sm:$0xff] }
 0x31a   :  { %v1707_v43 = vor.u32 1.1754944e-38, %v1706_v40  ;;  %vm1705_vm13 = vcmp.eq.f32.partialorder %v1704_v51, 8.507059e+37  ;;  %v7362_v40 = vld [vmem:[#allocation127_spill] sm:$0xff]  ;;  %v7364_v51 = vld [vmem:[#allocation129_spill] sm:$0xff] }
 0x31b   :  { %4716 = vtanh.f32 %v5787_v12 }
 0x31e   :  { %v4715_v19 = vpop.eup %4714 }
 0x31f   :  { %v1696_v3 = vmul.f32 %v4715_v19, %v1679_v16  ;;  %vm1701_vm10 = vweird.f32 %v4715_v19  ;;  %v7353_v16 = vld [vmem:[#allocation102_spill] sm:$0xff] }
 0x320   :  { %vm1702_vm12 = vmor %vm1700_vm11, %vm1701_vm10 }
 0x321   :  { %v1697_v22 = vsub.f32 1.0, %v1696_v3  ;;  %v4717_v54 = vpop.eup %4716  ;;  %v7360_v3 = vld [vmem:[#allocation113_spill] sm:$0xff] }
 0x323   :  { %v1698_v42 = vmul.f32 %v4715_v19, %v1697_v22  ;;  %v7361_v22 = vld [vmem:[#allocation126_spill] sm:$0xff] }
 0x325   :  { %v1699_v20 = vadd.f32 %v4715_v19, %v1698_v42  ;;  %v7363_v42 = vld [vmem:[#allocation128_spill] sm:$0xff] }
 0x327   :  { %v1703_v38 = vsel %vm1702_vm12, %v4715_v19, %v1699_v20  ;;  %v7358_v19 = vld [vmem:[#allocation111_spill] sm:$0xff]  ;;  %v7365_v20 = vld [vmem:[#allocation130_spill] sm:$0xff] }
 0x328   :  { %v1708_v24 = vsel %vm1705_vm13, %v1707_v43, %v1703_v38  ;;  %v7366_v43 = vld [vmem:[#allocation131_spill] sm:$0xff]  ;;  %v7367_v38 = vld [vmem:[#allocation132_spill] sm:$0xff] }
 0x329   :  { %v1719_v23 = vrot.slane %v1708_v24, 4  ;;  %v7368_v24 = vld [vmem:[#allocation133_spill] sm:$0xff] }
 0x32b   :  { %v1721_v45 = vmul.f32 %v4717_v54, %v1719_v23  ;;  %v7369_v23 = vld [vmem:[#allocation134_spill] sm:$0xff]  ;;  %v7370_v54 = vld [vmem:[#allocation135_spill] sm:$0xff] }
 0x32d   :  { %1726 = vst [vmem:[#allocation1] ss:$4 sm:$0xff] %v1721_v45  ;;  %v7371_v45 = vld [vmem:[#allocation136_spill] sm:$0xff] }
 0x334   :  { %v1727_v28 = vld.sshfl [vmem:[#allocation1] sm:$0xff pattern:$0x73625140]  ;;  %v1728_v0 = vld.sshfl [vmem:[#allocation1 + $0x8] sm:$0xff pattern:$0x73625140] }
 0x335   :  { %v5790_v1 = vpack.c.bf16 %v1727_v28, %v1727_v28  ;;  %v5792_v8 = vpack.c.bf16 %v1728_v0, %v1728_v0  ;;  %v7372_v28 = vld [vmem:[#allocation137_spill] sm:$0xff]  ;;  %v7373_v0 = vld [vmem:[#allocation138_spill] sm:$0xff] }
 0x337   :  { %1741 = vmatmul.bf16.vlgmr.msra.gmra.mxu0 %v5790_v1  ;;  %1754 = vmatmul.bf16.vlgmr.msra.gmra.mxu1 %v5792_v8 }
 0x338   :  { %1767 = vmatmul.bf16.vlgmr.msra.gmra.mxu2 %v5790_v1  ;;  %1780 = vmatmul.bf16.vlgmr.msra.gmra.mxu3 %v5792_v8 }
 0x339   :  { %1837 = vmatpush.bf16.msra.mxu0 %v7178_v39  ;;  %1850 = vmatpush.bf16.msra.mxu1 %v7179_v63 }
 0x33a   :  { %1863 = vmatpush.bf16.msra.mxu2 %v7180_v36  ;;  %1876 = vmatpush.bf16.msra.mxu3 %v7181_v13 }
 0x33d   :  { %1838 = vmatpush.bf16.msra.mxu0 %v7182_v15  ;;  %1851 = vmatpush.bf16.msra.mxu1 %v7183_v2 }
 0x33e   :  { %1864 = vmatpush.bf16.msra.mxu2 %v7184_v26  ;;  %1877 = vmatpush.bf16.msra.mxu3 %v7185_v61 }
 0x341   :  { %1839 = vmatpush.bf16.msra.mxu0 %v7186_v60  ;;  %1852 = vmatpush.bf16.msra.mxu1 %v7187_v31 }
 0x342   :  { %1865 = vmatpush.bf16.msra.mxu2 %v7265_v44  ;;  %1878 = vmatpush.bf16.msra.mxu3 %v7266_v29 }
 0x345   :  { %1840 = vmatpush.bf16.msra.mxu0 %v7267_v62  ;;  %1853 = vmatpush.bf16.msra.mxu1 %v7268_v56 }
 0x346   :  { %1866 = vmatpush.bf16.msra.mxu2 %v7269_v57  ;;  %1879 = vmatpush.bf16.msra.mxu3 %v7270_v33 }
 0x347   :  { %1793 = vmatmul.bf16.vlgmr.msrb.gmra.mxu0 %v5790_v1  ;;  %1806 = vmatmul.bf16.vlgmr.msrb.gmra.mxu1 %v5792_v8 }
 0x348   :  { %1819 = vmatmul.bf16.vlgmr.msrb.gmra.mxu2 %v5790_v1  ;;  %1832 = vmatmul.bf16.vlgmr.msrb.gmra.mxu3 %v5792_v8 }
 0x349   :  { %1841 = vmatpush.bf16.msra.mxu0 %v7194_v35  ;;  %1854 = vmatpush.bf16.msra.mxu1 %v7195_v48 }
 0x34a   :  { %1867 = vmatpush.bf16.msra.mxu2 %v7196_v47  ;;  %1880 = vmatpush.bf16.msra.mxu3 %v7197_v41 }
 0x34d   :  { %1842 = vmatpush.bf16.msra.mxu0 %v7271_v5  ;;  %1855 = vmatpush.bf16.msra.mxu1 %v7272_v21 }
 0x34e   :  { %1868 = vmatpush.bf16.msra.mxu2 %v7273_v34  ;;  %1881 = vmatpush.bf16.msra.mxu3 %v7274_v58 }
 0x351   :  { %1843 = vmatpush.bf16.msra.mxu0 %v7353_v16  ;;  %1856 = vmatpush.bf16.msra.mxu1 %v7276_v25 }
 0x352   :  { %1869 = vmatpush.bf16.msra.mxu2 %v7277_v6  ;;  %1882 = vmatpush.bf16.msra.mxu3 %v7278_v9 }
 0x355   :  { %1844 = vmatpush.bf16.msra.mxu0 %v7279_v55  ;;  %1857 = vmatpush.bf16.msra.mxu1 %v7354_v49 }
 0x356   :  { %1870 = vmatpush.bf16.msra.mxu2 %v7355_v7  ;;  %1883 = vmatpush.bf16.msra.mxu3 %v7356_v30 }
 0x358   :  { %1845 = vmatmul.bf16.vlgmr.msra.gmra.mxu0 %v5790_v1  ;;  %1858 = vmatmul.bf16.vlgmr.msra.gmra.mxu1 %v5792_v8 }
 0x359   :  { %1889 = vmatpush.bf16.msrb.mxu0 %v7357_v32  ;;  %1902 = vmatpush.bf16.msrb.mxu1 %v7358_v19 }
 0x35a   :  { %1915 = vmatpush.bf16.msrb.mxu2 %v7359_v18  ;;  %1928 = vmatpush.bf16.msrb.mxu3 %v7360_v3 }
 0x35b   :  { %1871 = vmatmul.bf16.vlgmr.msra.gmra.mxu2 %v5790_v1  ;;  %1884 = vmatmul.bf16.vlgmr.msra.gmra.mxu3 %v5792_v8 }
 0x35d   :  { %1890 = vmatpush.bf16.msrb.mxu0 %v7287_v50  ;;  %1903 = vmatpush.bf16.msrb.mxu1 %v7288_v14 }
 0x35e   :  { %1916 = vmatpush.bf16.msrb.mxu2 %v7289_v46  ;;  %1929 = vmatpush.bf16.msrb.mxu3 %v7290_v52 }
 0x361   :  { %1891 = vmatpush.bf16.msrb.mxu0 %v7291_v27  ;;  %1904 = vmatpush.bf16.msrb.mxu1 %v7292_v4 }
 0x362   :  { %1917 = vmatpush.bf16.msrb.mxu2 %v7293_v17  ;;  %1930 = vmatpush.bf16.msrb.mxu3 %v7216_v53 }
 0x365   :  { %1892 = vmatpush.bf16.msrb.mxu0 %v7217_v10  ;;  %1905 = vmatpush.bf16.msrb.mxu1 %v7218_v37 }
 0x366   :  { %1918 = vmatpush.bf16.msrb.mxu2 %v7219_v59  ;;  %1931 = vmatpush.bf16.msrb.mxu3 %v7220_v11 }
 0x369   :  { %1893 = vmatpush.bf16.msrb.mxu0 %v7361_v22  ;;  %1906 = vmatpush.bf16.msrb.mxu1 %v7362_v40 }
 0x36a   :  { %1919 = vmatpush.bf16.msrb.mxu2 %v7363_v42  ;;  %1932 = vmatpush.bf16.msrb.mxu3 %v7364_v51  ;;  %v7374_v42 = vld [vmem:[#allocation139_spill] sm:$0xff]  ;;  %v7375_v51 = vld [vmem:[#allocation140_spill] sm:$0xff] }
 0x36d   :  { %1894 = vmatpush.bf16.msrb.mxu0 %v7365_v20  ;;  %1907 = vmatpush.bf16.msrb.mxu1 %v7366_v43  ;;  %v7376_v20 = vld [vmem:[#allocation141_spill] sm:$0xff]  ;;  %v7377_v43 = vld [vmem:[#allocation14_spill] sm:$0xff] }
 0x36e   :  { %1920 = vmatpush.bf16.msrb.mxu2 %v7367_v38  ;;  %1933 = vmatpush.bf16.msrb.mxu3 %v7368_v24  ;;  %v7378_v38 = vld [vmem:[#allocation15_spill] sm:$0xff] }
 0x371   :  { %1895 = vmatpush.bf16.msrb.mxu0 %v7369_v23  ;;  %1908 = vmatpush.bf16.msrb.mxu1 %v7370_v54  ;;  %v7387_v54 = vld [vmem:[#allocation24_spill] sm:$0xff] }
 0x372   :  { %1921 = vmatpush.bf16.msrb.mxu2 %v7371_v45  ;;  %1934 = vmatpush.bf16.msrb.mxu3 %v7372_v28  ;;  %v7379_v28 = vld [vmem:[#allocation16_spill] sm:$0xff]  ;;  %v7386_v45 = vld [vmem:[#allocation23_spill] sm:$0xff] }
 0x375   :  { %1896 = vmatpush.bf16.msrb.mxu0 %v7373_v0  ;;  %1909 = vmatpush.bf16.msrb.mxu1 %v7374_v42  ;;  %v7380_v0 = vld [vmem:[#allocation17_spill] sm:$0xff]  ;;  %v7381_v42 = vld [vmem:[#allocation18_spill] sm:$0xff] }
 0x376   :  { %1922 = vmatpush.bf16.msrb.mxu2 %v7375_v51  ;;  %1935 = vmatpush.bf16.msrb.mxu3 %v7376_v20  ;;  %v7382_v51 = vld [vmem:[#allocation19_spill] sm:$0xff]  ;;  %v7383_v20 = vld [vmem:[#allocation20_spill] sm:$0xff] }
 0x378   :  { %1897 = vmatmul.bf16.vlgmr.msrb.gmra.mxu0 %v5790_v1  ;;  %1910 = vmatmul.bf16.vlgmr.msrb.gmra.mxu1 %v5792_v8 }
 0x379   :  { %2026 = vmatpush.bf16.msra.mxu0 %v7377_v43  ;;  %2039 = vmatpush.bf16.msra.mxu1 %v7378_v38  ;;  %v7384_v43 = vld [vmem:[#allocation21_spill] sm:$0xff]  ;;  %v7385_v38 = vld [vmem:[#allocation22_spill] sm:$0xff] }
 0x37a   :  { %1923 = vmatmul.bf16.vlgmr.msrb.gmra.mxu2 %v5790_v1  ;;  %1936 = vmatmul.bf16.vlgmr.msrb.gmra.mxu3 %v5792_v8  ;;  %v7388_v1 = vld [vmem:[#allocation25_spill] sm:$0xff]  ;;  %v7389_v8 = vld [vmem:[#allocation26_spill] sm:$0xff] }
 0x37b   :  { %2052 = vmatpush.bf16.msra.mxu2 %v7379_v28  ;;  %2065 = vmatpush.bf16.msra.mxu3 %v7380_v0  ;;  %v7390_v28 = vld [vmem:[#allocation27_spill] sm:$0xff]  ;;  %v7391_v0 = vld [vmem:[#allocation28_spill] sm:$0xff] }
 0x37d   :  { %2027 = vmatpush.bf16.msra.mxu0 %v7381_v42  ;;  %2040 = vmatpush.bf16.msra.mxu1 %v7382_v51  ;;  %v7392_v42 = vld [vmem:[#allocation29_spill] sm:$0xff]  ;;  %v7393_v51 = vld [vmem:[#allocation30_spill] sm:$0xff] }
 0x37f   :  { %2053 = vmatpush.bf16.msra.mxu2 %v7383_v20  ;;  %2066 = vmatpush.bf16.msra.mxu3 %v7384_v43  ;;  %v7394_v20 = vld [vmem:[#allocation31_spill] sm:$0xff]  ;;  %v7395_v43 = vld [vmem:[#allocation32_spill] sm:$0xff] }
 0x381   :  { %2028 = vmatpush.bf16.msra.mxu0 %v7385_v38  ;;  %2041 = vmatpush.bf16.msra.mxu1 %v7386_v45  ;;  %v7396_v38 = vld [vmem:[#allocation33_spill] sm:$0xff]  ;;  %v7397_v45 = vld [vmem:[#allocation34_spill] sm:$0xff] }
 0x383   :  { %2054 = vmatpush.bf16.msra.mxu2 %v7387_v54  ;;  %2067 = vmatpush.bf16.msra.mxu3 %v7388_v1  ;;  %v7398_v54 = vld [vmem:[#allocation35_spill] sm:$0xff]  ;;  %v7399_v1 = vld [vmem:[#allocation36_spill] sm:$0xff] }
 0x385   :  { %2029 = vmatpush.bf16.msra.mxu0 %v7389_v8  ;;  %2042 = vmatpush.bf16.msra.mxu1 %v7390_v28  ;;  %v7400_v8 = vld [vmem:[#allocation37_spill] sm:$0xff]  ;;  %v7401_v28 = vld [vmem:[#allocation38_spill] sm:$0xff] }
 0x387   :  { %2055 = vmatpush.bf16.msra.mxu2 %v7391_v0  ;;  %2068 = vmatpush.bf16.msra.mxu3 %v7392_v42  ;;  %v7402_v0 = vld [vmem:[#allocation39_spill] sm:$0xff]  ;;  %v7403_v42 = vld [vmem:[#allocation40_spill] sm:$0xff] }
 0x389   :  { %2030 = vmatpush.bf16.msra.mxu0 %v7393_v51  ;;  %2043 = vmatpush.bf16.msra.mxu1 %v7394_v20  ;;  %v7404_v51 = vld [vmem:[#allocation41_spill] sm:$0xff]  ;;  %v7405_v20 = vld [vmem:[#allocation42_spill] sm:$0xff] }
 0x38b   :  { %2056 = vmatpush.bf16.msra.mxu2 %v7395_v43  ;;  %2069 = vmatpush.bf16.msra.mxu3 %v7396_v38  ;;  %v7406_v43 = vld [vmem:[#allocation43_spill] sm:$0xff]  ;;  %v7407_v38 = vld [vmem:[#allocation46_spill] sm:$0xff] }
 0x38d   :  { %2031 = vmatpush.bf16.msra.mxu0 %v7397_v45  ;;  %2044 = vmatpush.bf16.msra.mxu1 %v7398_v54  ;;  %v7408_v45 = vld [vmem:[#allocation47_spill] sm:$0xff]  ;;  %v7409_v54 = vld [vmem:[#allocation44_spill] sm:$0xff] }
 0x38f   :  { %2057 = vmatpush.bf16.msra.mxu2 %v7399_v1  ;;  %2070 = vmatpush.bf16.msra.mxu3 %v7400_v8  ;;  %v7410_v1 = vld [vmem:[#allocation45_spill] sm:$0xff]  ;;  %v7411_v8 = vld [vmem:[#allocation48_spill] sm:$0xff] }
 0x391   :  { %2032 = vmatpush.bf16.msra.mxu0 %v7401_v28  ;;  %2045 = vmatpush.bf16.msra.mxu1 %v7402_v0  ;;  %v7412_v28 = vld [vmem:[#allocation49_spill] sm:$0xff]  ;;  %v7413_v0 = vld [vmem:[#allocation50_spill] sm:$0xff] }
 0x393   :  { %2058 = vmatpush.bf16.msra.mxu2 %v7403_v42  ;;  %2071 = vmatpush.bf16.msra.mxu3 %v7404_v51  ;;  %v7414_v42 = vld [vmem:[#allocation51_spill] sm:$0xff]  ;;  %v7415_v51 = vld [vmem:[#allocation52_spill] sm:$0xff] }
 0x395   :  { %2033 = vmatpush.bf16.msra.mxu0 %v7405_v20  ;;  %2046 = vmatpush.bf16.msra.mxu1 %v7406_v43  ;;  %v7416_v20 = vld [vmem:[#allocation53_spill] sm:$0xff]  ;;  %v7417_v43 = vld [vmem:[#allocation54_spill] sm:$0xff] }
 0x397   :  { %2059 = vmatpush.bf16.msra.mxu2 %v7409_v54  ;;  %2072 = vmatpush.bf16.msra.mxu3 %v7410_v1  ;;  %v7420_v54 = vld [vmem:[#allocation57_spill] sm:$0xff]  ;;  %v7421_v1 = vld [vmem:[#allocation58_spill] sm:$0xff] }
 0x399   :  { %2078 = vmatpush.bf16.msrb.mxu0 %v7407_v38  ;;  %2091 = vmatpush.bf16.msrb.mxu1 %v7408_v45  ;;  %v7418_v38 = vld [vmem:[#allocation55_spill] sm:$0xff]  ;;  %v7419_v45 = vld [vmem:[#allocation56_spill] sm:$0xff] }
 0x39b   :  { %2104 = vmatpush.bf16.msrb.mxu2 %v7411_v8  ;;  %2117 = vmatpush.bf16.msrb.mxu3 %v7412_v28  ;;  %v7422_v8 = vld [vmem:[#allocation59_spill] sm:$0xff]  ;;  %v7423_v28 = vld [vmem:[#allocation60_spill] sm:$0xff] }
 0x39d   :  { %2079 = vmatpush.bf16.msrb.mxu0 %v7413_v0  ;;  %2092 = vmatpush.bf16.msrb.mxu1 %v7414_v42  ;;  %v7424_v0 = vld [vmem:[#allocation61_spill] sm:$0xff]  ;;  %v7425_v42 = vld [vmem:[#allocation62_spill] sm:$0xff] }
 0x39f   :  { %2105 = vmatpush.bf16.msrb.mxu2 %v7415_v51  ;;  %2118 = vmatpush.bf16.msrb.mxu3 %v7416_v20  ;;  %v7426_v51 = vld [vmem:[#allocation63_spill] sm:$0xff]  ;;  %v7427_v20 = vld [vmem:[#allocation64_spill] sm:$0xff] }
 0x3a1   :  { %2080 = vmatpush.bf16.msrb.mxu0 %v7417_v43  ;;  %2093 = vmatpush.bf16.msrb.mxu1 %v7418_v38  ;;  %v7428_v43 = vld [vmem:[#allocation65_spill] sm:$0xff]  ;;  %v7429_v38 = vld [vmem:[#allocation66_spill] sm:$0xff] }
 0x3a3   :  { %2106 = vmatpush.bf16.msrb.mxu2 %v7419_v45  ;;  %2119 = vmatpush.bf16.msrb.mxu3 %v7420_v54  ;;  %v7430_v45 = vld [vmem:[#allocation67_spill] sm:$0xff]  ;;  %v7431_v54 = vld [vmem:[#allocation68_spill] sm:$0xff] }
 0x3a5   :  { %2081 = vmatpush.bf16.msrb.mxu0 %v7421_v1  ;;  %2094 = vmatpush.bf16.msrb.mxu1 %v7422_v8  ;;  %v7432_v1 = vld [vmem:[#allocation69_spill] sm:$0xff]  ;;  %v7433_v8 = vld [vmem:[#allocation70_spill] sm:$0xff] }
 0x3a7   :  { %2107 = vmatpush.bf16.msrb.mxu2 %v7423_v28  ;;  %2120 = vmatpush.bf16.msrb.mxu3 %v7424_v0  ;;  %v7434_v28 = vld [vmem:[#allocation71_spill] sm:$0xff]  ;;  %v7435_v0 = vld [vmem:[#allocation72_spill] sm:$0xff] }
 0x3a9   :  { %2082 = vmatpush.bf16.msrb.mxu0 %v7425_v42  ;;  %2095 = vmatpush.bf16.msrb.mxu1 %v7426_v51  ;;  %v7436_v42 = vld [vmem:[#allocation73_spill] sm:$0xff]  ;;  %v7437_v51 = vld [vmem:[#allocation74_spill] sm:$0xff] }
 0x3ab   :  { %2108 = vmatpush.bf16.msrb.mxu2 %v7427_v20  ;;  %2121 = vmatpush.bf16.msrb.mxu3 %v7428_v43  ;;  %v7438_v20 = vld [vmem:[#allocation75_spill] sm:$0xff]  ;;  %v7439_v43 = vld [vmem:[#allocation76_spill] sm:$0xff] }
 0x3ad   :  { %2083 = vmatpush.bf16.msrb.mxu0 %v7429_v38  ;;  %2096 = vmatpush.bf16.msrb.mxu1 %v7430_v45  ;;  %v7440_v38 = vld [vmem:[#allocation79_spill] sm:$0xff] }
 0x3af   :  { %2109 = vmatpush.bf16.msrb.mxu2 %v7431_v54  ;;  %2122 = vmatpush.bf16.msrb.mxu3 %v7432_v1 }
 0x3b1   :  { %2084 = vmatpush.bf16.msrb.mxu0 %v7433_v8  ;;  %2097 = vmatpush.bf16.msrb.mxu1 %v7434_v28 }
 0x3b3   :  { %2110 = vmatpush.bf16.msrb.mxu2 %v7435_v0  ;;  %2123 = vmatpush.bf16.msrb.mxu3 %v7436_v42 }
 0x3b4   :  { %v1742_v45 = vpop.f32.mrf.mxu0  ;;  %v1755_v54 = vpop.f32.mrf.mxu1 }
 0x3b5   :  { %2085 = vmatpush.bf16.msrb.mxu0 %v7437_v51  ;;  %2098 = vmatpush.bf16.msrb.mxu1 %v7438_v20  ;;  %v1756_v27 = vadd.f32 %v1755_v54, %v1742_v45 }
 0x3b7   :  { %2111 = vmatpush.bf16.msrb.mxu2 %v7439_v43  ;;  %2124 = vmatpush.bf16.msrb.mxu3 %v7440_v38 }
 0x3bb   :  { %v1768_v23 = vpop.f32.mrf.mxu2  ;;  %v1781_v1 = vpop.f32.mrf.mxu3 }
 0x3bc   :  { %v1744_v24 = vpop.f32.mrf.mxu0  ;;  %v1757_v8 = vpop.f32.mrf.mxu1  ;;  %v1782_v20 = vadd.f32 %v1781_v1, %v1768_v23 }
 0x3be   :  { %v1949_v17 = vrot.slane %v1782_v20, 6 }
 0x3c3   :  { %v1770_v40 = vpop.f32.mrf.mxu2  ;;  %v1783_v28 = vpop.f32.mrf.mxu3 }
 0x3c4   :  { %v1794_v22 = vpop.f32.mrf.mxu0  ;;  %v1807_v0 = vpop.f32.mrf.mxu1  ;;  %v1955_v28 = vsel %vm1073_vm0, %v1756_v27, %v1949_v17 }
 0x3c5   :  { %v1808_v10 = vadd.f32 %v1807_v0, %v1794_v22 }
 0x3c7   :  { %v1950_v4 = vrot.slane %v1808_v10, 4 }
 0x3cb   :  { %v1820_v11 = vpop.f32.mrf.mxu2  ;;  %v1833_v42 = vpop.f32.mrf.mxu3 }
 0x3cc   :  { %v1796_v59 = vpop.f32.mrf.mxu0  ;;  %v1809_v51 = vpop.f32.mrf.mxu1  ;;  %v1834_v37 = vadd.f32 %v1833_v42, %v1820_v11 }
 0x3cd   :  { %v4284_v59 = vld [vmem:[%s6735_s0 + $0x30] sm:$0xff] }
 0x3ce   :  { %v1951_v43 = vrot.slane %v1834_v37, 2 }
 0x3d0   :  { %v1956_v24 = vsel %vm1075_vm1, %v1950_v4, %v1951_v43 }
 0x3d1   :  { %v1957_v11 = vsel %vm1077_vm2, %v1955_v28, %v1956_v24 }
 0x3d2   :  { %v1963_v42 = vadd.f32 %v4284_v59, %v1957_v11 }
 0x3d3   :  { %v1822_v53 = vpop.f32.mrf.mxu2  ;;  %v1835_v38 = vpop.f32.mrf.mxu3 }
 0x3d4   :  { %v4286_v20 = vmul.f32 -1.442695, %v1963_v42 }
 0x3d5   :  { %v1846_v8 = vpop.f32.mrf.mxu0  ;;  %v1859_v40 = vpop.f32.mrf.mxu1 }
 0x3d6   :  { %4718 = vpow2.f32 %v4286_v20 }
 0x3dc   :  { %v4719_v4 = vpop.eup %4718 }
 0x3dd   :  { %v1848_v53 = vpop.f32.mrf.mxu0  ;;  %v1861_v51 = vpop.f32.mrf.mxu1  ;;  %v1971_v43 = vadd.f32 1.0, %v4719_v4 }
 0x3de   :  { %v1872_v22 = vpop.f32.mrf.mxu2  ;;  %v1885_v37 = vpop.f32.mrf.mxu3  ;;  %v1860_v51 = vadd.f32 %v1859_v40, %v1846_v8 }
 0x3df   :  { %4720 = vrcp.f32 %v1971_v43  ;;  %v1886_v54 = vadd.f32 %v1885_v37, %v1872_v22  ;;  %v1984_v40 = vand.u32 2147483648, %v1971_v43  ;;  %vm1978_vm15 = vweird.f32 %v1971_v43 }
 0x3e1   :  { %v1952_v28 = vrot.slane %v1886_v54, 6 }
 0x3e3   :  { %v1958_v4 = vsel %vm1073_vm0, %v1860_v51, %v1952_v28  ;;  %v1985_v28 = vor.u32 1.1754944e-38, %v1984_v40 }
 0x3e5   :  { %v4721_v27 = vpop.eup %4720 }
 0x3e6   :  { %v1874_v10 = vpop.f32.mrf.mxu2  ;;  %v1887_v38 = vpop.f32.mrf.mxu3  ;;  %v1974_v0 = vmul.f32 %v4721_v27, %v1971_v43  ;;  %vm1979_vm14 = vweird.f32 %v4721_v27 }
 0x3e7   :  { %v4285_v38 = vld [vmem:[%s6735_s0 + $0x38] sm:$0xff]  ;;  %vm1980_vm3 = vmor %vm1978_vm15, %vm1979_vm14 }
 0x3e8   :  { %v1975_v10 = vsub.f32 1.0, %v1974_v0 }
 0x3f5   :  { %v1898_v23 = vpop.f32.mrf.mxu0  ;;  %v1911_v17 = vpop.f32.mrf.mxu1 }
 0x3f6   :  { %v1912_v45 = vadd.f32 %v1911_v17, %v1898_v23  ;;  %v1976_v17 = vmul.f32 %v4721_v27, %v1975_v10 }
 0x3f8   :  { %v1953_v42 = vrot.slane %v1912_v45, 4  ;;  %v1977_v8 = vadd.f32 %v4721_v27, %v1976_v17  ;;  %v1982_v45 = vand.u32 2147483647, %v1971_v43 }
 0x3fa   :  { %v1981_v0 = vsel %vm1980_vm3, %v4721_v27, %v1977_v8  ;;  %vm1983_vm4 = vcmp.eq.f32.partialorder %v1982_v45, 8.507059e+37 }
 0x3fd   :  { %v1924_v1 = vpop.f32.mrf.mxu2  ;;  %v1937_v24 = vpop.f32.mrf.mxu3 }
 0x3fe   :  { %v1938_v59 = vadd.f32 %v1937_v24, %v1924_v1  ;;  %v1900_v11 = vpop.f32.mrf.mxu0  ;;  %v1913_v53 = vpop.f32.mrf.mxu1 }
 0x3ff   :  { %v1986_v53 = vsel %vm1983_vm4, %v1985_v28, %v1981_v0 }
 0x400   :  { %v1954_v20 = vrot.slane %v1938_v59, 2 }
 0x402   :  { %v1959_v22 = vsel %vm1075_vm1, %v1953_v42, %v1954_v20  ;;  %v2005_v42 = vrot.slane %v1986_v53, 4 }
 0x403   :  { %v1960_v37 = vsel %vm1077_vm2, %v1958_v4, %v1959_v22 }
 0x404   :  { %v1964_v23 = vadd.f32 %v4285_v38, %v1960_v37  ;;  %v2007_v38 = vmul.f32 %v2005_v42, %v5787_v12  ;;  %v7444_v42 = vld [vmem:[#allocation121_spill] sm:$0xff] }
 0x405   :  { %v1926_v54 = vpop.f32.mrf.mxu2  ;;  %v1939_v1 = vpop.f32.mrf.mxu3 }
 0x406   :  { %v4287_v24 = vmul.f32 -1.442695, %v1964_v23 }
 0x408   :  { %4722 = vpow2.f32 %v4287_v24 }
 0x409   :  { %4724 = vtanh.f32 %v1964_v23 }
 0x40e   :  { %v4723_v59 = vpop.eup %4722 }
 0x40f   :  { %v1972_v11 = vadd.f32 1.0, %v4723_v59  ;;  %v4725_v51 = vpop.eup %4724 }
 0x410   :  { %v2008_v20 = vmul.f32 %v4725_v51, %v1986_v53  ;;  %v7442_v53 = vld [vmem:[#allocation119_spill] sm:$0xff]  ;;  %v7443_v51 = vld [vmem:[#allocation120_spill] sm:$0xff] }
 0x411   :  { %4726 = vrcp.f32 %v1972_v11  ;;  %v1999_v43 = vand.u32 2147483648, %v1972_v11  ;;  %v1997_v27 = vand.u32 2147483647, %v1972_v11  ;;  %vm1993_vm6 = vweird.f32 %v1972_v11 }
 0x412   :  { %v5951_v22 = vadd.f32 %v2008_v20, %v2007_v38  ;;  %v7445_v20 = vld [vmem:[#allocation122_spill] sm:$0xff]  ;;  %v7447_v38 = vld [vmem:[#allocation124_spill] sm:$0xff] }
 0x413   :  { %v2000_v54 = vor.u32 1.1754944e-38, %v1999_v43  ;;  %vm1998_vm8 = vcmp.eq.f32.partialorder %v1997_v27, 8.507059e+37  ;;  %v7450_v43 = vld [vmem:[#allocation127_spill] sm:$0xff]  ;;  %v7452_v27 = vld [vmem:[#allocation129_spill] sm:$0xff] }
 0x414   :  { %4728 = vtanh.f32 %v5951_v22 }
 0x417   :  { %v4727_v10 = vpop.eup %4726 }
 0x418   :  { %v1989_v4 = vmul.f32 %v4727_v10, %v1972_v11  ;;  %vm1994_vm5 = vweird.f32 %v4727_v10  ;;  %v7441_v11 = vld [vmem:[#allocation118_spill] sm:$0xff] }
 0x419   :  { %vm1995_vm7 = vmor %vm1993_vm6, %vm1994_vm5 }
 0x41a   :  { %v1990_v37 = vsub.f32 1.0, %v1989_v4  ;;  %v4729_v40 = vpop.eup %4728  ;;  %v7448_v4 = vld [vmem:[#allocation125_spill] sm:$0xff] }
 0x41c   :  { %v1991_v17 = vmul.f32 %v4727_v10, %v1990_v37  ;;  %v7449_v37 = vld [vmem:[#allocation126_spill] sm:$0xff] }
 0x41e   :  { %v1992_v23 = vadd.f32 %v4727_v10, %v1991_v17  ;;  %v7451_v17 = vld [vmem:[#allocation128_spill] sm:$0xff] }
 0x420   :  { %v1996_v1 = vsel %vm1995_vm7, %v4727_v10, %v1992_v23  ;;  %v7446_v10 = vld [vmem:[#allocation123_spill] sm:$0xff]  ;;  %v7453_v23 = vld [vmem:[#allocation130_spill] sm:$0xff] }
 0x421   :  { %v2001_v24 = vsel %vm1998_vm8, %v2000_v54, %v1996_v1  ;;  %v7454_v54 = vld [vmem:[#allocation131_spill] sm:$0xff]  ;;  %v7455_v1 = vld [vmem:[#allocation132_spill] sm:$0xff] }
 0x422   :  { %v2012_v8 = vrot.slane %v2001_v24, 4  ;;  %v7456_v24 = vld [vmem:[#allocation133_spill] sm:$0xff] }
 0x424   :  { %v2014_v12 = vmul.f32 %v4729_v40, %v2012_v8  ;;  %v7457_v8 = vld [vmem:[#allocation134_spill] sm:$0xff]  ;;  %v7458_v40 = vld [vmem:[#allocation135_spill] sm:$0xff] }
 0x426   :  { %2019 = vst [vmem:[#allocation1] ss:$4 sm:$0xff] %v2014_v12  ;;  %v7459_v12 = vld [vmem:[#allocation136_spill] sm:$0xff] }
 0x42d   :  { %v2020_v45 = vld.sshfl [vmem:[#allocation1] sm:$0xff pattern:$0x73625140]  ;;  %v2021_v0 = vld.sshfl [vmem:[#allocation1 + $0x8] sm:$0xff pattern:$0x73625140] }
 0x42e   :  { %v5954_v59 = vpack.c.bf16 %v2020_v45, %v2020_v45  ;;  %v5956_v28 = vpack.c.bf16 %v2021_v0, %v2021_v0  ;;  %v7460_v45 = vld [vmem:[#allocation137_spill] sm:$0xff]  ;;  %v7461_v0 = vld [vmem:[#allocation138_spill] sm:$0xff] }
 0x430   :  { %2034 = vmatmul.bf16.vlgmr.msra.gmra.mxu0 %v5954_v59  ;;  %2047 = vmatmul.bf16.vlgmr.msra.gmra.mxu1 %v5956_v28 }
 0x431   :  { %2060 = vmatmul.bf16.vlgmr.msra.gmra.mxu2 %v5954_v59  ;;  %2073 = vmatmul.bf16.vlgmr.msra.gmra.mxu3 %v5956_v28 }
 0x432   :  { %2130 = vmatpush.bf16.msra.mxu0 %v7178_v39  ;;  %2143 = vmatpush.bf16.msra.mxu1 %v7179_v63 }
 0x433   :  { %2156 = vmatpush.bf16.msra.mxu2 %v7180_v36  ;;  %2169 = vmatpush.bf16.msra.mxu3 %v7181_v13 }
 0x436   :  { %2131 = vmatpush.bf16.msra.mxu0 %v7182_v15  ;;  %2144 = vmatpush.bf16.msra.mxu1 %v7183_v2 }
 0x437   :  { %2157 = vmatpush.bf16.msra.mxu2 %v7184_v26  ;;  %2170 = vmatpush.bf16.msra.mxu3 %v7185_v61 }
 0x43a   :  { %2132 = vmatpush.bf16.msra.mxu0 %v7186_v60  ;;  %2145 = vmatpush.bf16.msra.mxu1 %v7187_v31 }
 0x43b   :  { %2158 = vmatpush.bf16.msra.mxu2 %v7265_v44  ;;  %2171 = vmatpush.bf16.msra.mxu3 %v7266_v29 }
 0x43e   :  { %2133 = vmatpush.bf16.msra.mxu0 %v7267_v62  ;;  %2146 = vmatpush.bf16.msra.mxu1 %v7268_v56 }
 0x43f   :  { %2159 = vmatpush.bf16.msra.mxu2 %v7269_v57  ;;  %2172 = vmatpush.bf16.msra.mxu3 %v7270_v33 }
 0x440   :  { %2086 = vmatmul.bf16.vlgmr.msrb.gmra.mxu0 %v5954_v59  ;;  %2099 = vmatmul.bf16.vlgmr.msrb.gmra.mxu1 %v5956_v28 }
 0x441   :  { %2112 = vmatmul.bf16.vlgmr.msrb.gmra.mxu2 %v5954_v59  ;;  %2125 = vmatmul.bf16.vlgmr.msrb.gmra.mxu3 %v5956_v28 }
 0x442   :  { %2134 = vmatpush.bf16.msra.mxu0 %v7194_v35  ;;  %2147 = vmatpush.bf16.msra.mxu1 %v7195_v48 }
 0x443   :  { %2160 = vmatpush.bf16.msra.mxu2 %v7196_v47  ;;  %2173 = vmatpush.bf16.msra.mxu3 %v7197_v41 }
 0x446   :  { %2135 = vmatpush.bf16.msra.mxu0 %v7271_v5  ;;  %2148 = vmatpush.bf16.msra.mxu1 %v7272_v21 }
 0x447   :  { %2161 = vmatpush.bf16.msra.mxu2 %v7273_v34  ;;  %2174 = vmatpush.bf16.msra.mxu3 %v7274_v58 }
 0x44a   :  { %2136 = vmatpush.bf16.msra.mxu0 %v7353_v16  ;;  %2149 = vmatpush.bf16.msra.mxu1 %v7276_v25 }
 0x44b   :  { %2162 = vmatpush.bf16.msra.mxu2 %v7277_v6  ;;  %2175 = vmatpush.bf16.msra.mxu3 %v7278_v9 }
 0x44e   :  { %2137 = vmatpush.bf16.msra.mxu0 %v7279_v55  ;;  %2150 = vmatpush.bf16.msra.mxu1 %v7354_v49 }
 0x44f   :  { %2163 = vmatpush.bf16.msra.mxu2 %v7355_v7  ;;  %2176 = vmatpush.bf16.msra.mxu3 %v7356_v30 }
 0x451   :  { %2138 = vmatmul.bf16.vlgmr.msra.gmra.mxu0 %v5954_v59  ;;  %2151 = vmatmul.bf16.vlgmr.msra.gmra.mxu1 %v5956_v28 }
 0x452   :  { %2182 = vmatpush.bf16.msrb.mxu0 %v7357_v32  ;;  %2195 = vmatpush.bf16.msrb.mxu1 %v7358_v19 }
 0x453   :  { %2208 = vmatpush.bf16.msrb.mxu2 %v7359_v18  ;;  %2221 = vmatpush.bf16.msrb.mxu3 %v7360_v3 }
 0x454   :  { %2164 = vmatmul.bf16.vlgmr.msra.gmra.mxu2 %v5954_v59  ;;  %2177 = vmatmul.bf16.vlgmr.msra.gmra.mxu3 %v5956_v28 }
 0x456   :  { %2183 = vmatpush.bf16.msrb.mxu0 %v7287_v50  ;;  %2196 = vmatpush.bf16.msrb.mxu1 %v7288_v14 }
 0x457   :  { %2209 = vmatpush.bf16.msrb.mxu2 %v7289_v46  ;;  %2222 = vmatpush.bf16.msrb.mxu3 %v7290_v52 }
 0x45a   :  { %2184 = vmatpush.bf16.msrb.mxu0 %v7441_v11  ;;  %2197 = vmatpush.bf16.msrb.mxu1 %v7442_v53 }
 0x45b   :  { %2210 = vmatpush.bf16.msrb.mxu2 %v7443_v51  ;;  %2223 = vmatpush.bf16.msrb.mxu3 %v7444_v42 }
 0x45e   :  { %2185 = vmatpush.bf16.msrb.mxu0 %v7445_v20  ;;  %2198 = vmatpush.bf16.msrb.mxu1 %v7446_v10 }
 0x45f   :  { %2211 = vmatpush.bf16.msrb.mxu2 %v7447_v38  ;;  %2224 = vmatpush.bf16.msrb.mxu3 %v7448_v4 }
 0x462   :  { %2186 = vmatpush.bf16.msrb.mxu0 %v7449_v37  ;;  %2199 = vmatpush.bf16.msrb.mxu1 %v7450_v43 }
 0x463   :  { %2212 = vmatpush.bf16.msrb.mxu2 %v7451_v17  ;;  %2225 = vmatpush.bf16.msrb.mxu3 %v7452_v27  ;;  %v7462_v17 = vld [vmem:[#allocation139_spill] sm:$0xff]  ;;  %v7463_v27 = vld [vmem:[#allocation140_spill] sm:$0xff] }
 0x466   :  { %2187 = vmatpush.bf16.msrb.mxu0 %v7453_v23  ;;  %2200 = vmatpush.bf16.msrb.mxu1 %v7454_v54  ;;  %v7464_v23 = vld [vmem:[#allocation141_spill] sm:$0xff]  ;;  %v7465_v54 = vld [vmem:[#allocation14_spill] sm:$0xff] }
 0x467   :  { %2213 = vmatpush.bf16.msrb.mxu2 %v7455_v1  ;;  %2226 = vmatpush.bf16.msrb.mxu3 %v7456_v24  ;;  %v7466_v1 = vld [vmem:[#allocation15_spill] sm:$0xff] }
 0x46a   :  { %2188 = vmatpush.bf16.msrb.mxu0 %v7457_v8  ;;  %2201 = vmatpush.bf16.msrb.mxu1 %v7458_v40  ;;  %v7475_v40 = vld [vmem:[#allocation24_spill] sm:$0xff] }
 0x46b   :  { %2214 = vmatpush.bf16.msrb.mxu2 %v7459_v12  ;;  %2227 = vmatpush.bf16.msrb.mxu3 %v7460_v45  ;;  %v7467_v45 = vld [vmem:[#allocation16_spill] sm:$0xff]  ;;  %v7474_v12 = vld [vmem:[#allocation23_spill] sm:$0xff] }
 0x46e   :  { %2189 = vmatpush.bf16.msrb.mxu0 %v7461_v0  ;;  %2202 = vmatpush.bf16.msrb.mxu1 %v7462_v17  ;;  %v7468_v0 = vld [vmem:[#allocation17_spill] sm:$0xff]  ;;  %v7469_v17 = vld [vmem:[#allocation18_spill] sm:$0xff] }
 0x46f   :  { %2215 = vmatpush.bf16.msrb.mxu2 %v7463_v27  ;;  %2228 = vmatpush.bf16.msrb.mxu3 %v7464_v23  ;;  %v7470_v27 = vld [vmem:[#allocation19_spill] sm:$0xff]  ;;  %v7471_v23 = vld [vmem:[#allocation20_spill] sm:$0xff] }
 0x471   :  { %2190 = vmatmul.bf16.vlgmr.msrb.gmra.mxu0 %v5954_v59  ;;  %2203 = vmatmul.bf16.vlgmr.msrb.gmra.mxu1 %v5956_v28 }
 0x472   :  { %2319 = vmatpush.bf16.msra.mxu0 %v7465_v54  ;;  %2332 = vmatpush.bf16.msra.mxu1 %v7466_v1  ;;  %v7472_v54 = vld [vmem:[#allocation21_spill] sm:$0xff]  ;;  %v7473_v1 = vld [vmem:[#allocation22_spill] sm:$0xff] }
 0x473   :  { %2216 = vmatmul.bf16.vlgmr.msrb.gmra.mxu2 %v5954_v59  ;;  %2229 = vmatmul.bf16.vlgmr.msrb.gmra.mxu3 %v5956_v28  ;;  %v7476_v59 = vld [vmem:[#allocation25_spill] sm:$0xff]  ;;  %v7477_v28 = vld [vmem:[#allocation26_spill] sm:$0xff] }
 0x474   :  { %2345 = vmatpush.bf16.msra.mxu2 %v7467_v45  ;;  %2358 = vmatpush.bf16.msra.mxu3 %v7468_v0  ;;  %v7478_v45 = vld [vmem:[#allocation27_spill] sm:$0xff]  ;;  %v7479_v0 = vld [vmem:[#allocation28_spill] sm:$0xff] }
 0x476   :  { %2320 = vmatpush.bf16.msra.mxu0 %v7469_v17  ;;  %2333 = vmatpush.bf16.msra.mxu1 %v7470_v27  ;;  %v7480_v17 = vld [vmem:[#allocation29_spill] sm:$0xff]  ;;  %v7481_v27 = vld [vmem:[#allocation30_spill] sm:$0xff] }
 0x478   :  { %2346 = vmatpush.bf16.msra.mxu2 %v7471_v23  ;;  %2359 = vmatpush.bf16.msra.mxu3 %v7472_v54  ;;  %v7482_v23 = vld [vmem:[#allocation31_spill] sm:$0xff]  ;;  %v7483_v54 = vld [vmem:[#allocation32_spill] sm:$0xff] }
 0x47a   :  { %2321 = vmatpush.bf16.msra.mxu0 %v7473_v1  ;;  %2334 = vmatpush.bf16.msra.mxu1 %v7474_v12  ;;  %v7484_v1 = vld [vmem:[#allocation33_spill] sm:$0xff]  ;;  %v7485_v12 = vld [vmem:[#allocation34_spill] sm:$0xff] }
 0x47c   :  { %2347 = vmatpush.bf16.msra.mxu2 %v7475_v40  ;;  %2360 = vmatpush.bf16.msra.mxu3 %v7476_v59  ;;  %v7486_v40 = vld [vmem:[#allocation35_spill] sm:$0xff]  ;;  %v7487_v59 = vld [vmem:[#allocation36_spill] sm:$0xff] }
 0x47e   :  { %2322 = vmatpush.bf16.msra.mxu0 %v7477_v28  ;;  %2335 = vmatpush.bf16.msra.mxu1 %v7478_v45  ;;  %v7488_v28 = vld [vmem:[#allocation37_spill] sm:$0xff]  ;;  %v7489_v45 = vld [vmem:[#allocation38_spill] sm:$0xff] }
 0x480   :  { %2348 = vmatpush.bf16.msra.mxu2 %v7479_v0  ;;  %2361 = vmatpush.bf16.msra.mxu3 %v7480_v17  ;;  %v7490_v0 = vld [vmem:[#allocation39_spill] sm:$0xff]  ;;  %v7491_v17 = vld [vmem:[#allocation40_spill] sm:$0xff] }
 0x482   :  { %2323 = vmatpush.bf16.msra.mxu0 %v7481_v27  ;;  %2336 = vmatpush.bf16.msra.mxu1 %v7482_v23  ;;  %v7492_v27 = vld [vmem:[#allocation41_spill] sm:$0xff]  ;;  %v7493_v23 = vld [vmem:[#allocation42_spill] sm:$0xff] }
 0x484   :  { %2349 = vmatpush.bf16.msra.mxu2 %v7483_v54  ;;  %2362 = vmatpush.bf16.msra.mxu3 %v7484_v1  ;;  %v7494_v54 = vld [vmem:[#allocation43_spill] sm:$0xff]  ;;  %v7495_v1 = vld [vmem:[#allocation46_spill] sm:$0xff] }
 0x486   :  { %2324 = vmatpush.bf16.msra.mxu0 %v7485_v12  ;;  %2337 = vmatpush.bf16.msra.mxu1 %v7486_v40  ;;  %v7496_v12 = vld [vmem:[#allocation47_spill] sm:$0xff]  ;;  %v7497_v40 = vld [vmem:[#allocation44_spill] sm:$0xff] }
 0x488   :  { %2350 = vmatpush.bf16.msra.mxu2 %v7487_v59  ;;  %2363 = vmatpush.bf16.msra.mxu3 %v7488_v28  ;;  %v7498_v59 = vld [vmem:[#allocation45_spill] sm:$0xff]  ;;  %v7499_v28 = vld [vmem:[#allocation48_spill] sm:$0xff] }
 0x48a   :  { %2325 = vmatpush.bf16.msra.mxu0 %v7489_v45  ;;  %2338 = vmatpush.bf16.msra.mxu1 %v7490_v0  ;;  %v7500_v45 = vld [vmem:[#allocation49_spill] sm:$0xff]  ;;  %v7501_v0 = vld [vmem:[#allocation50_spill] sm:$0xff] }
 0x48c   :  { %2351 = vmatpush.bf16.msra.mxu2 %v7491_v17  ;;  %2364 = vmatpush.bf16.msra.mxu3 %v7492_v27  ;;  %v7502_v17 = vld [vmem:[#allocation51_spill] sm:$0xff]  ;;  %v7503_v27 = vld [vmem:[#allocation52_spill] sm:$0xff] }
 0x48e   :  { %2326 = vmatpush.bf16.msra.mxu0 %v7493_v23  ;;  %2339 = vmatpush.bf16.msra.mxu1 %v7494_v54  ;;  %v7504_v23 = vld [vmem:[#allocation53_spill] sm:$0xff]  ;;  %v7505_v54 = vld [vmem:[#allocation54_spill] sm:$0xff] }
 0x490   :  { %2352 = vmatpush.bf16.msra.mxu2 %v7497_v40  ;;  %2365 = vmatpush.bf16.msra.mxu3 %v7498_v59  ;;  %v7508_v40 = vld [vmem:[#allocation57_spill] sm:$0xff]  ;;  %v7509_v59 = vld [vmem:[#allocation58_spill] sm:$0xff] }
 0x492   :  { %2371 = vmatpush.bf16.msrb.mxu0 %v7495_v1  ;;  %2384 = vmatpush.bf16.msrb.mxu1 %v7496_v12  ;;  %v7506_v1 = vld [vmem:[#allocation55_spill] sm:$0xff]  ;;  %v7507_v12 = vld [vmem:[#allocation56_spill] sm:$0xff] }
 0x494   :  { %2397 = vmatpush.bf16.msrb.mxu2 %v7499_v28  ;;  %2410 = vmatpush.bf16.msrb.mxu3 %v7500_v45  ;;  %v7510_v28 = vld [vmem:[#allocation59_spill] sm:$0xff]  ;;  %v7511_v45 = vld [vmem:[#allocation60_spill] sm:$0xff] }
 0x496   :  { %2372 = vmatpush.bf16.msrb.mxu0 %v7501_v0  ;;  %2385 = vmatpush.bf16.msrb.mxu1 %v7502_v17  ;;  %v7512_v0 = vld [vmem:[#allocation61_spill] sm:$0xff]  ;;  %v7513_v17 = vld [vmem:[#allocation62_spill] sm:$0xff] }
 0x498   :  { %2398 = vmatpush.bf16.msrb.mxu2 %v7503_v27  ;;  %2411 = vmatpush.bf16.msrb.mxu3 %v7504_v23  ;;  %v7514_v27 = vld [vmem:[#allocation63_spill] sm:$0xff]  ;;  %v7515_v23 = vld [vmem:[#allocation64_spill] sm:$0xff] }
 0x49a   :  { %2373 = vmatpush.bf16.msrb.mxu0 %v7505_v54  ;;  %2386 = vmatpush.bf16.msrb.mxu1 %v7506_v1  ;;  %v7516_v54 = vld [vmem:[#allocation65_spill] sm:$0xff]  ;;  %v7517_v1 = vld [vmem:[#allocation66_spill] sm:$0xff] }
 0x49c   :  { %2399 = vmatpush.bf16.msrb.mxu2 %v7507_v12  ;;  %2412 = vmatpush.bf16.msrb.mxu3 %v7508_v40  ;;  %v7518_v12 = vld [vmem:[#allocation67_spill] sm:$0xff]  ;;  %v7519_v40 = vld [vmem:[#allocation68_spill] sm:$0xff] }
 0x49e   :  { %2374 = vmatpush.bf16.msrb.mxu0 %v7509_v59  ;;  %2387 = vmatpush.bf16.msrb.mxu1 %v7510_v28  ;;  %v7520_v59 = vld [vmem:[#allocation69_spill] sm:$0xff]  ;;  %v7521_v28 = vld [vmem:[#allocation70_spill] sm:$0xff] }
 0x4a0   :  { %2400 = vmatpush.bf16.msrb.mxu2 %v7511_v45  ;;  %2413 = vmatpush.bf16.msrb.mxu3 %v7512_v0  ;;  %v7522_v45 = vld [vmem:[#allocation71_spill] sm:$0xff]  ;;  %v7523_v0 = vld [vmem:[#allocation72_spill] sm:$0xff] }
 0x4a2   :  { %2375 = vmatpush.bf16.msrb.mxu0 %v7513_v17  ;;  %2388 = vmatpush.bf16.msrb.mxu1 %v7514_v27  ;;  %v7524_v17 = vld [vmem:[#allocation73_spill] sm:$0xff]  ;;  %v7525_v27 = vld [vmem:[#allocation74_spill] sm:$0xff] }
 0x4a4   :  { %2401 = vmatpush.bf16.msrb.mxu2 %v7515_v23  ;;  %2414 = vmatpush.bf16.msrb.mxu3 %v7516_v54  ;;  %v7526_v23 = vld [vmem:[#allocation75_spill] sm:$0xff]  ;;  %v7527_v54 = vld [vmem:[#allocation76_spill] sm:$0xff] }
 0x4a6   :  { %2376 = vmatpush.bf16.msrb.mxu0 %v7517_v1  ;;  %2389 = vmatpush.bf16.msrb.mxu1 %v7518_v12  ;;  %v7528_v1 = vld [vmem:[#allocation79_spill] sm:$0xff] }
 0x4a8   :  { %2402 = vmatpush.bf16.msrb.mxu2 %v7519_v40  ;;  %2415 = vmatpush.bf16.msrb.mxu3 %v7520_v59 }
 0x4aa   :  { %2377 = vmatpush.bf16.msrb.mxu0 %v7521_v28  ;;  %2390 = vmatpush.bf16.msrb.mxu1 %v7522_v45 }
 0x4ac   :  { %2403 = vmatpush.bf16.msrb.mxu2 %v7523_v0  ;;  %2416 = vmatpush.bf16.msrb.mxu3 %v7524_v17 }
 0x4ad   :  { %v2035_v12 = vpop.f32.mrf.mxu0  ;;  %v2048_v40 = vpop.f32.mrf.mxu1 }
 0x4ae   :  { %2378 = vmatpush.bf16.msrb.mxu0 %v7525_v27  ;;  %2391 = vmatpush.bf16.msrb.mxu1 %v7526_v23  ;;  %v2049_v11 = vadd.f32 %v2048_v40, %v2035_v12 }
 0x4b0   :  { %2404 = vmatpush.bf16.msrb.mxu2 %v7527_v54  ;;  %2417 = vmatpush.bf16.msrb.mxu3 %v7528_v1 }
 0x4b4   :  { %v2061_v8 = vpop.f32.mrf.mxu2  ;;  %v2074_v59 = vpop.f32.mrf.mxu3 }
 0x4b5   :  { %v2037_v24 = vpop.f32.mrf.mxu0  ;;  %v2050_v28 = vpop.f32.mrf.mxu1  ;;  %v2075_v23 = vadd.f32 %v2074_v59, %v2061_v8 }
 0x4b7   :  { %v2242_v51 = vrot.slane %v2075_v23, 6 }
 0x4bc   :  { %v2063_v43 = vpop.f32.mrf.mxu2  ;;  %v2076_v45 = vpop.f32.mrf.mxu3 }
 0x4bd   :  { %v2087_v37 = vpop.f32.mrf.mxu0  ;;  %v2100_v0 = vpop.f32.mrf.mxu1  ;;  %v2248_v45 = vsel %vm1073_vm0, %v2049_v11, %v2242_v51 }
 0x4be   :  { %v2101_v20 = vadd.f32 %v2100_v0, %v2087_v37 }
 0x4c0   :  { %v2243_v53 = vrot.slane %v2101_v20, 4 }
 0x4c4   :  { %v2113_v4 = vpop.f32.mrf.mxu2  ;;  %v2126_v17 = vpop.f32.mrf.mxu3 }
 0x4c5   :  { %v2089_v38 = vpop.f32.mrf.mxu0  ;;  %v2102_v27 = vpop.f32.mrf.mxu1  ;;  %v2127_v10 = vadd.f32 %v2126_v17, %v2113_v4 }
 0x4c6   :  { %v4288_v38 = vld [vmem:[%s6735_s0 + $0x40] sm:$0xff] }
 0x4c7   :  { %v2244_v54 = vrot.slane %v2127_v10, 2 }
 0x4c9   :  { %v2249_v24 = vsel %vm1075_vm1, %v2243_v53, %v2244_v54 }
 0x4ca   :  { %v2250_v4 = vsel %vm1077_vm2, %v2248_v45, %v2249_v24 }
 0x4cb   :  { %v2256_v17 = vadd.f32 %v4288_v38, %v2250_v4 }
 0x4cc   :  { %v2115_v42 = vpop.f32.mrf.mxu2  ;;  %v2128_v1 = vpop.f32.mrf.mxu3 }
 0x4cd   :  { %v4290_v23 = vmul.f32 -1.442695, %v2256_v17 }
 0x4ce   :  { %v2139_v28 = vpop.f32.mrf.mxu0  ;;  %v2152_v43 = vpop.f32.mrf.mxu1 }
 0x4cf   :  { %4730 = vpow2.f32 %v4290_v23 }
 0x4d5   :  { %v4731_v53 = vpop.eup %4730 }
 0x4d6   :  { %v2141_v42 = vpop.f32.mrf.mxu0  ;;  %v2154_v27 = vpop.f32.mrf.mxu1  ;;  %v2264_v54 = vadd.f32 1.0, %v4731_v53 }
 0x4d7   :  { %v2165_v37 = vpop.f32.mrf.mxu2  ;;  %v2178_v10 = vpop.f32.mrf.mxu3  ;;  %v2153_v27 = vadd.f32 %v2152_v43, %v2139_v28 }
 0x4d8   :  { %4732 = vrcp.f32 %v2264_v54  ;;  %v2179_v40 = vadd.f32 %v2178_v10, %v2165_v37  ;;  %v2277_v43 = vand.u32 2147483648, %v2264_v54  ;;  %vm2271_vm10 = vweird.f32 %v2264_v54 }
 0x4da   :  { %v2245_v45 = vrot.slane %v2179_v40, 6 }
 0x4dc   :  { %v2251_v53 = vsel %vm1073_vm0, %v2153_v27, %v2245_v45  ;;  %v2278_v45 = vor.u32 1.1754944e-38, %v2277_v43 }
 0x4de   :  { %v4733_v51 = vpop.eup %4732 }
 0x4df   :  { %v2167_v20 = vpop.f32.mrf.mxu2  ;;  %v2180_v1 = vpop.f32.mrf.mxu3  ;;  %v2267_v0 = vmul.f32 %v4733_v51, %v2264_v54  ;;  %vm2272_vm9 = vweird.f32 %v4733_v51 }
 0x4e0   :  { %v4289_v1 = vld [vmem:[%s6735_s0 + $0x48] sm:$0xff]  ;;  %vm2273_vm11 = vmor %vm2271_vm10, %vm2272_vm9 }
 0x4e1   :  { %v2268_v20 = vsub.f32 1.0, %v2267_v0 }
 0x4ee   :  { %v2191_v8 = vpop.f32.mrf.mxu0  ;;  %v2204_v11 = vpop.f32.mrf.mxu1 }
 0x4ef   :  { %v2205_v12 = vadd.f32 %v2204_v11, %v2191_v8  ;;  %v2269_v11 = vmul.f32 %v4733_v51, %v2268_v20 }
 0x4f1   :  { %v2246_v17 = vrot.slane %v2205_v12, 4  ;;  %v2270_v28 = vadd.f32 %v4733_v51, %v2269_v11  ;;  %v2275_v12 = vand.u32 2147483647, %v2264_v54 }
 0x4f3   :  { %v2274_v0 = vsel %vm2273_vm11, %v4733_v51, %v2270_v28  ;;  %vm2276_vm12 = vcmp.eq.f32.partialorder %v2275_v12, 8.507059e+37 }
 0x4f6   :  { %v2217_v59 = vpop.f32.mrf.mxu2  ;;  %v2230_v24 = vpop.f32.mrf.mxu3 }
 0x4f7   :  { %v2231_v38 = vadd.f32 %v2230_v24, %v2217_v59  ;;  %v2193_v4 = vpop.f32.mrf.mxu0  ;;  %v2206_v42 = vpop.f32.mrf.mxu1 }
 0x4f8   :  { %v2279_v42 = vsel %vm2276_vm12, %v2278_v45, %v2274_v0 }
 0x4f9   :  { %v2247_v23 = vrot.slane %v2231_v38, 2 }
 0x4fb   :  { %v2252_v37 = vsel %vm1075_vm1, %v2246_v17, %v2247_v23  ;;  %v2298_v17 = vrot.slane %v2279_v42, 4 }
 0x4fc   :  { %v2253_v10 = vsel %vm1077_vm2, %v2251_v53, %v2252_v37 }
 0x4fd   :  { %v2257_v8 = vadd.f32 %v4289_v1, %v2253_v10  ;;  %v2300_v1 = vmul.f32 %v2298_v17, %v5951_v22  ;;  %v7532_v17 = vld [vmem:[#allocation121_spill] sm:$0xff] }
 0x4fe   :  { %v2219_v40 = vpop.f32.mrf.mxu2  ;;  %v2232_v59 = vpop.f32.mrf.mxu3 }
 0x4ff   :  { %v4291_v24 = vmul.f32 -1.442695, %v2257_v8 }
 0x501   :  { %4734 = vpow2.f32 %v4291_v24 }
 0x502   :  { %4736 = vtanh.f32 %v2257_v8 }
 0x507   :  { %v4735_v38 = vpop.eup %4734 }
 0x508   :  { %v2265_v4 = vadd.f32 1.0, %v4735_v38  ;;  %v4737_v27 = vpop.eup %4736 }
 0x509   :  { %v2301_v23 = vmul.f32 %v4737_v27, %v2279_v42  ;;  %v7530_v42 = vld [vmem:[#allocation119_spill] sm:$0xff]  ;;  %v7531_v27 = vld [vmem:[#allocation120_spill] sm:$0xff] }
 0x50a   :  { %4738 = vrcp.f32 %v2265_v4  ;;  %v2292_v54 = vand.u32 2147483648, %v2265_v4  ;;  %v2290_v51 = vand.u32 2147483647, %v2265_v4  ;;  %vm2286_vm14 = vweird.f32 %v2265_v4 }
 0x50b   :  { %v6115_v37 = vadd.f32 %v2301_v23, %v2300_v1  ;;  %v7533_v23 = vld [vmem:[#allocation122_spill] sm:$0xff]  ;;  %v7535_v1 = vld [vmem:[#allocation124_spill] sm:$0xff] }
 0x50c   :  { %v2293_v40 = vor.u32 1.1754944e-38, %v2292_v54  ;;  %vm2291_vm3 = vcmp.eq.f32.partialorder %v2290_v51, 8.507059e+37  ;;  %v7538_v54 = vld [vmem:[#allocation127_spill] sm:$0xff]  ;;  %v7540_v51 = vld [vmem:[#allocation129_spill] sm:$0xff] }
 0x50d   :  { %4740 = vtanh.f32 %v6115_v37 }
 0x510   :  { %v4739_v20 = vpop.eup %4738 }
 0x511   :  { %v2282_v53 = vmul.f32 %v4739_v20, %v2265_v4  ;;  %vm2287_vm13 = vweird.f32 %v4739_v20  ;;  %v7529_v4 = vld [vmem:[#allocation118_spill] sm:$0xff] }
 0x512   :  { %vm2288_vm15 = vmor %vm2286_vm14, %vm2287_vm13 }
 0x513   :  { %v2283_v10 = vsub.f32 1.0, %v2282_v53  ;;  %v4741_v43 = vpop.eup %4740  ;;  %v7536_v53 = vld [vmem:[#allocation125_spill] sm:$0xff] }
 0x515   :  { %v2284_v11 = vmul.f32 %v4739_v20, %v2283_v10  ;;  %v7537_v10 = vld [vmem:[#allocation126_spill] sm:$0xff] }
 0x517   :  { %v2285_v8 = vadd.f32 %v4739_v20, %v2284_v11  ;;  %v7539_v11 = vld [vmem:[#allocation128_spill] sm:$0xff] }
 0x519   :  { %v2289_v59 = vsel %vm2288_vm15, %v4739_v20, %v2285_v8  ;;  %v7534_v20 = vld [vmem:[#allocation123_spill] sm:$0xff]  ;;  %v7541_v8 = vld [vmem:[#allocation130_spill] sm:$0xff] }
 0x51a   :  { %v2294_v24 = vsel %vm2291_vm3, %v2293_v40, %v2289_v59  ;;  %v7542_v40 = vld [vmem:[#allocation131_spill] sm:$0xff]  ;;  %v7543_v59 = vld [vmem:[#allocation132_spill] sm:$0xff] }
 0x51b   :  { %v2305_v28 = vrot.slane %v2294_v24, 4  ;;  %v7544_v24 = vld [vmem:[#allocation133_spill] sm:$0xff] }
 0x51d   :  { %v2307_v22 = vmul.f32 %v4741_v43, %v2305_v28  ;;  %v7545_v28 = vld [vmem:[#allocation134_spill] sm:$0xff]  ;;  %v7546_v43 = vld [vmem:[#allocation135_spill] sm:$0xff] }
 0x51f   :  { %2312 = vst [vmem:[#allocation1] ss:$4 sm:$0xff] %v2307_v22  ;;  %v7547_v22 = vld [vmem:[#allocation136_spill] sm:$0xff] }
 0x526   :  { %v2313_v12 = vld.sshfl [vmem:[#allocation1] sm:$0xff pattern:$0x73625140]  ;;  %v2314_v0 = vld.sshfl [vmem:[#allocation1 + $0x8] sm:$0xff pattern:$0x73625140] }
 0x527   :  { %v6118_v38 = vpack.c.bf16 %v2313_v12, %v2313_v12  ;;  %v6120_v45 = vpack.c.bf16 %v2314_v0, %v2314_v0  ;;  %v7548_v12 = vld [vmem:[#allocation137_spill] sm:$0xff]  ;;  %v7549_v0 = vld [vmem:[#allocation138_spill] sm:$0xff] }
 0x529   :  { %2327 = vmatmul.bf16.vlgmr.msra.gmra.mxu0 %v6118_v38  ;;  %2340 = vmatmul.bf16.vlgmr.msra.gmra.mxu1 %v6120_v45 }
 0x52a   :  { %2353 = vmatmul.bf16.vlgmr.msra.gmra.mxu2 %v6118_v38  ;;  %2366 = vmatmul.bf16.vlgmr.msra.gmra.mxu3 %v6120_v45 }
 0x52b   :  { %2423 = vmatpush.bf16.msra.mxu0 %v7178_v39  ;;  %2436 = vmatpush.bf16.msra.mxu1 %v7179_v63 }
 0x52c   :  { %2449 = vmatpush.bf16.msra.mxu2 %v7180_v36  ;;  %2462 = vmatpush.bf16.msra.mxu3 %v7181_v13 }
 0x52f   :  { %2424 = vmatpush.bf16.msra.mxu0 %v7182_v15  ;;  %2437 = vmatpush.bf16.msra.mxu1 %v7183_v2 }
 0x530   :  { %2450 = vmatpush.bf16.msra.mxu2 %v7184_v26  ;;  %2463 = vmatpush.bf16.msra.mxu3 %v7185_v61 }
 0x533   :  { %2425 = vmatpush.bf16.msra.mxu0 %v7186_v60  ;;  %2438 = vmatpush.bf16.msra.mxu1 %v7187_v31 }
 0x534   :  { %2451 = vmatpush.bf16.msra.mxu2 %v7265_v44  ;;  %2464 = vmatpush.bf16.msra.mxu3 %v7266_v29 }
 0x537   :  { %2426 = vmatpush.bf16.msra.mxu0 %v7267_v62  ;;  %2439 = vmatpush.bf16.msra.mxu1 %v7268_v56 }
 0x538   :  { %2452 = vmatpush.bf16.msra.mxu2 %v7269_v57  ;;  %2465 = vmatpush.bf16.msra.mxu3 %v7270_v33 }
 0x539   :  { %2379 = vmatmul.bf16.vlgmr.msrb.gmra.mxu0 %v6118_v38  ;;  %2392 = vmatmul.bf16.vlgmr.msrb.gmra.mxu1 %v6120_v45 }
 0x53a   :  { %2405 = vmatmul.bf16.vlgmr.msrb.gmra.mxu2 %v6118_v38  ;;  %2418 = vmatmul.bf16.vlgmr.msrb.gmra.mxu3 %v6120_v45 }
 0x53b   :  { %2427 = vmatpush.bf16.msra.mxu0 %v7194_v35  ;;  %2440 = vmatpush.bf16.msra.mxu1 %v7195_v48 }
 0x53c   :  { %2453 = vmatpush.bf16.msra.mxu2 %v7196_v47  ;;  %2466 = vmatpush.bf16.msra.mxu3 %v7197_v41 }
 0x53f   :  { %2428 = vmatpush.bf16.msra.mxu0 %v7271_v5  ;;  %2441 = vmatpush.bf16.msra.mxu1 %v7272_v21 }
 0x540   :  { %2454 = vmatpush.bf16.msra.mxu2 %v7273_v34  ;;  %2467 = vmatpush.bf16.msra.mxu3 %v7274_v58 }
 0x543   :  { %2429 = vmatpush.bf16.msra.mxu0 %v7353_v16  ;;  %2442 = vmatpush.bf16.msra.mxu1 %v7276_v25 }
 0x544   :  { %2455 = vmatpush.bf16.msra.mxu2 %v7277_v6  ;;  %2468 = vmatpush.bf16.msra.mxu3 %v7278_v9 }
 0x547   :  { %2430 = vmatpush.bf16.msra.mxu0 %v7279_v55  ;;  %2443 = vmatpush.bf16.msra.mxu1 %v7354_v49 }
 0x548   :  { %2456 = vmatpush.bf16.msra.mxu2 %v7355_v7  ;;  %2469 = vmatpush.bf16.msra.mxu3 %v7356_v30 }
 0x54a   :  { %2431 = vmatmul.bf16.vlgmr.msra.gmra.mxu0 %v6118_v38  ;;  %2444 = vmatmul.bf16.vlgmr.msra.gmra.mxu1 %v6120_v45 }
 0x54b   :  { %2475 = vmatpush.bf16.msrb.mxu0 %v7357_v32  ;;  %2488 = vmatpush.bf16.msrb.mxu1 %v7358_v19 }
 0x54c   :  { %2501 = vmatpush.bf16.msrb.mxu2 %v7359_v18  ;;  %2514 = vmatpush.bf16.msrb.mxu3 %v7360_v3 }
 0x54d   :  { %2457 = vmatmul.bf16.vlgmr.msra.gmra.mxu2 %v6118_v38  ;;  %2470 = vmatmul.bf16.vlgmr.msra.gmra.mxu3 %v6120_v45 }
 0x54f   :  { %2476 = vmatpush.bf16.msrb.mxu0 %v7287_v50  ;;  %2489 = vmatpush.bf16.msrb.mxu1 %v7288_v14 }
 0x550   :  { %2502 = vmatpush.bf16.msrb.mxu2 %v7289_v46  ;;  %2515 = vmatpush.bf16.msrb.mxu3 %v7290_v52 }
 0x553   :  { %2477 = vmatpush.bf16.msrb.mxu0 %v7529_v4  ;;  %2490 = vmatpush.bf16.msrb.mxu1 %v7530_v42 }
 0x554   :  { %2503 = vmatpush.bf16.msrb.mxu2 %v7531_v27  ;;  %2516 = vmatpush.bf16.msrb.mxu3 %v7532_v17 }
 0x557   :  { %2478 = vmatpush.bf16.msrb.mxu0 %v7533_v23  ;;  %2491 = vmatpush.bf16.msrb.mxu1 %v7534_v20 }
 0x558   :  { %2504 = vmatpush.bf16.msrb.mxu2 %v7535_v1  ;;  %2517 = vmatpush.bf16.msrb.mxu3 %v7536_v53 }
 0x55b   :  { %2479 = vmatpush.bf16.msrb.mxu0 %v7537_v10  ;;  %2492 = vmatpush.bf16.msrb.mxu1 %v7538_v54 }
 0x55c   :  { %2505 = vmatpush.bf16.msrb.mxu2 %v7539_v11  ;;  %2518 = vmatpush.bf16.msrb.mxu3 %v7540_v51  ;;  %v7550_v11 = vld [vmem:[#allocation139_spill] sm:$0xff]  ;;  %v7551_v51 = vld [vmem:[#allocation140_spill] sm:$0xff] }
 0x55f   :  { %2480 = vmatpush.bf16.msrb.mxu0 %v7541_v8  ;;  %2493 = vmatpush.bf16.msrb.mxu1 %v7542_v40  ;;  %v7552_v8 = vld [vmem:[#allocation141_spill] sm:$0xff]  ;;  %v7553_v40 = vld [vmem:[#allocation14_spill] sm:$0xff] }
 0x560   :  { %2506 = vmatpush.bf16.msrb.mxu2 %v7543_v59  ;;  %2519 = vmatpush.bf16.msrb.mxu3 %v7544_v24  ;;  %v7554_v59 = vld [vmem:[#allocation15_spill] sm:$0xff] }
 0x563   :  { %2481 = vmatpush.bf16.msrb.mxu0 %v7545_v28  ;;  %2494 = vmatpush.bf16.msrb.mxu1 %v7546_v43  ;;  %v7563_v43 = vld [vmem:[#allocation24_spill] sm:$0xff] }
 0x564   :  { %2507 = vmatpush.bf16.msrb.mxu2 %v7547_v22  ;;  %2520 = vmatpush.bf16.msrb.mxu3 %v7548_v12  ;;  %v7555_v12 = vld [vmem:[#allocation16_spill] sm:$0xff]  ;;  %v7562_v22 = vld [vmem:[#allocation23_spill] sm:$0xff] }
 0x567   :  { %2482 = vmatpush.bf16.msrb.mxu0 %v7549_v0  ;;  %2495 = vmatpush.bf16.msrb.mxu1 %v7550_v11  ;;  %v7556_v0 = vld [vmem:[#allocation17_spill] sm:$0xff]  ;;  %v7557_v11 = vld [vmem:[#allocation18_spill] sm:$0xff] }
 0x568   :  { %2508 = vmatpush.bf16.msrb.mxu2 %v7551_v51  ;;  %2521 = vmatpush.bf16.msrb.mxu3 %v7552_v8  ;;  %v7558_v51 = vld [vmem:[#allocation19_spill] sm:$0xff]  ;;  %v7559_v8 = vld [vmem:[#allocation20_spill] sm:$0xff] }
 0x56a   :  { %2483 = vmatmul.bf16.vlgmr.msrb.gmra.mxu0 %v6118_v38  ;;  %2496 = vmatmul.bf16.vlgmr.msrb.gmra.mxu1 %v6120_v45 }
 0x56b   :  { %2612 = vmatpush.bf16.msra.mxu0 %v7553_v40  ;;  %2625 = vmatpush.bf16.msra.mxu1 %v7554_v59  ;;  %v7560_v40 = vld [vmem:[#allocation21_spill] sm:$0xff]  ;;  %v7561_v59 = vld [vmem:[#allocation22_spill] sm:$0xff] }
 0x56c   :  { %2509 = vmatmul.bf16.vlgmr.msrb.gmra.mxu2 %v6118_v38  ;;  %2522 = vmatmul.bf16.vlgmr.msrb.gmra.mxu3 %v6120_v45  ;;  %v7564_v38 = vld [vmem:[#allocation25_spill] sm:$0xff]  ;;  %v7565_v45 = vld [vmem:[#allocation26_spill] sm:$0xff] }
 0x56d   :  { %2638 = vmatpush.bf16.msra.mxu2 %v7555_v12  ;;  %2651 = vmatpush.bf16.msra.mxu3 %v7556_v0  ;;  %v7566_v12 = vld [vmem:[#allocation27_spill] sm:$0xff]  ;;  %v7567_v0 = vld [vmem:[#allocation28_spill] sm:$0xff] }
 0x56f   :  { %2613 = vmatpush.bf16.msra.mxu0 %v7557_v11  ;;  %2626 = vmatpush.bf16.msra.mxu1 %v7558_v51  ;;  %v7568_v11 = vld [vmem:[#allocation29_spill] sm:$0xff]  ;;  %v7569_v51 = vld [vmem:[#allocation30_spill] sm:$0xff] }
 0x571   :  { %2639 = vmatpush.bf16.msra.mxu2 %v7559_v8  ;;  %2652 = vmatpush.bf16.msra.mxu3 %v7560_v40  ;;  %v7570_v8 = vld [vmem:[#allocation31_spill] sm:$0xff]  ;;  %v7571_v40 = vld [vmem:[#allocation32_spill] sm:$0xff] }
 0x573   :  { %2614 = vmatpush.bf16.msra.mxu0 %v7561_v59  ;;  %2627 = vmatpush.bf16.msra.mxu1 %v7562_v22  ;;  %v7572_v59 = vld [vmem:[#allocation33_spill] sm:$0xff]  ;;  %v7573_v22 = vld [vmem:[#allocation34_spill] sm:$0xff] }
 0x575   :  { %2640 = vmatpush.bf16.msra.mxu2 %v7563_v43  ;;  %2653 = vmatpush.bf16.msra.mxu3 %v7564_v38  ;;  %v7574_v43 = vld [vmem:[#allocation35_spill] sm:$0xff]  ;;  %v7575_v38 = vld [vmem:[#allocation36_spill] sm:$0xff] }
 0x577   :  { %2615 = vmatpush.bf16.msra.mxu0 %v7565_v45  ;;  %2628 = vmatpush.bf16.msra.mxu1 %v7566_v12  ;;  %v7576_v45 = vld [vmem:[#allocation37_spill] sm:$0xff]  ;;  %v7577_v12 = vld [vmem:[#allocation38_spill] sm:$0xff] }
 0x579   :  { %2641 = vmatpush.bf16.msra.mxu2 %v7567_v0  ;;  %2654 = vmatpush.bf16.msra.mxu3 %v7568_v11  ;;  %v7578_v0 = vld [vmem:[#allocation39_spill] sm:$0xff]  ;;  %v7579_v11 = vld [vmem:[#allocation40_spill] sm:$0xff] }
 0x57b   :  { %2616 = vmatpush.bf16.msra.mxu0 %v7569_v51  ;;  %2629 = vmatpush.bf16.msra.mxu1 %v7570_v8  ;;  %v7580_v51 = vld [vmem:[#allocation41_spill] sm:$0xff]  ;;  %v7581_v8 = vld [vmem:[#allocation42_spill] sm:$0xff] }
 0x57d   :  { %2642 = vmatpush.bf16.msra.mxu2 %v7571_v40  ;;  %2655 = vmatpush.bf16.msra.mxu3 %v7572_v59  ;;  %v7582_v40 = vld [vmem:[#allocation43_spill] sm:$0xff]  ;;  %v7583_v59 = vld [vmem:[#allocation46_spill] sm:$0xff] }
 0x57f   :  { %2617 = vmatpush.bf16.msra.mxu0 %v7573_v22  ;;  %2630 = vmatpush.bf16.msra.mxu1 %v7574_v43  ;;  %v7584_v22 = vld [vmem:[#allocation47_spill] sm:$0xff]  ;;  %v7585_v43 = vld [vmem:[#allocation44_spill] sm:$0xff] }
 0x581   :  { %2643 = vmatpush.bf16.msra.mxu2 %v7575_v38  ;;  %2656 = vmatpush.bf16.msra.mxu3 %v7576_v45  ;;  %v7586_v38 = vld [vmem:[#allocation45_spill] sm:$0xff]  ;;  %v7587_v45 = vld [vmem:[#allocation48_spill] sm:$0xff] }
 0x583   :  { %2618 = vmatpush.bf16.msra.mxu0 %v7577_v12  ;;  %2631 = vmatpush.bf16.msra.mxu1 %v7578_v0  ;;  %v7588_v12 = vld [vmem:[#allocation49_spill] sm:$0xff]  ;;  %v7589_v0 = vld [vmem:[#allocation50_spill] sm:$0xff] }
 0x585   :  { %2644 = vmatpush.bf16.msra.mxu2 %v7579_v11  ;;  %2657 = vmatpush.bf16.msra.mxu3 %v7580_v51  ;;  %v7590_v11 = vld [vmem:[#allocation51_spill] sm:$0xff]  ;;  %v7591_v51 = vld [vmem:[#allocation52_spill] sm:$0xff] }
 0x587   :  { %2619 = vmatpush.bf16.msra.mxu0 %v7581_v8  ;;  %2632 = vmatpush.bf16.msra.mxu1 %v7582_v40  ;;  %v7592_v8 = vld [vmem:[#allocation53_spill] sm:$0xff]  ;;  %v7593_v40 = vld [vmem:[#allocation54_spill] sm:$0xff] }
 0x589   :  { %2645 = vmatpush.bf16.msra.mxu2 %v7585_v43  ;;  %2658 = vmatpush.bf16.msra.mxu3 %v7586_v38  ;;  %v7596_v43 = vld [vmem:[#allocation57_spill] sm:$0xff]  ;;  %v7597_v38 = vld [vmem:[#allocation58_spill] sm:$0xff] }
 0x58b   :  { %2664 = vmatpush.bf16.msrb.mxu0 %v7583_v59  ;;  %2677 = vmatpush.bf16.msrb.mxu1 %v7584_v22  ;;  %v7594_v59 = vld [vmem:[#allocation55_spill] sm:$0xff]  ;;  %v7595_v22 = vld [vmem:[#allocation56_spill] sm:$0xff] }
 0x58d   :  { %2690 = vmatpush.bf16.msrb.mxu2 %v7587_v45  ;;  %2703 = vmatpush.bf16.msrb.mxu3 %v7588_v12  ;;  %v7598_v45 = vld [vmem:[#allocation59_spill] sm:$0xff]  ;;  %v7599_v12 = vld [vmem:[#allocation60_spill] sm:$0xff] }
 0x58f   :  { %2665 = vmatpush.bf16.msrb.mxu0 %v7589_v0  ;;  %2678 = vmatpush.bf16.msrb.mxu1 %v7590_v11  ;;  %v7600_v0 = vld [vmem:[#allocation61_spill] sm:$0xff]  ;;  %v7601_v11 = vld [vmem:[#allocation62_spill] sm:$0xff] }
 0x591   :  { %2691 = vmatpush.bf16.msrb.mxu2 %v7591_v51  ;;  %2704 = vmatpush.bf16.msrb.mxu3 %v7592_v8  ;;  %v7602_v51 = vld [vmem:[#allocation63_spill] sm:$0xff]  ;;  %v7603_v8 = vld [vmem:[#allocation64_spill] sm:$0xff] }
 0x593   :  { %2666 = vmatpush.bf16.msrb.mxu0 %v7593_v40  ;;  %2679 = vmatpush.bf16.msrb.mxu1 %v7594_v59  ;;  %v7604_v40 = vld [vmem:[#allocation65_spill] sm:$0xff]  ;;  %v7605_v59 = vld [vmem:[#allocation66_spill] sm:$0xff] }
 0x595   :  { %2692 = vmatpush.bf16.msrb.mxu2 %v7595_v22  ;;  %2705 = vmatpush.bf16.msrb.mxu3 %v7596_v43  ;;  %v7606_v22 = vld [vmem:[#allocation67_spill] sm:$0xff]  ;;  %v7607_v43 = vld [vmem:[#allocation68_spill] sm:$0xff] }
 0x597   :  { %2667 = vmatpush.bf16.msrb.mxu0 %v7597_v38  ;;  %2680 = vmatpush.bf16.msrb.mxu1 %v7598_v45  ;;  %v7608_v38 = vld [vmem:[#allocation69_spill] sm:$0xff]  ;;  %v7609_v45 = vld [vmem:[#allocation70_spill] sm:$0xff] }
 0x599   :  { %2693 = vmatpush.bf16.msrb.mxu2 %v7599_v12  ;;  %2706 = vmatpush.bf16.msrb.mxu3 %v7600_v0  ;;  %v7610_v12 = vld [vmem:[#allocation71_spill] sm:$0xff]  ;;  %v7611_v0 = vld [vmem:[#allocation72_spill] sm:$0xff] }
 0x59b   :  { %2668 = vmatpush.bf16.msrb.mxu0 %v7601_v11  ;;  %2681 = vmatpush.bf16.msrb.mxu1 %v7602_v51  ;;  %v7612_v11 = vld [vmem:[#allocation73_spill] sm:$0xff]  ;;  %v7613_v51 = vld [vmem:[#allocation74_spill] sm:$0xff] }
 0x59d   :  { %2694 = vmatpush.bf16.msrb.mxu2 %v7603_v8  ;;  %2707 = vmatpush.bf16.msrb.mxu3 %v7604_v40  ;;  %v7614_v8 = vld [vmem:[#allocation75_spill] sm:$0xff]  ;;  %v7615_v40 = vld [vmem:[#allocation76_spill] sm:$0xff] }
 0x59f   :  { %2669 = vmatpush.bf16.msrb.mxu0 %v7605_v59  ;;  %2682 = vmatpush.bf16.msrb.mxu1 %v7606_v22  ;;  %v7616_v59 = vld [vmem:[#allocation79_spill] sm:$0xff] }
 0x5a1   :  { %2695 = vmatpush.bf16.msrb.mxu2 %v7607_v43  ;;  %2708 = vmatpush.bf16.msrb.mxu3 %v7608_v38 }
 0x5a3   :  { %2670 = vmatpush.bf16.msrb.mxu0 %v7609_v45  ;;  %2683 = vmatpush.bf16.msrb.mxu1 %v7610_v12 }
 0x5a5   :  { %2696 = vmatpush.bf16.msrb.mxu2 %v7611_v0  ;;  %2709 = vmatpush.bf16.msrb.mxu3 %v7612_v11 }
 0x5a6   :  { %v2328_v22 = vpop.f32.mrf.mxu0  ;;  %v2341_v43 = vpop.f32.mrf.mxu1 }
 0x5a7   :  { %2671 = vmatpush.bf16.msrb.mxu0 %v7613_v51  ;;  %2684 = vmatpush.bf16.msrb.mxu1 %v7614_v8  ;;  %v2342_v4 = vadd.f32 %v2341_v43, %v2328_v22 }
 0x5a9   :  { %2697 = vmatpush.bf16.msrb.mxu2 %v7615_v40  ;;  %2710 = vmatpush.bf16.msrb.mxu3 %v7616_v59 }
 0x5ad   :  { %v2354_v28 = vpop.f32.mrf.mxu2  ;;  %v2367_v38 = vpop.f32.mrf.mxu3 }
 0x5ae   :  { %v2330_v24 = vpop.f32.mrf.mxu0  ;;  %v2343_v45 = vpop.f32.mrf.mxu1  ;;  %v2368_v8 = vadd.f32 %v2367_v38, %v2354_v28 }
 0x5b0   :  { %v2535_v27 = vrot.slane %v2368_v8, 6 }
 0x5b5   :  { %v2356_v54 = vpop.f32.mrf.mxu2  ;;  %v2369_v12 = vpop.f32.mrf.mxu3 }
 0x5b6   :  { %v2380_v10 = vpop.f32.mrf.mxu0  ;;  %v2393_v0 = vpop.f32.mrf.mxu1  ;;  %v2541_v12 = vsel %vm1073_vm0, %v2342_v4, %v2535_v27 }
 0x5b7   :  { %v2394_v23 = vadd.f32 %v2393_v0, %v2380_v10 }
 0x5b9   :  { %v2536_v42 = vrot.slane %v2394_v23, 4 }
 0x5bd   :  { %v2406_v53 = vpop.f32.mrf.mxu2  ;;  %v2419_v11 = vpop.f32.mrf.mxu3 }
 0x5be   :  { %v2382_v1 = vpop.f32.mrf.mxu0  ;;  %v2395_v51 = vpop.f32.mrf.mxu1  ;;  %v2420_v20 = vadd.f32 %v2419_v11, %v2406_v53 }
 0x5bf   :  { %v4292_v1 = vld [vmem:[%s6735_s0 + $0x50] sm:$0xff] }
 0x5c0   :  { %v2537_v40 = vrot.slane %v2420_v20, 2 }
 0x5c2   :  { %v2542_v24 = vsel %vm1075_vm1, %v2536_v42, %v2537_v40 }
 0x5c3   :  { %v2543_v53 = vsel %vm1077_vm2, %v2541_v12, %v2542_v24 }
 0x5c4   :  { %v2549_v11 = vadd.f32 %v4292_v1, %v2543_v53 }
 0x5c5   :  { %v2408_v17 = vpop.f32.mrf.mxu2  ;;  %v2421_v59 = vpop.f32.mrf.mxu3 }
 0x5c6   :  { %v4294_v8 = vmul.f32 -1.442695, %v2549_v11 }
 0x5c7   :  { %v2432_v45 = vpop.f32.mrf.mxu0  ;;  %v2445_v54 = vpop.f32.mrf.mxu1 }
 0x5c8   :  { %4742 = vpow2.f32 %v4294_v8 }
 0x5ce   :  { %v4743_v42 = vpop.eup %4742 }
 0x5cf   :  { %v2434_v17 = vpop.f32.mrf.mxu0  ;;  %v2447_v51 = vpop.f32.mrf.mxu1  ;;  %v2557_v40 = vadd.f32 1.0, %v4743_v42 }
 0x5d0   :  { %v2458_v10 = vpop.f32.mrf.mxu2  ;;  %v2471_v20 = vpop.f32.mrf.mxu3  ;;  %v2446_v51 = vadd.f32 %v2445_v54, %v2432_v45 }
 0x5d1   :  { %4744 = vrcp.f32 %v2557_v40  ;;  %v2472_v43 = vadd.f32 %v2471_v20, %v2458_v10  ;;  %v2570_v54 = vand.u32 2147483648, %v2557_v40  ;;  %vm2564_vm5 = vweird.f32 %v2557_v40 }
 0x5d3   :  { %v2538_v12 = vrot.slane %v2472_v43, 6 }
 0x5d5   :  { %v2544_v42 = vsel %vm1073_vm0, %v2446_v51, %v2538_v12  ;;  %v2571_v12 = vor.u32 1.1754944e-38, %v2570_v54 }
 0x5d7   :  { %v4745_v27 = vpop.eup %4744 }
 0x5d8   :  { %v2460_v23 = vpop.f32.mrf.mxu2  ;;  %v2473_v59 = vpop.f32.mrf.mxu3  ;;  %v2560_v0 = vmul.f32 %v4745_v27, %v2557_v40  ;;  %vm2565_vm4 = vweird.f32 %v4745_v27 }
 0x5d9   :  { %v4293_v59 = vld [vmem:[%s6735_s0 + $0x58] sm:$0xff]  ;;  %vm2566_vm6 = vmor %vm2564_vm5, %vm2565_vm4 }
 0x5da   :  { %v2561_v23 = vsub.f32 1.0, %v2560_v0 }
 0x5e7   :  { %v2484_v28 = vpop.f32.mrf.mxu0  ;;  %v2497_v4 = vpop.f32.mrf.mxu1 }
 0x5e8   :  { %v2498_v22 = vadd.f32 %v2497_v4, %v2484_v28  ;;  %v2562_v4 = vmul.f32 %v4745_v27, %v2561_v23 }
 0x5ea   :  { %v2539_v11 = vrot.slane %v2498_v22, 4  ;;  %v2563_v45 = vadd.f32 %v4745_v27, %v2562_v4  ;;  %v2568_v22 = vand.u32 2147483647, %v2557_v40 }
 0x5ec   :  { %v2567_v0 = vsel %vm2566_vm6, %v4745_v27, %v2563_v45  ;;  %vm2569_vm7 = vcmp.eq.f32.partialorder %v2568_v22, 8.507059e+37 }
 0x5ef   :  { %v2510_v38 = vpop.f32.mrf.mxu2  ;;  %v2523_v24 = vpop.f32.mrf.mxu3 }
 0x5f0   :  { %v2524_v1 = vadd.f32 %v2523_v24, %v2510_v38  ;;  %v2486_v53 = vpop.f32.mrf.mxu0  ;;  %v2499_v17 = vpop.f32.mrf.mxu1 }
 0x5f1   :  { %v2572_v17 = vsel %vm2569_vm7, %v2571_v12, %v2567_v0 }
 0x5f2   :  { %v2540_v8 = vrot.slane %v2524_v1, 2 }
 0x5f4   :  { %v2545_v10 = vsel %vm1075_vm1, %v2539_v11, %v2540_v8  ;;  %v2591_v11 = vrot.slane %v2572_v17, 4 }
 0x5f5   :  { %v2546_v20 = vsel %vm1077_vm2, %v2544_v42, %v2545_v10 }
 0x5f6   :  { %v2550_v28 = vadd.f32 %v4293_v59, %v2546_v20  ;;  %v2593_v59 = vmul.f32 %v2591_v11, %v6115_v37  ;;  %v7620_v11 = vld [vmem:[#allocation121_spill] sm:$0xff] }
 0x5f7   :  { %v2512_v43 = vpop.f32.mrf.mxu2  ;;  %v2525_v38 = vpop.f32.mrf.mxu3 }
 0x5f8   :  { %v4295_v24 = vmul.f32 -1.442695, %v2550_v28 }
 0x5fa   :  { %4746 = vpow2.f32 %v4295_v24 }
 0x5fb   :  { %4748 = vtanh.f32 %v2550_v28 }
 0x600   :  { %v4747_v1 = vpop.eup %4746 }
 0x601   :  { %v2558_v53 = vadd.f32 1.0, %v4747_v1  ;;  %v4749_v51 = vpop.eup %4748 }
 0x602   :  { %v2594_v8 = vmul.f32 %v4749_v51, %v2572_v17  ;;  %v7618_v17 = vld [vmem:[#allocation119_spill] sm:$0xff]  ;;  %v7619_v51 = vld [vmem:[#allocation120_spill] sm:$0xff] }
 0x603   :  { %4750 = vrcp.f32 %v2558_v53  ;;  %v2585_v40 = vand.u32 2147483648, %v2558_v53  ;;  %v2583_v27 = vand.u32 2147483647, %v2558_v53  ;;  %vm2579_vm9 = vweird.f32 %v2558_v53 }
 0x604   :  { %v6279_v10 = vadd.f32 %v2594_v8, %v2593_v59  ;;  %v7621_v8 = vld [vmem:[#allocation122_spill] sm:$0xff]  ;;  %v7623_v59 = vld [vmem:[#allocation124_spill] sm:$0xff] }
 0x605   :  { %v2586_v43 = vor.u32 1.1754944e-38, %v2585_v40  ;;  %vm2584_vm11 = vcmp.eq.f32.partialorder %v2583_v27, 8.507059e+37  ;;  %v7626_v40 = vld [vmem:[#allocation127_spill] sm:$0xff]  ;;  %v7628_v27 = vld [vmem:[#allocation129_spill] sm:$0xff] }
 0x606   :  { %4752 = vtanh.f32 %v6279_v10 }
 0x609   :  { %v4751_v23 = vpop.eup %4750 }
 0x60a   :  { %v2575_v42 = vmul.f32 %v4751_v23, %v2558_v53  ;;  %vm2580_vm8 = vweird.f32 %v4751_v23  ;;  %v7617_v53 = vld [vmem:[#allocation118_spill] sm:$0xff] }
 0x60b   :  { %vm2581_vm10 = vmor %vm2579_vm9, %vm2580_vm8 }
 0x60c   :  { %v2576_v20 = vsub.f32 1.0, %v2575_v42  ;;  %v4753_v54 = vpop.eup %4752  ;;  %v7624_v42 = vld [vmem:[#allocation125_spill] sm:$0xff] }
 0x60e   :  { %v2577_v4 = vmul.f32 %v4751_v23, %v2576_v20  ;;  %v7625_v20 = vld [vmem:[#allocation126_spill] sm:$0xff] }
 0x610   :  { %v2578_v28 = vadd.f32 %v4751_v23, %v2577_v4  ;;  %v7627_v4 = vld [vmem:[#allocation128_spill] sm:$0xff] }
 0x612   :  { %v2582_v38 = vsel %vm2581_vm10, %v4751_v23, %v2578_v28  ;;  %v7622_v23 = vld [vmem:[#allocation123_spill] sm:$0xff]  ;;  %v7629_v28 = vld [vmem:[#allocation130_spill] sm:$0xff] }
 0x613   :  { %v2587_v24 = vsel %vm2584_vm11, %v2586_v43, %v2582_v38  ;;  %v7630_v43 = vld [vmem:[#allocation131_spill] sm:$0xff]  ;;  %v7631_v38 = vld [vmem:[#allocation132_spill] sm:$0xff] }
 0x614   :  { %v2598_v45 = vrot.slane %v2587_v24, 4  ;;  %v7632_v24 = vld [vmem:[#allocation133_spill] sm:$0xff] }
 0x616   :  { %v2600_v37 = vmul.f32 %v4753_v54, %v2598_v45  ;;  %v7633_v45 = vld [vmem:[#allocation134_spill] sm:$0xff]  ;;  %v7634_v54 = vld [vmem:[#allocation135_spill] sm:$0xff] }
 0x618   :  { %2605 = vst [vmem:[#allocation1] ss:$4 sm:$0xff] %v2600_v37  ;;  %v7635_v37 = vld [vmem:[#allocation136_spill] sm:$0xff] }
 0x61f   :  { %v2606_v22 = vld.sshfl [vmem:[#allocation1] sm:$0xff pattern:$0x73625140]  ;;  %v2607_v0 = vld.sshfl [vmem:[#allocation1 + $0x8] sm:$0xff pattern:$0x73625140] }
 0x620   :  { %v6282_v1 = vpack.c.bf16 %v2606_v22, %v2606_v22  ;;  %v6284_v12 = vpack.c.bf16 %v2607_v0, %v2607_v0  ;;  %v7636_v22 = vld [vmem:[#allocation137_spill] sm:$0xff]  ;;  %v7637_v0 = vld [vmem:[#allocation138_spill] sm:$0xff] }
 0x622   :  { %2620 = vmatmul.bf16.vlgmr.msra.gmra.mxu0 %v6282_v1  ;;  %2633 = vmatmul.bf16.vlgmr.msra.gmra.mxu1 %v6284_v12 }
 0x623   :  { %2646 = vmatmul.bf16.vlgmr.msra.gmra.mxu2 %v6282_v1  ;;  %2659 = vmatmul.bf16.vlgmr.msra.gmra.mxu3 %v6284_v12 }
 0x624   :  { %2716 = vmatpush.bf16.msra.mxu0 %v7178_v39  ;;  %2729 = vmatpush.bf16.msra.mxu1 %v7179_v63 }
 0x625   :  { %2742 = vmatpush.bf16.msra.mxu2 %v7180_v36  ;;  %2755 = vmatpush.bf16.msra.mxu3 %v7181_v13 }
 0x628   :  { %2717 = vmatpush.bf16.msra.mxu0 %v7182_v15  ;;  %2730 = vmatpush.bf16.msra.mxu1 %v7183_v2 }
 0x629   :  { %2743 = vmatpush.bf16.msra.mxu2 %v7184_v26  ;;  %2756 = vmatpush.bf16.msra.mxu3 %v7185_v61 }
 0x62c   :  { %2718 = vmatpush.bf16.msra.mxu0 %v7186_v60  ;;  %2731 = vmatpush.bf16.msra.mxu1 %v7187_v31 }
 0x62d   :  { %2744 = vmatpush.bf16.msra.mxu2 %v7265_v44  ;;  %2757 = vmatpush.bf16.msra.mxu3 %v7266_v29 }
 0x630   :  { %2719 = vmatpush.bf16.msra.mxu0 %v7267_v62  ;;  %2732 = vmatpush.bf16.msra.mxu1 %v7268_v56 }
 0x631   :  { %2745 = vmatpush.bf16.msra.mxu2 %v7269_v57  ;;  %2758 = vmatpush.bf16.msra.mxu3 %v7270_v33 }
 0x632   :  { %2672 = vmatmul.bf16.vlgmr.msrb.gmra.mxu0 %v6282_v1  ;;  %2685 = vmatmul.bf16.vlgmr.msrb.gmra.mxu1 %v6284_v12 }
 0x633   :  { %2698 = vmatmul.bf16.vlgmr.msrb.gmra.mxu2 %v6282_v1  ;;  %2711 = vmatmul.bf16.vlgmr.msrb.gmra.mxu3 %v6284_v12 }
 0x634   :  { %2720 = vmatpush.bf16.msra.mxu0 %v7194_v35  ;;  %2733 = vmatpush.bf16.msra.mxu1 %v7195_v48 }
 0x635   :  { %2746 = vmatpush.bf16.msra.mxu2 %v7196_v47  ;;  %2759 = vmatpush.bf16.msra.mxu3 %v7197_v41 }
 0x638   :  { %2721 = vmatpush.bf16.msra.mxu0 %v7271_v5  ;;  %2734 = vmatpush.bf16.msra.mxu1 %v7272_v21 }
 0x639   :  { %2747 = vmatpush.bf16.msra.mxu2 %v7273_v34  ;;  %2760 = vmatpush.bf16.msra.mxu3 %v7274_v58 }
 0x63c   :  { %2722 = vmatpush.bf16.msra.mxu0 %v7353_v16  ;;  %2735 = vmatpush.bf16.msra.mxu1 %v7276_v25 }
 0x63d   :  { %2748 = vmatpush.bf16.msra.mxu2 %v7277_v6  ;;  %2761 = vmatpush.bf16.msra.mxu3 %v7278_v9 }
 0x640   :  { %2723 = vmatpush.bf16.msra.mxu0 %v7279_v55  ;;  %2736 = vmatpush.bf16.msra.mxu1 %v7354_v49 }
 0x641   :  { %2749 = vmatpush.bf16.msra.mxu2 %v7355_v7  ;;  %2762 = vmatpush.bf16.msra.mxu3 %v7356_v30 }
 0x643   :  { %2724 = vmatmul.bf16.vlgmr.msra.gmra.mxu0 %v6282_v1  ;;  %2737 = vmatmul.bf16.vlgmr.msra.gmra.mxu1 %v6284_v12 }
 0x644   :  { %2768 = vmatpush.bf16.msrb.mxu0 %v7357_v32  ;;  %2781 = vmatpush.bf16.msrb.mxu1 %v7358_v19 }
 0x645   :  { %2794 = vmatpush.bf16.msrb.mxu2 %v7359_v18  ;;  %2807 = vmatpush.bf16.msrb.mxu3 %v7360_v3 }
 0x646   :  { %2750 = vmatmul.bf16.vlgmr.msra.gmra.mxu2 %v6282_v1  ;;  %2763 = vmatmul.bf16.vlgmr.msra.gmra.mxu3 %v6284_v12 }
 0x648   :  { %2769 = vmatpush.bf16.msrb.mxu0 %v7287_v50  ;;  %2782 = vmatpush.bf16.msrb.mxu1 %v7288_v14 }
 0x649   :  { %2795 = vmatpush.bf16.msrb.mxu2 %v7289_v46  ;;  %2808 = vmatpush.bf16.msrb.mxu3 %v7290_v52 }
 0x64c   :  { %2770 = vmatpush.bf16.msrb.mxu0 %v7617_v53  ;;  %2783 = vmatpush.bf16.msrb.mxu1 %v7618_v17 }
 0x64d   :  { %2796 = vmatpush.bf16.msrb.mxu2 %v7619_v51  ;;  %2809 = vmatpush.bf16.msrb.mxu3 %v7620_v11 }
 0x650   :  { %2771 = vmatpush.bf16.msrb.mxu0 %v7621_v8  ;;  %2784 = vmatpush.bf16.msrb.mxu1 %v7622_v23 }
 0x651   :  { %2797 = vmatpush.bf16.msrb.mxu2 %v7623_v59  ;;  %2810 = vmatpush.bf16.msrb.mxu3 %v7624_v42 }
 0x654   :  { %2772 = vmatpush.bf16.msrb.mxu0 %v7625_v20  ;;  %2785 = vmatpush.bf16.msrb.mxu1 %v7626_v40 }
 0x655   :  { %2798 = vmatpush.bf16.msrb.mxu2 %v7627_v4  ;;  %2811 = vmatpush.bf16.msrb.mxu3 %v7628_v27  ;;  %v7638_v4 = vld [vmem:[#allocation139_spill] sm:$0xff]  ;;  %v7639_v27 = vld [vmem:[#allocation140_spill] sm:$0xff] }
 0x658   :  { %2773 = vmatpush.bf16.msrb.mxu0 %v7629_v28  ;;  %2786 = vmatpush.bf16.msrb.mxu1 %v7630_v43  ;;  %v7640_v28 = vld [vmem:[#allocation141_spill] sm:$0xff]  ;;  %v7641_v43 = vld [vmem:[#allocation14_spill] sm:$0xff] }
 0x659   :  { %2799 = vmatpush.bf16.msrb.mxu2 %v7631_v38  ;;  %2812 = vmatpush.bf16.msrb.mxu3 %v7632_v24  ;;  %v7642_v38 = vld [vmem:[#allocation15_spill] sm:$0xff] }
 0x65c   :  { %2774 = vmatpush.bf16.msrb.mxu0 %v7633_v45  ;;  %2787 = vmatpush.bf16.msrb.mxu1 %v7634_v54  ;;  %v7651_v54 = vld [vmem:[#allocation24_spill] sm:$0xff] }
 0x65d   :  { %2800 = vmatpush.bf16.msrb.mxu2 %v7635_v37  ;;  %2813 = vmatpush.bf16.msrb.mxu3 %v7636_v22  ;;  %v7643_v22 = vld [vmem:[#allocation16_spill] sm:$0xff]  ;;  %v7650_v37 = vld [vmem:[#allocation23_spill] sm:$0xff] }
 0x660   :  { %2775 = vmatpush.bf16.msrb.mxu0 %v7637_v0  ;;  %2788 = vmatpush.bf16.msrb.mxu1 %v7638_v4  ;;  %v7644_v0 = vld [vmem:[#allocation17_spill] sm:$0xff]  ;;  %v7645_v4 = vld [vmem:[#allocation18_spill] sm:$0xff] }
 0x661   :  { %2801 = vmatpush.bf16.msrb.mxu2 %v7639_v27  ;;  %2814 = vmatpush.bf16.msrb.mxu3 %v7640_v28  ;;  %v7646_v27 = vld [vmem:[#allocation19_spill] sm:$0xff]  ;;  %v7647_v28 = vld [vmem:[#allocation20_spill] sm:$0xff] }
 0x663   :  { %2776 = vmatmul.bf16.vlgmr.msrb.gmra.mxu0 %v6282_v1  ;;  %2789 = vmatmul.bf16.vlgmr.msrb.gmra.mxu1 %v6284_v12 }
 0x664   :  { %2905 = vmatpush.bf16.msra.mxu0 %v7641_v43  ;;  %2918 = vmatpush.bf16.msra.mxu1 %v7642_v38  ;;  %v7648_v43 = vld [vmem:[#allocation21_spill] sm:$0xff]  ;;  %v7649_v38 = vld [vmem:[#allocation22_spill] sm:$0xff] }
 0x665   :  { %2802 = vmatmul.bf16.vlgmr.msrb.gmra.mxu2 %v6282_v1  ;;  %2815 = vmatmul.bf16.vlgmr.msrb.gmra.mxu3 %v6284_v12  ;;  %v7652_v1 = vld [vmem:[#allocation25_spill] sm:$0xff]  ;;  %v7653_v12 = vld [vmem:[#allocation26_spill] sm:$0xff] }
 0x666   :  { %2931 = vmatpush.bf16.msra.mxu2 %v7643_v22  ;;  %2944 = vmatpush.bf16.msra.mxu3 %v7644_v0  ;;  %v7654_v22 = vld [vmem:[#allocation27_spill] sm:$0xff]  ;;  %v7655_v0 = vld [vmem:[#allocation28_spill] sm:$0xff] }
 0x668   :  { %2906 = vmatpush.bf16.msra.mxu0 %v7645_v4  ;;  %2919 = vmatpush.bf16.msra.mxu1 %v7646_v27  ;;  %v7656_v4 = vld [vmem:[#allocation29_spill] sm:$0xff]  ;;  %v7657_v27 = vld [vmem:[#allocation30_spill] sm:$0xff] }
 0x66a   :  { %2932 = vmatpush.bf16.msra.mxu2 %v7647_v28  ;;  %2945 = vmatpush.bf16.msra.mxu3 %v7648_v43  ;;  %v7658_v28 = vld [vmem:[#allocation31_spill] sm:$0xff]  ;;  %v7659_v43 = vld [vmem:[#allocation32_spill] sm:$0xff] }
 0x66c   :  { %2907 = vmatpush.bf16.msra.mxu0 %v7649_v38  ;;  %2920 = vmatpush.bf16.msra.mxu1 %v7650_v37  ;;  %v7660_v38 = vld [vmem:[#allocation33_spill] sm:$0xff]  ;;  %v7661_v37 = vld [vmem:[#allocation34_spill] sm:$0xff] }
 0x66e   :  { %2933 = vmatpush.bf16.msra.mxu2 %v7651_v54  ;;  %2946 = vmatpush.bf16.msra.mxu3 %v7652_v1  ;;  %v7662_v54 = vld [vmem:[#allocation35_spill] sm:$0xff]  ;;  %v7663_v1 = vld [vmem:[#allocation36_spill] sm:$0xff] }
 0x670   :  { %2908 = vmatpush.bf16.msra.mxu0 %v7653_v12  ;;  %2921 = vmatpush.bf16.msra.mxu1 %v7654_v22  ;;  %v7664_v12 = vld [vmem:[#allocation37_spill] sm:$0xff]  ;;  %v7665_v22 = vld [vmem:[#allocation38_spill] sm:$0xff] }
 0x672   :  { %2934 = vmatpush.bf16.msra.mxu2 %v7655_v0  ;;  %2947 = vmatpush.bf16.msra.mxu3 %v7656_v4  ;;  %v7666_v0 = vld [vmem:[#allocation39_spill] sm:$0xff]  ;;  %v7667_v4 = vld [vmem:[#allocation40_spill] sm:$0xff] }
 0x674   :  { %2909 = vmatpush.bf16.msra.mxu0 %v7657_v27  ;;  %2922 = vmatpush.bf16.msra.mxu1 %v7658_v28  ;;  %v7668_v27 = vld [vmem:[#allocation41_spill] sm:$0xff]  ;;  %v7669_v28 = vld [vmem:[#allocation42_spill] sm:$0xff] }
 0x676   :  { %2935 = vmatpush.bf16.msra.mxu2 %v7659_v43  ;;  %2948 = vmatpush.bf16.msra.mxu3 %v7660_v38  ;;  %v7670_v43 = vld [vmem:[#allocation43_spill] sm:$0xff]  ;;  %v7671_v38 = vld [vmem:[#allocation46_spill] sm:$0xff] }
 0x678   :  { %2910 = vmatpush.bf16.msra.mxu0 %v7661_v37  ;;  %2923 = vmatpush.bf16.msra.mxu1 %v7662_v54  ;;  %v7672_v37 = vld [vmem:[#allocation47_spill] sm:$0xff]  ;;  %v7673_v54 = vld [vmem:[#allocation44_spill] sm:$0xff] }
 0x67a   :  { %2936 = vmatpush.bf16.msra.mxu2 %v7663_v1  ;;  %2949 = vmatpush.bf16.msra.mxu3 %v7664_v12  ;;  %v7674_v1 = vld [vmem:[#allocation45_spill] sm:$0xff]  ;;  %v7675_v12 = vld [vmem:[#allocation48_spill] sm:$0xff] }
 0x67c   :  { %2911 = vmatpush.bf16.msra.mxu0 %v7665_v22  ;;  %2924 = vmatpush.bf16.msra.mxu1 %v7666_v0  ;;  %v7676_v22 = vld [vmem:[#allocation49_spill] sm:$0xff]  ;;  %v7677_v0 = vld [vmem:[#allocation50_spill] sm:$0xff] }
 0x67e   :  { %2937 = vmatpush.bf16.msra.mxu2 %v7667_v4  ;;  %2950 = vmatpush.bf16.msra.mxu3 %v7668_v27  ;;  %v7678_v4 = vld [vmem:[#allocation51_spill] sm:$0xff]  ;;  %v7679_v27 = vld [vmem:[#allocation52_spill] sm:$0xff] }
 0x680   :  { %2912 = vmatpush.bf16.msra.mxu0 %v7669_v28  ;;  %2925 = vmatpush.bf16.msra.mxu1 %v7670_v43  ;;  %v7680_v28 = vld [vmem:[#allocation53_spill] sm:$0xff]  ;;  %v7681_v43 = vld [vmem:[#allocation54_spill] sm:$0xff] }
 0x682   :  { %2938 = vmatpush.bf16.msra.mxu2 %v7673_v54  ;;  %2951 = vmatpush.bf16.msra.mxu3 %v7674_v1  ;;  %v7684_v54 = vld [vmem:[#allocation57_spill] sm:$0xff]  ;;  %v7685_v1 = vld [vmem:[#allocation58_spill] sm:$0xff] }
 0x684   :  { %2957 = vmatpush.bf16.msrb.mxu0 %v7671_v38  ;;  %2970 = vmatpush.bf16.msrb.mxu1 %v7672_v37  ;;  %v7682_v38 = vld [vmem:[#allocation55_spill] sm:$0xff]  ;;  %v7683_v37 = vld [vmem:[#allocation56_spill] sm:$0xff] }
 0x686   :  { %2983 = vmatpush.bf16.msrb.mxu2 %v7675_v12  ;;  %2996 = vmatpush.bf16.msrb.mxu3 %v7676_v22  ;;  %v7686_v12 = vld [vmem:[#allocation59_spill] sm:$0xff]  ;;  %v7687_v22 = vld [vmem:[#allocation60_spill] sm:$0xff] }
 0x688   :  { %2958 = vmatpush.bf16.msrb.mxu0 %v7677_v0  ;;  %2971 = vmatpush.bf16.msrb.mxu1 %v7678_v4  ;;  %v7688_v0 = vld [vmem:[#allocation61_spill] sm:$0xff]  ;;  %v7689_v4 = vld [vmem:[#allocation62_spill] sm:$0xff] }
 0x68a   :  { %2984 = vmatpush.bf16.msrb.mxu2 %v7679_v27  ;;  %2997 = vmatpush.bf16.msrb.mxu3 %v7680_v28  ;;  %v7690_v27 = vld [vmem:[#allocation63_spill] sm:$0xff]  ;;  %v7691_v28 = vld [vmem:[#allocation64_spill] sm:$0xff] }
 0x68c   :  { %2959 = vmatpush.bf16.msrb.mxu0 %v7681_v43  ;;  %2972 = vmatpush.bf16.msrb.mxu1 %v7682_v38  ;;  %v7692_v43 = vld [vmem:[#allocation65_spill] sm:$0xff]  ;;  %v7693_v38 = vld [vmem:[#allocation66_spill] sm:$0xff] }
 0x68e   :  { %2985 = vmatpush.bf16.msrb.mxu2 %v7683_v37  ;;  %2998 = vmatpush.bf16.msrb.mxu3 %v7684_v54  ;;  %v7694_v37 = vld [vmem:[#allocation67_spill] sm:$0xff]  ;;  %v7695_v54 = vld [vmem:[#allocation68_spill] sm:$0xff] }
 0x690   :  { %2960 = vmatpush.bf16.msrb.mxu0 %v7685_v1  ;;  %2973 = vmatpush.bf16.msrb.mxu1 %v7686_v12  ;;  %v7696_v1 = vld [vmem:[#allocation69_spill] sm:$0xff]  ;;  %v7697_v12 = vld [vmem:[#allocation70_spill] sm:$0xff] }
 0x692   :  { %2986 = vmatpush.bf16.msrb.mxu2 %v7687_v22  ;;  %2999 = vmatpush.bf16.msrb.mxu3 %v7688_v0  ;;  %v7698_v22 = vld [vmem:[#allocation71_spill] sm:$0xff]  ;;  %v7699_v0 = vld [vmem:[#allocation72_spill] sm:$0xff] }
 0x694   :  { %2961 = vmatpush.bf16.msrb.mxu0 %v7689_v4  ;;  %2974 = vmatpush.bf16.msrb.mxu1 %v7690_v27  ;;  %v7700_v4 = vld [vmem:[#allocation73_spill] sm:$0xff]  ;;  %v7701_v27 = vld [vmem:[#allocation74_spill] sm:$0xff] }
 0x696   :  { %2987 = vmatpush.bf16.msrb.mxu2 %v7691_v28  ;;  %3000 = vmatpush.bf16.msrb.mxu3 %v7692_v43  ;;  %v7702_v28 = vld [vmem:[#allocation75_spill] sm:$0xff]  ;;  %v7703_v43 = vld [vmem:[#allocation76_spill] sm:$0xff] }
 0x698   :  { %2962 = vmatpush.bf16.msrb.mxu0 %v7693_v38  ;;  %2975 = vmatpush.bf16.msrb.mxu1 %v7694_v37  ;;  %v7704_v38 = vld [vmem:[#allocation79_spill] sm:$0xff] }
 0x69a   :  { %2988 = vmatpush.bf16.msrb.mxu2 %v7695_v54  ;;  %3001 = vmatpush.bf16.msrb.mxu3 %v7696_v1 }
 0x69c   :  { %2963 = vmatpush.bf16.msrb.mxu0 %v7697_v12  ;;  %2976 = vmatpush.bf16.msrb.mxu1 %v7698_v22 }
 0x69e   :  { %2989 = vmatpush.bf16.msrb.mxu2 %v7699_v0  ;;  %3002 = vmatpush.bf16.msrb.mxu3 %v7700_v4 }
 0x69f   :  { %v2621_v37 = vpop.f32.mrf.mxu0  ;;  %v2634_v54 = vpop.f32.mrf.mxu1 }
 0x6a0   :  { %2964 = vmatpush.bf16.msrb.mxu0 %v7701_v27  ;;  %2977 = vmatpush.bf16.msrb.mxu1 %v7702_v28  ;;  %v2635_v53 = vadd.f32 %v2634_v54, %v2621_v37 }
 0x6a2   :  { %2990 = vmatpush.bf16.msrb.mxu2 %v7703_v43  ;;  %3003 = vmatpush.bf16.msrb.mxu3 %v7704_v38 }
 0x6a6   :  { %v2647_v45 = vpop.f32.mrf.mxu2  ;;  %v2660_v1 = vpop.f32.mrf.mxu3 }
 0x6a7   :  { %v2623_v24 = vpop.f32.mrf.mxu0  ;;  %v2636_v12 = vpop.f32.mrf.mxu1  ;;  %v2661_v28 = vadd.f32 %v2660_v1, %v2647_v45 }
 0x6a9   :  { %v2828_v51 = vrot.slane %v2661_v28, 6 }
 0x6ae   :  { %v2649_v40 = vpop.f32.mrf.mxu2  ;;  %v2662_v22 = vpop.f32.mrf.mxu3 }
 0x6af   :  { %v2673_v20 = vpop.f32.mrf.mxu0  ;;  %v2686_v0 = vpop.f32.mrf.mxu1  ;;  %v2834_v22 = vsel %vm1073_vm0, %v2635_v53, %v2828_v51 }
 0x6b0   :  { %v2687_v8 = vadd.f32 %v2686_v0, %v2673_v20 }
 0x6b2   :  { %v2829_v17 = vrot.slane %v2687_v8, 4 }
 0x6b6   :  { %v2699_v42 = vpop.f32.mrf.mxu2  ;;  %v2712_v4 = vpop.f32.mrf.mxu3 }
 0x6b7   :  { %v2675_v59 = vpop.f32.mrf.mxu0  ;;  %v2688_v27 = vpop.f32.mrf.mxu1  ;;  %v2713_v23 = vadd.f32 %v2712_v4, %v2699_v42 }
 0x6b8   :  { %v4296_v59 = vld [vmem:[%s6735_s0 + $0x60] sm:$0xff] }
 0x6b9   :  { %v2830_v43 = vrot.slane %v2713_v23, 2 }
 0x6bb   :  { %v2835_v24 = vsel %vm1075_vm1, %v2829_v17, %v2830_v43 }
 0x6bc   :  { %v2836_v42 = vsel %vm1077_vm2, %v2834_v22, %v2835_v24 }
 0x6bd   :  { %v2842_v45 = vadd.f32 %v4296_v59, %v2836_v42 }
 0x6be   :  { %v2701_v11 = vpop.f32.mrf.mxu2  ;;  %v2714_v38 = vpop.f32.mrf.mxu3 }
 0x6bf   :  { %v4298_v0 = vmul.f32 -1.442695, %v2842_v45 }
 0x6c0   :  { %v2725_v12 = vpop.f32.mrf.mxu0  ;;  %v2738_v40 = vpop.f32.mrf.mxu1 }
 0x6c1   :  { %4754 = vpow2.f32 %v4298_v0 }
 0x6c7   :  { %v4755_v17 = vpop.eup %4754 }
 0x6c8   :  { %v2727_v11 = vpop.f32.mrf.mxu0  ;;  %v2740_v1 = vpop.f32.mrf.mxu1  ;;  %v2850_v54 = vadd.f32 1.0, %v4755_v17 }
 0x6c9   :  { %v2751_v20 = vpop.f32.mrf.mxu2  ;;  %v2764_v23 = vpop.f32.mrf.mxu3  ;;  %v2739_v1 = vadd.f32 %v2738_v40, %v2725_v12 }
 0x6ca   :  { %4756 = vrcp.f32 %v2850_v54  ;;  %v2765_v27 = vadd.f32 %v2764_v23, %v2751_v20  ;;  %v2863_v40 = vand.u32 2147483648, %v2850_v54  ;;  %vm2857_vm13 = vweird.f32 %v2850_v54 }
 0x6cc   :  { %v2831_v22 = vrot.slane %v2765_v27, 6 }
 0x6ce   :  { %v2837_v17 = vsel %vm1073_vm0, %v2739_v1, %v2831_v22  ;;  %v2864_v22 = vor.u32 1.1754944e-38, %v2863_v40 }
 0x6d0   :  { %v4757_v51 = vpop.eup %4756 }
 0x6d1   :  { %v2753_v8 = vpop.f32.mrf.mxu2  ;;  %v2766_v37 = vpop.f32.mrf.mxu3  ;;  %v2853_v43 = vmul.f32 %v4757_v51, %v2850_v54  ;;  %vm2858_vm12 = vweird.f32 %v4757_v51 }
 0x6d2   :  { %v4297_v37 = vld [vmem:[%s6735_s0 + $0x68] sm:$0xff]  ;;  %vm2859_vm14 = vmor %vm2857_vm13, %vm2858_vm12 }
 0x6d3   :  { %v2854_v8 = vsub.f32 1.0, %v2853_v43 }
 0x6e0   :  { %v2777_v4 = vpop.f32.mrf.mxu0  ;;  %v2790_v53 = vpop.f32.mrf.mxu1 }
 0x6e1   :  { %v2791_v28 = vadd.f32 %v2790_v53, %v2777_v4  ;;  %v2855_v53 = vmul.f32 %v4757_v51, %v2854_v8 }
 0x6e3   :  { %v2832_v45 = vrot.slane %v2791_v28, 4  ;;  %v2856_v12 = vadd.f32 %v4757_v51, %v2855_v53  ;;  %v2861_v28 = vand.u32 2147483647, %v2850_v54 }
 0x6e5   :  { %v2860_v43 = vsel %vm2859_vm14, %v4757_v51, %v2856_v12  ;;  %vm2862_vm15 = vcmp.eq.f32.partialorder %v2861_v28, 8.507059e+37 }
 0x6e8   :  { %v2803_v38 = vpop.f32.mrf.mxu2  ;;  %v2816_v24 = vpop.f32.mrf.mxu3 }
 0x6e9   :  { %v2817_v59 = vadd.f32 %v2816_v24, %v2803_v38  ;;  %v2779_v42 = vpop.f32.mrf.mxu0  ;;  %v2792_v11 = vpop.f32.mrf.mxu1 }
 0x6ea   :  { %v2865_v11 = vsel %vm2862_vm15, %v2864_v22, %v2860_v43 }
 0x6eb   :  { %v2833_v0 = vrot.slane %v2817_v59, 2 }
 0x6ed   :  { %v2838_v20 = vsel %vm1075_vm1, %v2832_v45, %v2833_v0  ;;  %v2884_v45 = vrot.slane %v2865_v11, 4 }
 0x6ee   :  { %v2839_v23 = vsel %vm1077_vm2, %v2837_v17, %v2838_v20 }
 0x6ef   :  { %v2843_v4 = vadd.f32 %v4297_v37, %v2839_v23  ;;  %v2886_v37 = vmul.f32 %v2884_v45, %v6279_v10 }
 0x6f0   :  { %v2805_v27 = vpop.f32.mrf.mxu2  ;;  %v2818_v38 = vpop.f32.mrf.mxu3 }
 0x6f1   :  { %v4299_v24 = vmul.f32 -1.442695, %v2843_v4 }
 0x6f3   :  { %4758 = vpow2.f32 %v4299_v24 }
 0x6f4   :  { %4760 = vtanh.f32 %v2843_v4 }
 0x6f9   :  { %v4759_v59 = vpop.eup %4758 }
 0x6fa   :  { %v2851_v42 = vadd.f32 1.0, %v4759_v59  ;;  %v4761_v1 = vpop.eup %4760 }
 0x6fb   :  { %v2887_v0 = vmul.f32 %v4761_v1, %v2865_v11 }
 0x6fc   :  { %4762 = vrcp.f32 %v2851_v42  ;;  %v2878_v54 = vand.u32 2147483648, %v2851_v42  ;;  %v2876_v51 = vand.u32 2147483647, %v2851_v42  ;;  %vm2872_vm4 = vweird.f32 %v2851_v42 }
 0x6fd   :  { %v6443_v20 = vadd.f32 %v2887_v0, %v2886_v37 }
 0x6fe   :  { %v2879_v27 = vor.u32 1.1754944e-38, %v2878_v54  ;;  %vm2877_vm6 = vcmp.eq.f32.partialorder %v2876_v51, 8.507059e+37 }
 0x6ff   :  { %4764 = vtanh.f32 %v6443_v20 }
 0x702   :  { %v4763_v8 = vpop.eup %4762 }
 0x703   :  { %v2868_v17 = vmul.f32 %v4763_v8, %v2851_v42  ;;  %vm2873_vm3 = vweird.f32 %v4763_v8 }
 0x704   :  { %vm2874_vm5 = vmor %vm2872_vm4, %vm2873_vm3 }
 0x705   :  { %v2869_v23 = vsub.f32 1.0, %v2868_v17  ;;  %v4765_v40 = vpop.eup %4764 }
 0x707   :  { %v2870_v53 = vmul.f32 %v4763_v8, %v2869_v23 }
 0x709   :  { %v2871_v4 = vadd.f32 %v4763_v8, %v2870_v53 }
 0x70b   :  { %v2875_v38 = vsel %vm2874_vm5, %v4763_v8, %v2871_v4  ;;  %v4300_v8 = vld [vmem:[%s6735_s0 + $0x70] sm:$0xff] }
 0x70c   :  { %v2880_v24 = vsel %vm2877_vm6, %v2879_v27, %v2875_v38 }
 0x70d   :  { %v2891_v12 = vrot.slane %v2880_v24, 4 }
 0x70f   :  { %v2893_v10 = vmul.f32 %v4765_v40, %v2891_v12 }
 0x711   :  { %2898 = vst [vmem:[#allocation1] ss:$4 sm:$0xff] %v2893_v10 }
 0x718   :  { %v2899_v28 = vld.sshfl [vmem:[#allocation1] sm:$0xff pattern:$0x73625140]  ;;  %v2900_v43 = vld.sshfl [vmem:[#allocation1 + $0x8] sm:$0xff pattern:$0x73625140] }
 0x719   :  { %v6446_v59 = vpack.c.bf16 %v2899_v28, %v2899_v28  ;;  %v6448_v22 = vpack.c.bf16 %v2900_v43, %v2900_v43  ;;  %v4631_v43 = vld [vmem:[%s6739_s4 + $0x38] sm:$0xff] }
 0x71b   :  { %2913 = vmatmul.bf16.vlgmr.msra.gmra.mxu0 %v6446_v59  ;;  %2926 = vmatmul.bf16.vlgmr.msra.gmra.mxu1 %v6448_v22 }
 0x71c   :  { %2939 = vmatmul.bf16.vlgmr.msra.gmra.mxu2 %v6446_v59  ;;  %2952 = vmatmul.bf16.vlgmr.msra.gmra.mxu3 %v6448_v22 }
 0x71d   :  { %3009 = vmatpush.bf16.msra.mxu0 %v7178_v39  ;;  %3022 = vmatpush.bf16.msra.mxu1 %v7179_v63  ;;  %v7705_v39 = vld [vmem:[#allocation118_spill] sm:$0xff]  ;;  %v7706_v63 = vld [vmem:[#allocation119_spill] sm:$0xff] }
 0x71e   :  { %3035 = vmatpush.bf16.msra.mxu2 %v7180_v36  ;;  %3048 = vmatpush.bf16.msra.mxu3 %v7181_v13  ;;  %v7707_v36 = vld [vmem:[#allocation120_spill] sm:$0xff]  ;;  %v7708_v13 = vld [vmem:[#allocation121_spill] sm:$0xff] }
 0x721   :  { %3010 = vmatpush.bf16.msra.mxu0 %v7182_v15  ;;  %3023 = vmatpush.bf16.msra.mxu1 %v7183_v2  ;;  %v7709_v15 = vld [vmem:[#allocation122_spill] sm:$0xff]  ;;  %v7710_v2 = vld [vmem:[#allocation123_spill] sm:$0xff] }
 0x722   :  { %3036 = vmatpush.bf16.msra.mxu2 %v7184_v26  ;;  %3049 = vmatpush.bf16.msra.mxu3 %v7185_v61  ;;  %v7711_v26 = vld [vmem:[#allocation124_spill] sm:$0xff]  ;;  %v7712_v61 = vld [vmem:[#allocation125_spill] sm:$0xff] }
 0x725   :  { %3011 = vmatpush.bf16.msra.mxu0 %v7186_v60  ;;  %3024 = vmatpush.bf16.msra.mxu1 %v7187_v31  ;;  %v7713_v60 = vld [vmem:[#allocation126_spill] sm:$0xff]  ;;  %v7714_v31 = vld [vmem:[#allocation127_spill] sm:$0xff] }
 0x726   :  { %3037 = vmatpush.bf16.msra.mxu2 %v7265_v44  ;;  %3050 = vmatpush.bf16.msra.mxu3 %v7266_v29  ;;  %v7719_v44 = vld [vmem:[#allocation132_spill] sm:$0xff]  ;;  %v7720_v29 = vld [vmem:[#allocation133_spill] sm:$0xff] }
 0x729   :  { %3012 = vmatpush.bf16.msra.mxu0 %v7267_v62  ;;  %3025 = vmatpush.bf16.msra.mxu1 %v7268_v56  ;;  %v7721_v62 = vld [vmem:[#allocation134_spill] sm:$0xff]  ;;  %v7722_v56 = vld [vmem:[#allocation135_spill] sm:$0xff] }
 0x72a   :  { %3038 = vmatpush.bf16.msra.mxu2 %v7269_v57  ;;  %3051 = vmatpush.bf16.msra.mxu3 %v7270_v33  ;;  %v7723_v57 = vld [vmem:[#allocation136_spill] sm:$0xff]  ;;  %v7724_v33 = vld [vmem:[#allocation137_spill] sm:$0xff] }
 0x72b   :  { %2965 = vmatmul.bf16.vlgmr.msrb.gmra.mxu0 %v6446_v59  ;;  %2978 = vmatmul.bf16.vlgmr.msrb.gmra.mxu1 %v6448_v22 }
 0x72c   :  { %2991 = vmatmul.bf16.vlgmr.msrb.gmra.mxu2 %v6446_v59  ;;  %3004 = vmatmul.bf16.vlgmr.msrb.gmra.mxu3 %v6448_v22 }
 0x72d   :  { %3013 = vmatpush.bf16.msra.mxu0 %v7194_v35  ;;  %3026 = vmatpush.bf16.msra.mxu1 %v7195_v48  ;;  %v7715_v35 = vld [vmem:[#allocation128_spill] sm:$0xff]  ;;  %v7716_v48 = vld [vmem:[#allocation129_spill] sm:$0xff] }
 0x72e   :  { %3039 = vmatpush.bf16.msra.mxu2 %v7196_v47  ;;  %3052 = vmatpush.bf16.msra.mxu3 %v7197_v41  ;;  %v7717_v47 = vld [vmem:[#allocation130_spill] sm:$0xff]  ;;  %v7718_v41 = vld [vmem:[#allocation131_spill] sm:$0xff] }
 0x731   :  { %3014 = vmatpush.bf16.msra.mxu0 %v7271_v5  ;;  %3027 = vmatpush.bf16.msra.mxu1 %v7272_v21  ;;  %v7725_v5 = vld [vmem:[#allocation138_spill] sm:$0xff]  ;;  %v7726_v21 = vld [vmem:[#allocation139_spill] sm:$0xff] }
 0x732   :  { %3040 = vmatpush.bf16.msra.mxu2 %v7273_v34  ;;  %3053 = vmatpush.bf16.msra.mxu3 %v7274_v58  ;;  %v7727_v34 = vld [vmem:[#allocation140_spill] sm:$0xff]  ;;  %v7728_v58 = vld [vmem:[#allocation141_spill] sm:$0xff] }
 0x735   :  { %3015 = vmatpush.bf16.msra.mxu0 %v7353_v16  ;;  %3028 = vmatpush.bf16.msra.mxu1 %v7276_v25 }
 0x736   :  { %3041 = vmatpush.bf16.msra.mxu2 %v7277_v6  ;;  %3054 = vmatpush.bf16.msra.mxu3 %v7278_v9 }
 0x739   :  { %3016 = vmatpush.bf16.msra.mxu0 %v7279_v55  ;;  %3029 = vmatpush.bf16.msra.mxu1 %v7354_v49 }
 0x73a   :  { %3042 = vmatpush.bf16.msra.mxu2 %v7355_v7  ;;  %3055 = vmatpush.bf16.msra.mxu3 %v7356_v30 }
 0x73c   :  { %3017 = vmatmul.bf16.vlgmr.msra.gmra.mxu0 %v6446_v59  ;;  %3030 = vmatmul.bf16.vlgmr.msra.gmra.mxu1 %v6448_v22 }
 0x73d   :  { %3061 = vmatpush.bf16.msrb.mxu0 %v7357_v32  ;;  %3074 = vmatpush.bf16.msrb.mxu1 %v7358_v19 }
 0x73e   :  { %3087 = vmatpush.bf16.msrb.mxu2 %v7359_v18  ;;  %3100 = vmatpush.bf16.msrb.mxu3 %v7360_v3 }
 0x73f   :  { %3043 = vmatmul.bf16.vlgmr.msra.gmra.mxu2 %v6446_v59  ;;  %3056 = vmatmul.bf16.vlgmr.msra.gmra.mxu3 %v6448_v22 }
 0x741   :  { %3062 = vmatpush.bf16.msrb.mxu0 %v7287_v50  ;;  %3075 = vmatpush.bf16.msrb.mxu1 %v7288_v14 }
 0x742   :  { %3088 = vmatpush.bf16.msrb.mxu2 %v7289_v46  ;;  %3101 = vmatpush.bf16.msrb.mxu3 %v7290_v52 }
 0x745   :  { %3063 = vmatpush.bf16.msrb.mxu0 %v7705_v39  ;;  %3076 = vmatpush.bf16.msrb.mxu1 %v7706_v63  ;;  %v4630_v63 = vld [vmem:[%s6739_s4 + $0x30] sm:$0xff] }
 0x746   :  { %3089 = vmatpush.bf16.msrb.mxu2 %v7707_v36  ;;  %3102 = vmatpush.bf16.msrb.mxu3 %v7708_v13  ;;  %v4629_v36 = vld [vmem:[%s6739_s4 + $0x28] sm:$0xff] }
 0x749   :  { %3064 = vmatpush.bf16.msrb.mxu0 %v7709_v15  ;;  %3077 = vmatpush.bf16.msrb.mxu1 %v7710_v2  ;;  %v4628_v15 = vld [vmem:[%s6739_s4 + $0x20] sm:$0xff]  ;;  %v4639_v2 = vld [vmem:[%s6739_s4 + $0x78] sm:$0xff] }
 0x74a   :  { %3090 = vmatpush.bf16.msrb.mxu2 %v7711_v26  ;;  %3103 = vmatpush.bf16.msrb.mxu3 %v7712_v61  ;;  %v4655_v26 = vld [vmem:[%s6743_s8 + $0x38] sm:$0xff] }
 0x74d   :  { %3065 = vmatpush.bf16.msrb.mxu0 %v7713_v60  ;;  %3078 = vmatpush.bf16.msrb.mxu1 %v7714_v31  ;;  %v4627_v60 = vld [vmem:[%s6739_s4 + $0x18] sm:$0xff]  ;;  %v4638_v31 = vld [vmem:[%s6739_s4 + $0x70] sm:$0xff] }
 0x74e   :  { %3091 = vmatpush.bf16.msrb.mxu2 %v7715_v35  ;;  %3104 = vmatpush.bf16.msrb.mxu3 %v7716_v48  ;;  %v4654_v35 = vld [vmem:[%s6743_s8 + $0x30] sm:$0xff] }
 0x751   :  { %3066 = vmatpush.bf16.msrb.mxu0 %v7717_v47  ;;  %3079 = vmatpush.bf16.msrb.mxu1 %v7718_v41 }
 0x752   :  { %3092 = vmatpush.bf16.msrb.mxu2 %v7719_v44  ;;  %3105 = vmatpush.bf16.msrb.mxu3 %v7720_v29  ;;  %v4626_v44 = vld [vmem:[%s6739_s4 + $0x10] sm:$0xff]  ;;  %v4637_v29 = vld [vmem:[%s6739_s4 + $0x68] sm:$0xff] }
 0x755   :  { %3067 = vmatpush.bf16.msrb.mxu0 %v7721_v62  ;;  %3080 = vmatpush.bf16.msrb.mxu1 %v7722_v56  ;;  %v4653_v62 = vld [vmem:[%s6743_s8 + $0x28] sm:$0xff] }
 0x756   :  { %3093 = vmatpush.bf16.msrb.mxu2 %v7723_v57  ;;  %3106 = vmatpush.bf16.msrb.mxu3 %v7724_v33 }
 0x759   :  { %3068 = vmatpush.bf16.msrb.mxu0 %v7725_v5  ;;  %3081 = vmatpush.bf16.msrb.mxu1 %v7726_v21  ;;  %v4625_v5 = vld [vmem:[%s6739_s4 + $0x8] sm:$0xff] }
 0x75a   :  { %3094 = vmatpush.bf16.msrb.mxu2 %v7727_v34  ;;  %3107 = vmatpush.bf16.msrb.mxu3 %v7728_v58  ;;  %v4636_v58 = vld [vmem:[%s6739_s4 + $0x60] sm:$0xff] }
 0x75c   :  { %3069 = vmatmul.bf16.vlgmr.msrb.gmra.mxu0 %v6446_v59  ;;  %3082 = vmatmul.bf16.vlgmr.msrb.gmra.mxu1 %v6448_v22 }
 0x75d   :  { %3095 = vmatmul.bf16.vlgmr.msrb.gmra.mxu2 %v6446_v59  ;;  %3108 = vmatmul.bf16.vlgmr.msrb.gmra.mxu3 %v6448_v22 }
 0x75e   :  { %3334 = vmatpush.bf16.msra.mxu0 %v4631_v43  ;;  %3347 = vmatpush.bf16.msra.mxu1 %v4639_v2  ;;  %v4658_v2 = vld [vmem:[%s6743_s8 + $0x50] sm:$0xff] }
 0x75f   :  { %3600 = vmatpush.bf16.msra.mxu3 %v4655_v26 }
 0x762   :  { %3335 = vmatpush.bf16.msra.mxu0 %v4630_v63  ;;  %3348 = vmatpush.bf16.msra.mxu1 %v4638_v31 }
 0x763   :  { %3601 = vmatpush.bf16.msra.mxu3 %v4654_v35 }
 0x766   :  { %3336 = vmatpush.bf16.msra.mxu0 %v4629_v36  ;;  %3349 = vmatpush.bf16.msra.mxu1 %v4637_v29 }
 0x767   :  { %3602 = vmatpush.bf16.msra.mxu3 %v4653_v62 }
 0x76a   :  { %3337 = vmatpush.bf16.msra.mxu0 %v4628_v15  ;;  %3350 = vmatpush.bf16.msra.mxu1 %v4636_v58  ;;  %v4659_v15 = vld [vmem:[%s6743_s8 + $0x58] sm:$0xff]  ;;  %v4670_v58 = vld [vmem:[%s6745_s10 + $0x30] sm:$0xff] }
 0x76e   :  { %3338 = vmatpush.bf16.msra.mxu0 %v4627_v60 }
 0x772   :  { %3339 = vmatpush.bf16.msra.mxu0 %v4626_v44 }
 0x776   :  { %3340 = vmatpush.bf16.msra.mxu0 %v4625_v5  ;;  %v4671_v5 = vld [vmem:[%s6745_s10 + $0x38] sm:$0xff] }
 0x798   :  { %v2914_v25 = vpop.f32.mrf.mxu0  ;;  %v2927_v6 = vpop.f32.mrf.mxu1 }
 0x799   :  { %v2928_v1 = vadd.f32 %v2927_v6, %v2914_v25  ;;  %v4652_v25 = vld [vmem:[%s6743_s8 + $0x20] sm:$0xff] }
 0x79a   :  { %3603 = vmatpush.bf16.msra.mxu3 %v4652_v25  ;;  %v4645_v25 = vld [vmem:[%s6741_s6 + $0x28] sm:$0xff] }
 0x79f   :  { %v2940_v9 = vpop.f32.mrf.mxu2  ;;  %v2953_v55 = vpop.f32.mrf.mxu3 }
 0x7a0   :  { %v2916_v50 = vpop.f32.mrf.mxu0  ;;  %v2929_v14 = vpop.f32.mrf.mxu1  ;;  %v2954_v7 = vadd.f32 %v2953_v55, %v2940_v9 }
 0x7a2   :  { %v3121_v18 = vrot.slane %v2954_v7, 6 }
 0x7a4   :  { %v3127_v37 = vsel %vm1073_vm0, %v2928_v1, %v3121_v18  ;;  %v4651_v18 = vld [vmem:[%s6743_s8 + $0x18] sm:$0xff] }
 0x7a5   :  { %3604 = vmatpush.bf16.msra.mxu3 %v4651_v18  ;;  %v4665_v18 = vld [vmem:[%s6745_s10 + $0x8] sm:$0xff] }
 0x7a7   :  { %v2942_v46 = vpop.f32.mrf.mxu2  ;;  %v2955_v52 = vpop.f32.mrf.mxu3 }
 0x7a8   :  { %v2966_v16 = vpop.f32.mrf.mxu0  ;;  %v2979_v49 = vpop.f32.mrf.mxu1 }
 0x7a9   :  { %v2980_v30 = vadd.f32 %v2979_v49, %v2966_v16  ;;  %v4301_v16 = vld [vmem:[%s6735_s0 + $0x78] sm:$0xff] }
 0x7ab   :  { %v3122_v45 = vrot.slane %v2980_v30, 4  ;;  %v4624_v30 = vld [vmem:[%s6739_s4] sm:$0xff] }
 0x7ac   :  { %3341 = vmatpush.bf16.msra.mxu0 %v4624_v30  ;;  %v4640_v30 = vld [vmem:[%s6741_s6] sm:$0xff] }
 0x7af   :  { %v2992_v32 = vpop.f32.mrf.mxu2  ;;  %v3005_v19 = vpop.f32.mrf.mxu3 }
 0x7b0   :  { %v3006_v3 = vadd.f32 %v3005_v19, %v2992_v32  ;;  %v2968_v42 = vpop.f32.mrf.mxu0  ;;  %v2981_v11 = vpop.f32.mrf.mxu1  ;;  %v4635_v19 = vld [vmem:[%s6739_s4 + $0x58] sm:$0xff] }
 0x7b1   :  { %3351 = vmatpush.bf16.msra.mxu1 %v4635_v19  ;;  %v4666_v19 = vld [vmem:[%s6745_s10 + $0x10] sm:$0xff] }
 0x7b2   :  { %v3123_v0 = vrot.slane %v3006_v3, 2  ;;  %v4663_v3 = vld [vmem:[%s6743_s8 + $0x78] sm:$0xff] }
 0x7b3   :  { %3613 = vmatpush.bf16.msrb.mxu0 %v4663_v3  ;;  %v4664_v3 = vld [vmem:[%s6745_s10] sm:$0xff] }
 0x7b4   :  { %v3128_v17 = vsel %vm1075_vm1, %v3122_v45, %v3123_v0 }
 0x7b5   :  { %v3129_v23 = vsel %vm1077_vm2, %v3127_v37, %v3128_v17 }
 0x7b6   :  { %v3135_v54 = vadd.f32 %v4300_v8, %v3129_v23 }
 0x7b7   :  { %v2994_v53 = vpop.f32.mrf.mxu2  ;;  %v3007_v51 = vpop.f32.mrf.mxu3 }
 0x7b8   :  { %v4302_v4 = vmul.f32 -1.442695, %v3135_v54  ;;  %v4634_v54 = vld [vmem:[%s6739_s4 + $0x50] sm:$0xff] }
 0x7b9   :  { %v3018_v27 = vpop.f32.mrf.mxu0  ;;  %v3031_v38 = vpop.f32.mrf.mxu1  ;;  %v4650_v53 = vld [vmem:[%s6743_s8 + $0x10] sm:$0xff]  ;;  %3352 = vmatpush.bf16.msra.mxu1 %v4634_v54 }
 0x7ba   :  { %4766 = vpow2.f32 %v4302_v4  ;;  %v3032_v46 = vadd.f32 %v3031_v38, %v3018_v27  ;;  %v4662_v51 = vld [vmem:[%s6743_s8 + $0x70] sm:$0xff]  ;;  %3605 = vmatpush.bf16.msra.mxu3 %v4650_v53  ;;  %v4633_v38 = vld [vmem:[%s6739_s4 + $0x48] sm:$0xff]  ;;  %v4679_v53 = vld [vmem:[%s6744_s9] ss:$0 sm:$0xff] }
 0x7bb   :  { %3614 = vmatpush.bf16.msrb.mxu0 %v4662_v51 }
 0x7bd   :  { %3353 = vmatpush.bf16.msra.mxu1 %v4633_v38 }
 0x7c0   :  { %v4767_v28 = vpop.eup %4766 }
 0x7c1   :  { %v3020_v40 = vpop.f32.mrf.mxu0  ;;  %v3033_v10 = vpop.f32.mrf.mxu1  ;;  %v6539_v59 = vadd.f32 1.0, %v4767_v28  ;;  %v4648_v28 = vld [vmem:[%s6743_s8] sm:$0xff] }
 0x7c2   :  { %v3044_v24 = vpop.f32.mrf.mxu2  ;;  %v3057_v12 = vpop.f32.mrf.mxu3  ;;  %v4632_v10 = vld [vmem:[%s6739_s4 + $0x40] sm:$0xff] }
 0x7c3   :  { %4768 = vrcp.f32 %v6539_v59  ;;  %v3058_v56 = vadd.f32 %v3057_v12, %v3044_v24  ;;  %v3156_v7 = vand.u32 2147483648, %v6539_v59  ;;  %vm3150_vm8 = vweird.f32 %v6539_v59  ;;  %v4649_v24 = vld [vmem:[%s6743_s8 + $0x8] sm:$0xff]  ;;  %3354 = vmatpush.bf16.msra.mxu1 %v4632_v10  ;;  %v4680_v10 = vld [vmem:[%s6742_s7] ss:$0 sm:$0xff] }
 0x7c4   :  { %v3154_v32 = vand.u32 2147483647, %v6539_v59  ;;  %v4661_v12 = vld [vmem:[%s6743_s8 + $0x68] sm:$0xff]  ;;  %3606 = vmatpush.bf16.msra.mxu3 %v4649_v24 }
 0x7c5   :  { %v3124_v6 = vrot.slane %v3058_v56, 6  ;;  %v3157_v37 = vor.u32 1.1754944e-38, %v3156_v7  ;;  %3615 = vmatpush.bf16.msrb.mxu0 %v4661_v12  ;;  %v4668_v7 = vld [vmem:[%s6745_s10 + $0x20] sm:$0xff] }
 0x7c6   :  { %vm3155_vm10 = vcmp.eq.f32.partialorder %v3154_v32, 8.507059e+37  ;;  %v4667_v32 = vld [vmem:[%s6745_s10 + $0x18] sm:$0xff] }
 0x7c7   :  { %v3130_v42 = vsel %vm1073_vm0, %v3032_v46, %v3124_v6  ;;  %3696 = vmatpush.bf16.msrb.mxu1 %v4671_v5  ;;  %v4644_v6 = vld [vmem:[%s6741_s6 + $0x20] sm:$0xff]  ;;  %v4643_v46 = vld [vmem:[%s6741_s6 + $0x18] sm:$0xff] }
 0x7c8   :  { %3607 = vmatpush.bf16.msra.mxu3 %v4648_v28 }
 0x7c9   :  { %v6548_v13 = vpop.eup %4768 }
 0x7ca   :  { %v3046_v22 = vpop.f32.mrf.mxu2  ;;  %v3059_v39 = vpop.f32.mrf.mxu3  ;;  %v3146_v61 = vmul.f32 %v6548_v13, %v6539_v59  ;;  %vm3151_vm7 = vweird.f32 %v6548_v13  ;;  %v4660_v59 = vld [vmem:[%s6743_s8 + $0x60] sm:$0xff] }
 0x7cb   :  { %vm6613_vm9 = vmor %vm3150_vm8, %vm3151_vm7  ;;  %3616 = vmatpush.bf16.msrb.mxu0 %v4660_v59  ;;  %3697 = vmatpush.bf16.msrb.mxu1 %v4670_v58 }
 0x7cc   :  { %v3147_v41 = vsub.f32 1.0, %v3146_v61  ;;  %v4657_v61 = vld [vmem:[%s6743_s8 + $0x48] sm:$0xff] }
 0x7ce   :  { %v3148_v57 = vmul.f32 %v6548_v13, %v3147_v41 }
 0x7cf   :  { %3617 = vmatpush.bf16.msrb.mxu0 %v4659_v15 }
 0x7d0   :  { %v3149_v14 = vadd.f32 %v6548_v13, %v3148_v57  ;;  %v4647_v57 = vld [vmem:[%s6741_s6 + $0x38] sm:$0xff] }
 0x7d1   :  { %3430 = vmatpush.bf16.msra.mxu2 %v4647_v57 }
 0x7d2   :  { %v3153_v0 = vsel %vm6613_vm9, %v6548_v13, %v3149_v14 }
 0x7d3   :  { %v3158_v27 = vsel %vm3155_vm10, %v3157_v37, %v3153_v0  ;;  %3618 = vmatpush.bf16.msrb.mxu0 %v4658_v2 }
 0x7d4   :  { %v3177_v40 = vrot.slane %v3158_v27, 4 }
 0x7d6   :  { %v3179_v22 = vmul.f32 %v3177_v40, %v6443_v20 }
 0x7d7   :  { %3619 = vmatpush.bf16.msrb.mxu0 %v4657_v61 }
 0x7d9   :  { %v3070_v48 = vpop.f32.mrf.mxu0  ;;  %v3083_v47 = vpop.f32.mrf.mxu1 }
 0x7da   :  { %v3084_v33 = vadd.f32 %v3083_v47, %v3070_v48  ;;  %v4656_v47 = vld [vmem:[%s6743_s8 + $0x40] sm:$0xff] }
 0x7db   :  { %3620 = vmatpush.bf16.msrb.mxu0 %v4656_v47 }
 0x7dc   :  { %v3125_v52 = vrot.slane %v3084_v33, 4 }
 0x7e0   :  { %v3096_v21 = vpop.f32.mrf.mxu2  ;;  %v3109_v34 = vpop.f32.mrf.mxu3 }
 0x7e1   :  { %v3110_v9 = vadd.f32 %v3109_v34, %v3096_v21  ;;  %v3072_v55 = vpop.f32.mrf.mxu0  ;;  %v3085_v50 = vpop.f32.mrf.mxu1  ;;  %v4646_v34 = vld [vmem:[%s6741_s6 + $0x30] sm:$0xff] }
 0x7e2   :  { %3431 = vmatpush.bf16.msra.mxu2 %v4646_v34 }
 0x7e3   :  { %v3126_v49 = vrot.slane %v3110_v9, 2 }
 0x7e5   :  { %v3131_v11 = vsel %vm1075_vm1, %v3125_v52, %v3126_v49  ;;  %v4642_v52 = vld [vmem:[%s6741_s6 + $0x10] sm:$0xff]  ;;  %v4641_v49 = vld [vmem:[%s6741_s6 + $0x8] sm:$0xff] }
 0x7e6   :  { %v3132_v45 = vsel %vm1077_vm2, %v3130_v42, %v3131_v11  ;;  %3432 = vmatpush.bf16.msra.mxu2 %v4645_v25  ;;  %v4678_v42 = vld [vmem:[%s6740_s5] ss:$0 sm:$0xff] }
 0x7e7   :  { %v3136_v8 = vadd.f32 %v4301_v16, %v3132_v45  ;;  %v4669_v16 = vld [vmem:[%s6745_s10 + $0x28] sm:$0xff] }
 0x7e8   :  { %v3098_v17 = vpop.f32.mrf.mxu2  ;;  %v3111_v23 = vpop.f32.mrf.mxu3  ;;  %3698 = vmatpush.bf16.msrb.mxu1 %v4669_v16 }
 0x7e9   :  { %v4303_v4 = vmul.f32 -1.442695, %v3136_v8  ;;  %4770 = vtanh.f32 %v3136_v8 }
 0x7ea   :  { %3433 = vmatpush.bf16.msra.mxu2 %v4644_v6 }
 0x7eb   :  { %4772 = vpow2.f32 %v4303_v4 }
 0x7ec   :  { %3699 = vmatpush.bf16.msrb.mxu1 %v4668_v7 }
 0x7ee   :  { %3434 = vmatpush.bf16.msra.mxu2 %v4643_v46 }
 0x7ef   :  { %v4771_v43 = vpop.eup %4770 }
 0x7f0   :  { %v3180_v39 = vmul.f32 %v4771_v43, %v3158_v27  ;;  %3700 = vmatpush.bf16.msrb.mxu1 %v4667_v32 }
 0x7f1   :  { %v4773_v63 = vpop.eup %4772 }
 0x7f2   :  { %v3144_v36 = vadd.f32 1.0, %v4773_v63  ;;  %v3181_v13 = vadd.f32 %v3180_v39, %v3179_v22  ;;  %3435 = vmatpush.bf16.msra.mxu2 %v4642_v52  ;;  %v4681_v22 = vld [vmem:[%s6746_s11] ss:$0 sm:$0xff]  ;;  %s3728_s11 = sshll.u32 %s6748_s13, 4  ;;  %s4889_s13 = smov [#allocation10]   ;;  %s3729_s11 = int_to_ptr.hbm [resolvable:$true] %s3728_s11 }
 0x7f3   :  { %s3737_s17 = sshll.u32 %s4889_s13, 4  ;;  %s3738_s17 = int_to_ptr.vmem [resolvable:$true] %s3737_s17 }
 0x7f4   :  { %4774 = vrcp.f32 %v3144_v36  ;;  %3188 = vst [vmem:[#allocation3] sm:$0xf] %v3181_v13  ;;  %v3171_v31 = vand.u32 2147483648, %v3144_v36  ;;  %v3169_v48 = vand.u32 2147483647, %v3144_v36  ;;  %vm3165_vm2 = vweird.f32 %v3144_v36  ;;  %3701 = vmatpush.bf16.msrb.mxu1 %v4666_v19 }
 0x7f5   :  { %3193 = vst [vmem:[#allocation8] sm:$0xf] %v3181_v13  ;;  %4776 = vtanh.f32 %v3181_v13 }
 0x7f6   :  { %v3172_v44 = vor.u32 1.1754944e-38, %v3171_v31  ;;  %vm3170_vm12 = vcmp.eq.f32.partialorder %v3169_v48, 8.507059e+37  ;;  %3436 = vmatpush.bf16.msra.mxu2 %v4641_v49  ;;  %3731 = dma.vmem_to_hbm [thread:$0]  %s3727_s28, 64, %s3729_s11, [#allocation9]  }
 0x7f8   :  { %3702 = vmatpush.bf16.msrb.mxu1 %v4665_v18 }
 0x7fa   :  { %v4775_v20 = vpop.eup %4774  ;;  %3437 = vmatpush.bf16.msra.mxu2 %v4640_v30 }
 0x7fb   :  { %v3161_v26 = vmul.f32 %v4775_v20, %v3144_v36  ;;  %vm3166_vm1 = vweird.f32 %v4775_v20  ;;  %v4777_v33 = vpop.eup %4776 }
 0x7fc   :  { %vm3167_vm11 = vmor %vm3165_vm2, %vm3166_vm1  ;;  %3703 = vmatpush.bf16.msrb.mxu1 %v4664_v3 }
 0x7fd   :  { %v3162_v60 = vsub.f32 1.0, %v3161_v26 }
 0x7ff   :  { %v3163_v35 = vmul.f32 %v4775_v20, %v3162_v60 }
 0x801   :  { %v3164_v41 = vadd.f32 %v4775_v20, %v3163_v35 }
 0x803   :  { %v3168_v29 = vsel %vm3167_vm11, %v4775_v20, %v3164_v41 }
 0x804   :  { %v3173_v62 = vsel %vm3170_vm12, %v3172_v44, %v3168_v29 }
 0x805   :  { %v3184_v56 = vrot.slane %v3173_v62, 4 }
 0x807   :  { %v3186_v21 = vmul.f32 %v4777_v33, %v3184_v56 }
 0x809   :  { %3187 = vst [vmem:[#allocation2] sm:$0xf] %v3186_v21 }
 0x80a   :  { %3192 = vst [vmem:[#allocation7] sm:$0xf] %v3186_v21 }
 0x80b   :  { %3195 = vst [vmem:[#allocation1] ss:$4 sm:$0xff] %v3186_v21 }
 0x812   :  { %v3196_v9 = vld.sshfl [vmem:[#allocation1] sm:$0xff pattern:$0x73625140]  ;;  %v3197_v55 = vld.sshfl [vmem:[#allocation1 + $0x8] sm:$0xff pattern:$0x73625140] }
 0x813   :  { %v3200_v50 = vpack.c.bf16 %v3196_v9, %v3196_v9  ;;  %v3201_v14 = vpack.c.bf16 %v3197_v55, %v3197_v55 }
 0x815   :  { %3342 = vmatmul.bf16.vlgmr.msra.gmra.mxu0 %v3200_v50  ;;  %3355 = vmatmul.bf16.vlgmr.msra.gmra.mxu1 %v3201_v14 }
 0x816   :  { %3608 = vmatmul.bf16.vlgmr.msra.gmra.mxu3 %v3200_v50 }
 0x825   :  { %3621 = vmatmul.bf16.vlgmr.msrb.gmra.mxu0 %v3201_v14 }
 0x892   :  { %v3343_v11 = vpop.f32.mrf.mxu0  ;;  %v3356_v1 = vpop.f32.mrf.mxu1 }
 0x893   :  { %v3344_v45 = vadd.f32 %v4678_v42, %v3343_v11 }
 0x895   :  { %v3357_v0 = vadd.f32 %v3356_v1, %v3344_v45 }
 0x897   :  { %v3360_v8 = vmax.f32 %v3357_v0, 0.0 }
 0x899   :  { %v3361_v37 = vpack.c.bf16 %v3360_v8, %v3360_v8  ;;  %v3609_v17 = vpop.f32.mrf.mxu3 }
 0x89a   :  { %v3345_v23 = vpop.f32.mrf.mxu0  ;;  %v3358_v54 = vpop.f32.mrf.mxu1  ;;  %v3610_v51 = vadd.f32 %v4679_v53, %v3609_v17 }
 0x89b   :  { %3438 = vmatmul.bf16.vlgmr.msra.gmra.mxu2 %v3361_v37 }
 0x8a1   :  { %v3611_v4 = vpop.f32.mrf.mxu3 }
 0x8a2   :  { %v3622_v27 = vpop.f32.mrf.mxu0 }
 0x8a3   :  { %v3623_v38 = vadd.f32 %v3622_v27, %v3610_v51 }
 0x8a5   :  { %v3626_v24 = vmax.f32 %v3623_v38, 0.0 }
 0x8a7   :  { %v3627_v12 = vpack.c.bf16 %v3626_v24, %v3626_v24 }
 0x8a9   :  { %3704 = vmatmul.bf16.vlgmr.msrb.gmra.mxu1 %v3627_v12 }
 0x8aa   :  { %v3624_v40 = vpop.f32.mrf.mxu0 }
 0x91e   :  { %v3439_v28 = vpop.f32.mrf.mxu2 }
 0x91f   :  { %v3440_v43 = vadd.f32 %v4680_v10, %v3439_v28 }
 0x921   :  { %v3443_v59 = vsel %vm1073_vm0, %v3440_v43, -inf }
 0x922   :  { %3444 = vmax.xlane.f32.xlu0 %v3443_v59 }
 0x926   :  { %v3441_v39 = vpop.f32.mrf.mxu2  ;;  %v3705_v63 = vpop.f32.mrf.mxu1 }
 0x927   :  { %v3706_v36 = vadd.f32 %v4681_v22, %v3705_v63 }
 0x929   :  { %3709 = vst [vmem:[%s6750_s15] sm:$0x3] %v3706_v36  ;;  %s3715_s15 = sshll.u32 %s4888_s3, 4  ;;  %s3716_s15 = int_to_ptr.vmem [resolvable:$true] %s3715_s15 }
 0x92a   :  { %3720 = dma.vmem_to_hbm [thread:$0]  %s3716_s15, 64, %s3718_s16, [#allocation6]  }
 0x92e   :  { %v3707_v13 = vpop.f32.mrf.mxu1 }
 0x995   :  { %v3445_v15 = vpop.xlane.xlu0 %3444 }
 0x996   :  { %v3446_v2 = vsub.f32 %v3440_v43, %v3445_v15 }
 0x998   :  { %v3447_v20 = vmul.f32 1.442695, %v3446_v2 }
 0x99a   :  { %4778 = vpow2.f32 %v3447_v20 }
 0x9a0   :  { %v4779_v26 = vpop.eup %4778 }
 0x9a1   :  { %v3449_v61 = vsel %vm1073_vm0, %v4779_v26, 0.0 }
 0x9a2   :  { %3450 = vadd.xlane.f32.xlu0 %v3449_v61 }
 0xa15   :  { %v3451_v60 = vpop.xlane.xlu0 %3450 }
 0xa16   :  { %4780 = vrcp.f32 %v3451_v60  ;;  %v3463_v47 = vand.u32 2147483648, %v3451_v60  ;;  %v3461_v44 = vand.u32 2147483647, %v3451_v60  ;;  %vm3457_vm13 = vweird.f32 %v3451_v60 }
 0xa18   :  { %v3464_v62 = vor.u32 1.1754944e-38, %v3463_v47  ;;  %vm3462_vm15 = vcmp.eq.f32.partialorder %v3461_v44, 8.507059e+37 }
 0xa1c   :  { %v4781_v31 = vpop.eup %4780 }
 0xa1d   :  { %v3453_v35 = vmul.f32 %v4781_v31, %v3451_v60  ;;  %vm3458_vm0 = vweird.f32 %v4781_v31 }
 0xa1e   :  { %vm3459_vm14 = vmor %vm3457_vm13, %vm3458_vm0 }
 0xa1f   :  { %v3454_v48 = vsub.f32 1.0, %v3453_v35 }
 0xa21   :  { %v3455_v41 = vmul.f32 %v4781_v31, %v3454_v48 }
 0xa23   :  { %v3456_v29 = vadd.f32 %v4781_v31, %v3455_v41 }
 0xa25   :  { %v3460_v56 = vsel %vm3459_vm14, %v4781_v31, %v3456_v29 }
 0xa26   :  { %v3465_v57 = vsel %vm3462_vm15, %v3464_v62, %v3460_v56 }
 0xa27   :  { %v3466_v33 = vmul.f32 %v4779_v26, %v3465_v57 }
 0xa29   :  { %3467 = vst [vmem:[#allocation10] sm:$0x3] %v3466_v33 }
 0xa2a   :  { %3742 = dma.vmem_to_hbm [thread:$0]  %s3738_s17, 32, %s3740_s18, [#allocation9]  }
 0xa2b   :  { %4880 = dma.done.wait [#allocation6], 64  }
 0xa2c   :  { %4881 = vsyncadd [#allocation6], 4294967232 }
 0xa2d   :  { %4882 = dma.done.wait [#allocation9], 96  }
 0xa2e   :  { %4883 = vsyncadd [#allocation9], 4294967200 }
 0xa2f   :  { %3759 = vsyncpa [#allocation5], 1 }
 0xa30   :  { %3760 = vsyncpa [#allocation6], 1 }
 0xa31   :  { %3761 = vsyncpa [#allocation9], 1 }

</bundles_post_ra>
